<compile_context>
chip_gen: v7x
topology: tpu7x:2x2x1
jax: 0.10.0
libtpu: 0.0.40
codegen_flags: <defaults>
</compile_context>

<pallas_src>
import functools
import math

import numpy as np
import jax
import jax.numpy as jnp
from jax.experimental import pallas as pl
from jax.experimental.pallas import tpu as pltpu

EPS = 1e-5
RP = 128                       # R (=100) zero-padded to one full lane tile
P_HIGH = jax.lax.Precision.HIGHEST


# ------------------------- in-kernel helpers -------------------------

def _bn_relu(h, gamma, beta, nb):
    """Fused BatchNorm1d (training-mode batch stats, biased var) + ReLU.

    h:          (D, N) activations, N = nb*RP; channel r lives in lane
                (n mod RP), batch index b in lane-tile n // RP.
    gamma/beta: (1, RP), zero-padded beyond the real R channels.
    """
    D = h.shape[0]
    inv_cnt = 1.0 / float(nb * D)                    # count = batch * features
    s1 = jnp.sum(h, axis=0, keepdims=True)           # (1, N)  sum
    s2 = jnp.sum(h * h, axis=0, keepdims=True)       # (1, N)  sum of squares

    def fold(row):                                   # (1, N) -> (1, RP)
        acc = row[:, 0:RP]                           # static 128-aligned slices:
        for t in range(1, nb):                       # pure vreg selects, no relayout
            acc = acc + row[:, t * RP:(t + 1) * RP]
        return acc

    mean = fold(s1) * inv_cnt
    var = fold(s2) * inv_cnt - mean * mean           # biased variance, E[h^2]-m^2
    scale = gamma * jax.lax.rsqrt(var + EPS)         # folded gamma
    shift = beta - mean * scale                      # folded beta
    scale = jnp.concatenate([scale] * nb, axis=1)    # (1, N): 128-aligned concat
    shift = jnp.concatenate([shift] * nb, axis=1)
    return jnp.maximum(h * scale + shift, 0.0)       # one mul + one add + relu


# ------------------------------ kernel -------------------------------

def resnet_kernel(x_ref, wcat_ref, w_ref, gb_ref, fcb_ref, out_ref,
                  *, hidden, dout, n_blocks, has_ds):
    """Whole-network forward.  Activation layout: (features, B*RP)."""
    nb = x_ref.shape[1] // RP                        # number of batch lane-tiles
    x = x_ref[...]                                   # (Din, N)

    def dot(w, a):
        return jnp.dot(w, a, preferred_element_type=jnp.float32)

    def gamma_beta(j):
        gb = gb_ref[j]                               # (2, RP)
        return gb[0:1, :], gb[1:2, :]

    # ---- block 0: downsample residual + fc1 share one stacked MXU pass ----
    if has_ds:
        hcat = dot(wcat_ref[...], x)                 # (2H, N)
        res = hcat[0:hidden, :]                      # downsample residual
        h1p = hcat[hidden:2 * hidden, :]             # fc1 pre-activation
    else:
        res = x                                      # identity residual
        h1p = dot(wcat_ref[...], x)
    g, b = gamma_beta(0)
    h1 = _bn_relu(h1p, g, b, nb)
    g, b = gamma_beta(1)
    h2 = _bn_relu(dot(w_ref[0], h1), g, b, nb)
    out = jnp.maximum(h2 + res, 0.0)

    # ---- blocks 1..n_blocks-1 (identity residuals) ----
    # Statically unrolled: the carried value is only `out` (~16 vregs).  If
    # bundle dumps ever show spills, switch to lax.fori_loop over w_ref/gb_ref.
    for i in range(1, n_blocks):
        res = out
        g, b = gamma_beta(2 * i)
        h1 = _bn_relu(dot(w_ref[2 * i - 1], out), g, b, nb)
        g, b = gamma_beta(2 * i + 1)
        h2 = _bn_relu(dot(w_ref[2 * i], h1), g, b, nb)
        out = jnp.maximum(h2 + res, 0.0)

    # ---- fc_out (padded into the weight slab); keep rows [0, dout) ----
    y = dot(w_ref[2 * n_blocks - 1], out)[0:dout, :] + fcb_ref[...]
    out_ref[...] = y                                 # lane-dense (dout, N) store


# ----------------------------- wrapper -------------------------------

def _full_spec(shape):
    n = len(shape)
    return pl.BlockSpec(shape, lambda i, n=n: (0,) * n)


@functools.partial(jax.jit, static_argnames=("has_ds",))
def resnet_forward(x, kp, has_ds=True):
    """x: (B, R, Din) -> (B, R, Dout).  Single fused pallas_call."""
    B, R, Din = x.shape
    H = kp["w_slab"].shape[1]
    dout = kp["fc_b"].shape[0]
    n_blocks = kp["gb"].shape[0] // 2
    N = B * RP

    # Input prep: one tiny fused XLA op -> (Din, B*RP), channels zero-padded.
    xt = jnp.pad(jnp.transpose(x, (2, 0, 1)), ((0, 0), (0, 0), (0, RP - R)))
    x_p = xt.reshape(Din, N)

    kern = functools.partial(resnet_kernel, hidden=H, dout=dout,
                             n_blocks=n_blocks, has_ds=has_ds)
    args = (x_p, kp["w_cat0"], kp["w_slab"], kp["gb"], kp["fc_b"])

    y = pl.pallas_call(
        kern,
        grid=(1,),
        in_specs=[_full_spec(a.shape) for a in args],
        out_specs=_full_spec((dout, N)),
        out_shape=jax.ShapeDtypeStruct((dout, N), jnp.float32),
        compiler_params=pltpu.CompilerParams(dimension_semantics=("arbitrary",)),
    )(*args)

    # Output post: reshape + slice only (no transpose when Dout == 1).
    if dout == 1:
        return y.reshape(B, RP)[:, :R, None]
    return jnp.moveaxis(y.reshape(dout, B, RP), 0, 2)[:, :R, :]


# --------------------------- parameter init --------------------------

def _init_linear_w(key, din, dout):
    bound = 1.0 / math.sqrt(din)
    return jax.random.uniform(key, (dout, din), jnp.float32, -bound, bound)


def _init_block(key, din, dout, R):
    k = jax.random.split(key, 6)
    return dict(
        w1=_init_linear_w(k[0], din, dout),          # PyTorch (Dout, Din) layout
        w2=_init_linear_w(k[1], dout, dout),
        g1=1.0 + 0.1 * jax.random.normal(k[2], (R,), jnp.float32),
        b1=0.1 * jax.random.normal(k[3], (R,), jnp.float32),
        g2=1.0 + 0.1 * jax.random.normal(k[4], (R,), jnp.float32),
        b2=0.1 * jax.random.normal(k[5], (R,), jnp.float32),
    )


def init_resnet(key, input_dim, hidden, output_dim, R, n_blocks=3):
    keys = jax.random.split(key, 2 * n_blocks + 3)
    layer1_blocks = [_init_block(keys[0], input_dim, hidden, R)]
    layer1_blocks += [_init_block(keys[1 + i], hidden, hidden, R) for i in range(n_blocks - 1)]
    layer2_blocks = [_init_block(keys[n_blocks + i], hidden, hidden, R) for i in range(n_blocks)]
    ds = _init_linear_w(keys[2 * n_blocks], input_dim, hidden) if input_dim != hidden else None
    fc_w = _init_linear_w(keys[2 * n_blocks + 1], hidden, output_dim)
    bound = 1.0 / math.sqrt(hidden)
    fc_b = jax.random.uniform(keys[2 * n_blocks + 2], (output_dim,), jnp.float32, -bound, bound)
    return dict(
        layer1=dict(downsample=ds, blocks=layer1_blocks),
        layer2=dict(blocks=layer2_blocks),
        fc_out=(fc_w, fc_b),
    )


def prep_kernel_params(params, R):
    """One-time hoisted packing of all parameters into a few slabs."""
    assert R <= RP
    blocks = params["layer1"]["blocks"] + params["layer2"]["blocks"]
    b0 = blocks[0]
    H = b0["w1"].shape[0]

    ds = params["layer1"]["downsample"]
    has_ds = ds is not None
    # Stack downsample with block-0 fc1 so both share one MXU pass; when
    # input_dim == hidden there is no downsample (identity residual, no eye()).
    w_cat0 = jnp.concatenate([ds, b0["w1"]], axis=0) if has_ds else b0["w1"]

    ws = [b0["w2"]]
    for blk in blocks[1:]:
        ws += [blk["w1"], blk["w2"]]
    fc_w, fc_b = params["fc_out"]
    dout = fc_w.shape[0]
    fc_pad = jnp.zeros((H, H), jnp.float32).at[:dout, :].set(fc_w)
    ws.append(fc_pad)
    w_slab = jnp.stack(ws)                            # (2*n_blocks, H, H)

    pad = lambda v: jnp.pad(v, (0, RP - R))           # zero-pad channel axis
    gbs = []
    for blk in blocks:
        gbs.append(jnp.stack([pad(blk["g1"]), pad(blk["b1"])]))
        gbs.append(jnp.stack([pad(blk["g2"]), pad(blk["b2"])]))
    gb_slab = jnp.stack(gbs)                          # (2*n_blocks, 2, RP)

    kp = dict(w_cat0=w_cat0, w_slab=w_slab, gb=gb_slab,
              fc_b=fc_b.reshape(dout, 1).astype(jnp.float32))
    return kp, has_ds


# ------------------------- pure-JAX reference ------------------------

def _ref_bn_relu(h, g, be):
    mean = h.mean(axis=(0, 2), keepdims=True)
    var = ((h - mean) ** 2).mean(axis=(0, 2), keepdims=True)
    y = (h - mean) / jnp.sqrt(var + EPS) * g.reshape(1, -1, 1) + be.reshape(1, -1, 1)
    return jnp.maximum(y, 0.0)


def _ref_block(x, blk, ds_w):
    res = x if ds_w is None else jnp.einsum("brd,kd->brk", x, ds_w, precision=P_HIGH)
    h1 = _ref_bn_relu(jnp.einsum("brd,kd->brk", x, blk["w1"], precision=P_HIGH),
                      blk["g1"], blk["b1"])
    h2 = _ref_bn_relu(jnp.einsum("brd,kd->brk", h1, blk["w2"], precision=P_HIGH),
                      blk["g2"], blk["b2"])
    return jnp.maximum(h2 + res, 0.0)


def ref_forward(x, params):
    out = x
    for i, blk in enumerate(params["layer1"]["blocks"]):
        out = _ref_block(out, blk, params["layer1"]["downsample"] if i == 0 else None)
    for blk in params["layer2"]["blocks"]:
        out = _ref_block(out, blk, None)
    w, b = params["fc_out"]
    return jnp.einsum("brd,kd->brk", out, w, precision=P_HIGH) + b.reshape(1, 1, -1)


# -------------------------------- main --------------------------------

if __name__ == "__main__":
    B, R, INPUT_DIM, HIDDEN, OUTPUT_DIM = 4, 100, 2, 32, 1   # R fixed to 100 by the module
    key = jax.random.PRNGKey(0)
    kx, kparam = jax.random.split(key)
    x = jax.random.normal(kx, (B, R, INPUT_DIM), jnp.float32)
    params = init_resnet(kparam, INPUT_DIM, HIDDEN, OUTPUT_DIM, R, n_blocks=3)
    kparams, has_ds = prep_kernel_params(params, R)          # hoisted, done once

    y = jax.block_until_ready(resnet_forward(x, kparams, has_ds=has_ds))
    assert y.shape == (B, R, OUTPUT_DIM)

    y_ref = jax.block_until_ready(ref_forward(x, params))
    # Tightened 20x vs the previous 2e-2 (review): everything stays f32, so the
    # only kernel-vs-reference differences are MXU f32 pass decomposition,
    # rsqrt-vs-sqrt and summation order (~1e-5 expected); 1e-3 keeps margin.
    np.testing.assert_allclose(np.asarray(y), np.asarray(y_ref), rtol=1e-3, atol=1e-3)

    print("KERNEL_OK")
</pallas_src>

<mosaic_0001>
module attributes {stable_mosaic.version = 11 : i64} {
  func.func @resnet_kernel(%arg0: i32, %arg1: memref<2x512xf32, #tpu.memory_space<vmem>>, %arg2: memref<64x2xf32, #tpu.memory_space<vmem>>, %arg3: memref<12x32x32xf32, #tpu.memory_space<vmem>>, %arg4: memref<12x2x128xf32, #tpu.memory_space<vmem>>, %arg5: memref<1x1xf32, #tpu.memory_space<vmem>>, %arg6: memref<1x512xf32, #tpu.memory_space<vmem>>) attributes {dimension_semantics = [#tpu.dimension_semantics<arbitrary>], iteration_bounds = array<i64: 1>, scalar_prefetch = 0 : i64, scratch_operands = 0 : i64, tpu.core_type = #tpu.core_type<tc>, window_params = [{pipeline_mode = #tpu.pipeline_mode<synchronous>, transform_indices = @transform_0, window_bounds = array<i64: 2, 512>}, {pipeline_mode = #tpu.pipeline_mode<synchronous>, transform_indices = @transform_1, window_bounds = array<i64: 64, 2>}, {pipeline_mode = #tpu.pipeline_mode<synchronous>, transform_indices = @transform_2, window_bounds = array<i64: 12, 32, 32>}, {pipeline_mode = #tpu.pipeline_mode<synchronous>, transform_indices = @transform_3, window_bounds = array<i64: 12, 2, 128>}, {pipeline_mode = #tpu.pipeline_mode<synchronous>, transform_indices = @transform_4, window_bounds = array<i64: 1, 1>}, {pipeline_mode = #tpu.pipeline_mode<synchronous>, transform_indices = @transform_5, window_bounds = array<i64: 1, 512>}]} {
    %c0 = arith.constant 0 : index
    %c0_0 = arith.constant 0 : index
    %0 = vector.load %arg1[%c0, %c0_0] : memref<2x512xf32, #tpu.memory_space<vmem>>, vector<2x512xf32>
    %c0_1 = arith.constant 0 : index
    %c0_2 = arith.constant 0 : index
    %1 = vector.load %arg2[%c0_1, %c0_2] : memref<64x2xf32, #tpu.memory_space<vmem>>, vector<64x2xf32>
    %cst = arith.constant dense<0.000000e+00> : vector<64x512xf32>
    %2 = tpu.matmul %1, %0, %cst {dimension_numbers = #tpu.dot_dimension_numbers<[1], [0], [0], [1], [0, 0, 1, 1], [], []>} : vector<64x2xf32>, vector<2x512xf32>, vector<64x512xf32> -> vector<64x512xf32>
    %3 = vector.extract_strided_slice %2 {offsets = [0, 0], sizes = [32, 512], strides = [1, 1]} : vector<64x512xf32> to vector<32x512xf32>
    %4 = vector.extract_strided_slice %2 {offsets = [32, 0], sizes = [32, 512], strides = [1, 1]} : vector<64x512xf32> to vector<32x512xf32>
    %c0_3 = arith.constant 0 : index
    %c0_4 = arith.constant 0 : index
    %c0_5 = arith.constant 0 : index
    %5 = vector.load %arg4[%c0_3, %c0_4, %c0_5] : memref<12x2x128xf32, #tpu.memory_space<vmem>>, vector<1x2x128xf32>
    %6 = vector.shape_cast %5 : vector<1x2x128xf32> to vector<2x128xf32>
    %7 = vector.extract_strided_slice %6 {offsets = [0, 0], sizes = [1, 128], strides = [1, 1]} : vector<2x128xf32> to vector<1x128xf32>
    %8 = vector.extract_strided_slice %6 {offsets = [1, 0], sizes = [1, 128], strides = [1, 1]} : vector<2x128xf32> to vector<1x128xf32>
    %cst_6 = arith.constant dense<0.000000e+00> : vector<512xf32>
    %9 = vector.multi_reduction <add>, %4, %cst_6 [0] : vector<32x512xf32> to vector<512xf32>
    %10 = vector.shape_cast %9 : vector<512xf32> to vector<1x512xf32>
    %11 = arith.mulf %4, %4 : vector<32x512xf32>
    %cst_7 = arith.constant dense<0.000000e+00> : vector<512xf32>
    %12 = vector.multi_reduction <add>, %11, %cst_7 [0] : vector<32x512xf32> to vector<512xf32>
    %13 = vector.shape_cast %12 : vector<512xf32> to vector<1x512xf32>
    %14 = vector.extract_strided_slice %10 {offsets = [0, 0], sizes = [1, 128], strides = [1, 1]} : vector<1x512xf32> to vector<1x128xf32>
    %15 = vector.extract_strided_slice %10 {offsets = [0, 128], sizes = [1, 128], strides = [1, 1]} : vector<1x512xf32> to vector<1x128xf32>
    %16 = arith.addf %14, %15 : vector<1x128xf32>
    %17 = vector.extract_strided_slice %10 {offsets = [0, 256], sizes = [1, 128], strides = [1, 1]} : vector<1x512xf32> to vector<1x128xf32>
    %18 = arith.addf %16, %17 : vector<1x128xf32>
    %19 = vector.extract_strided_slice %10 {offsets = [0, 384], sizes = [1, 128], strides = [1, 1]} : vector<1x512xf32> to vector<1x128xf32>
    %20 = arith.addf %18, %19 : vector<1x128xf32>
    %cst_8 = arith.constant 7.812500e-03 : f32
    %21 = vector.broadcast %cst_8 : f32 to vector<1x128xf32>
    %22 = arith.mulf %20, %21 : vector<1x128xf32>
    %23 = vector.extract_strided_slice %13 {offsets = [0, 0], sizes = [1, 128], strides = [1, 1]} : vector<1x512xf32> to vector<1x128xf32>
    %24 = vector.extract_strided_slice %13 {offsets = [0, 128], sizes = [1, 128], strides = [1, 1]} : vector<1x512xf32> to vector<1x128xf32>
    %25 = arith.addf %23, %24 : vector<1x128xf32>
    %26 = vector.extract_strided_slice %13 {offsets = [0, 256], sizes = [1, 128], strides = [1, 1]} : vector<1x512xf32> to vector<1x128xf32>
    %27 = arith.addf %25, %26 : vector<1x128xf32>
    %28 = vector.extract_strided_slice %13 {offsets = [0, 384], sizes = [1, 128], strides = [1, 1]} : vector<1x512xf32> to vector<1x128xf32>
    %29 = arith.addf %27, %28 : vector<1x128xf32>
    %cst_9 = arith.constant 7.812500e-03 : f32
    %30 = vector.broadcast %cst_9 : f32 to vector<1x128xf32>
    %31 = arith.mulf %29, %30 : vector<1x128xf32>
    %32 = arith.mulf %22, %22 : vector<1x128xf32>
    %33 = arith.subf %31, %32 : vector<1x128xf32>
    %cst_10 = arith.constant 9.99999974E-6 : f32
    %34 = vector.broadcast %cst_10 : f32 to vector<1x128xf32>
    %35 = arith.addf %33, %34 : vector<1x128xf32>
    %36 = math.rsqrt %35 : vector<1x128xf32>
    %37 = arith.mulf %7, %36 : vector<1x128xf32>
    %38 = arith.mulf %22, %37 : vector<1x128xf32>
    %39 = arith.subf %8, %38 : vector<1x128xf32>
    %40 = tpu.concatenate %37, %37, %37, %37 in 1 : vector<1x128xf32>, vector<1x128xf32>, vector<1x128xf32>, vector<1x128xf32> -> vector<1x512xf32>
    %41 = tpu.concatenate %39, %39, %39, %39 in 1 : vector<1x128xf32>, vector<1x128xf32>, vector<1x128xf32>, vector<1x128xf32> -> vector<1x512xf32>
    %42 = vector.broadcast %40 : vector<1x512xf32> to vector<32x512xf32>
    %43 = arith.mulf %4, %42 : vector<32x512xf32>
    %44 = vector.broadcast %41 : vector<1x512xf32> to vector<32x512xf32>
    %45 = arith.addf %43, %44 : vector<32x512xf32>
    %cst_11 = arith.constant 0.000000e+00 : f32
    %46 = vector.broadcast %cst_11 : f32 to vector<32x512xf32>
    %47 = arith.maximumf %45, %46 : vector<32x512xf32>
    %c1 = arith.constant 1 : index
    %c0_12 = arith.constant 0 : index
    %c0_13 = arith.constant 0 : index
    %48 = vector.load %arg4[%c1, %c0_12, %c0_13] : memref<12x2x128xf32, #tpu.memory_space<vmem>>, vector<1x2x128xf32>
    %49 = vector.shape_cast %48 : vector<1x2x128xf32> to vector<2x128xf32>
    %50 = vector.extract_strided_slice %49 {offsets = [0, 0], sizes = [1, 128], strides = [1, 1]} : vector<2x128xf32> to vector<1x128xf32>
    %51 = vector.extract_strided_slice %49 {offsets = [1, 0], sizes = [1, 128], strides = [1, 1]} : vector<2x128xf32> to vector<1x128xf32>
    %c0_14 = arith.constant 0 : index
    %c0_15 = arith.constant 0 : index
    %c0_16 = arith.constant 0 : index
    %52 = vector.load %arg3[%c0_14, %c0_15, %c0_16] : memref<12x32x32xf32, #tpu.memory_space<vmem>>, vector<1x32x32xf32>
    %53 = vector.shape_cast %52 : vector<1x32x32xf32> to vector<32x32xf32>
    %cst_17 = arith.constant dense<0.000000e+00> : vector<32x512xf32>
    %54 = tpu.matmul %53, %47, %cst_17 {dimension_numbers = #tpu.dot_dimension_numbers<[1], [0], [0], [1], [0, 0, 1, 1], [], []>} : vector<32x32xf32>, vector<32x512xf32>, vector<32x512xf32> -> vector<32x512xf32>
    %cst_18 = arith.constant dense<0.000000e+00> : vector<512xf32>
    %55 = vector.multi_reduction <add>, %54, %cst_18 [0] : vector<32x512xf32> to vector<512xf32>
    %56 = vector.shape_cast %55 : vector<512xf32> to vector<1x512xf32>
    %57 = arith.mulf %54, %54 : vector<32x512xf32>
    %cst_19 = arith.constant dense<0.000000e+00> : vector<512xf32>
    %58 = vector.multi_reduction <add>, %57, %cst_19 [0] : vector<32x512xf32> to vector<512xf32>
    %59 = vector.shape_cast %58 : vector<512xf32> to vector<1x512xf32>
    %60 = vector.extract_strided_slice %56 {offsets = [0, 0], sizes = [1, 128], strides = [1, 1]} : vector<1x512xf32> to vector<1x128xf32>
    %61 = vector.extract_strided_slice %56 {offsets = [0, 128], sizes = [1, 128], strides = [1, 1]} : vector<1x512xf32> to vector<1x128xf32>
    %62 = arith.addf %60, %61 : vector<1x128xf32>
    %63 = vector.extract_strided_slice %56 {offsets = [0, 256], sizes = [1, 128], strides = [1, 1]} : vector<1x512xf32> to vector<1x128xf32>
    %64 = arith.addf %62, %63 : vector<1x128xf32>
    %65 = vector.extract_strided_slice %56 {offsets = [0, 384], sizes = [1, 128], strides = [1, 1]} : vector<1x512xf32> to vector<1x128xf32>
    %66 = arith.addf %64, %65 : vector<1x128xf32>
    %cst_20 = arith.constant 7.812500e-03 : f32
    %67 = vector.broadcast %cst_20 : f32 to vector<1x128xf32>
    %68 = arith.mulf %66, %67 : vector<1x128xf32>
    %69 = vector.extract_strided_slice %59 {offsets = [0, 0], sizes = [1, 128], strides = [1, 1]} : vector<1x512xf32> to vector<1x128xf32>
    %70 = vector.extract_strided_slice %59 {offsets = [0, 128], sizes = [1, 128], strides = [1, 1]} : vector<1x512xf32> to vector<1x128xf32>
    %71 = arith.addf %69, %70 : vector<1x128xf32>
    %72 = vector.extract_strided_slice %59 {offsets = [0, 256], sizes = [1, 128], strides = [1, 1]} : vector<1x512xf32> to vector<1x128xf32>
    %73 = arith.addf %71, %72 : vector<1x128xf32>
    %74 = vector.extract_strided_slice %59 {offsets = [0, 384], sizes = [1, 128], strides = [1, 1]} : vector<1x512xf32> to vector<1x128xf32>
    %75 = arith.addf %73, %74 : vector<1x128xf32>
    %cst_21 = arith.constant 7.812500e-03 : f32
    %76 = vector.broadcast %cst_21 : f32 to vector<1x128xf32>
    %77 = arith.mulf %75, %76 : vector<1x128xf32>
    %78 = arith.mulf %68, %68 : vector<1x128xf32>
    %79 = arith.subf %77, %78 : vector<1x128xf32>
    %cst_22 = arith.constant 9.99999974E-6 : f32
    %80 = vector.broadcast %cst_22 : f32 to vector<1x128xf32>
    %81 = arith.addf %79, %80 : vector<1x128xf32>
    %82 = math.rsqrt %81 : vector<1x128xf32>
    %83 = arith.mulf %50, %82 : vector<1x128xf32>
    %84 = arith.mulf %68, %83 : vector<1x128xf32>
    %85 = arith.subf %51, %84 : vector<1x128xf32>
    %86 = tpu.concatenate %83, %83, %83, %83 in 1 : vector<1x128xf32>, vector<1x128xf32>, vector<1x128xf32>, vector<1x128xf32> -> vector<1x512xf32>
    %87 = tpu.concatenate %85, %85, %85, %85 in 1 : vector<1x128xf32>, vector<1x128xf32>, vector<1x128xf32>, vector<1x128xf32> -> vector<1x512xf32>
    %88 = vector.broadcast %86 : vector<1x512xf32> to vector<32x512xf32>
    %89 = arith.mulf %54, %88 : vector<32x512xf32>
    %90 = vector.broadcast %87 : vector<1x512xf32> to vector<32x512xf32>
    %91 = arith.addf %89, %90 : vector<32x512xf32>
    %cst_23 = arith.constant 0.000000e+00 : f32
    %92 = vector.broadcast %cst_23 : f32 to vector<32x512xf32>
    %93 = arith.maximumf %91, %92 : vector<32x512xf32>
    %94 = arith.addf %93, %3 : vector<32x512xf32>
    %cst_24 = arith.constant 0.000000e+00 : f32
    %95 = vector.broadcast %cst_24 : f32 to vector<32x512xf32>
    %96 = arith.maximumf %94, %95 : vector<32x512xf32>
    %c2 = arith.constant 2 : index
    %c0_25 = arith.constant 0 : index
    %c0_26 = arith.constant 0 : index
    %97 = vector.load %arg4[%c2, %c0_25, %c0_26] : memref<12x2x128xf32, #tpu.memory_space<vmem>>, vector<1x2x128xf32>
    %98 = vector.shape_cast %97 : vector<1x2x128xf32> to vector<2x128xf32>
    %99 = vector.extract_strided_slice %98 {offsets = [0, 0], sizes = [1, 128], strides = [1, 1]} : vector<2x128xf32> to vector<1x128xf32>
    %100 = vector.extract_strided_slice %98 {offsets = [1, 0], sizes = [1, 128], strides = [1, 1]} : vector<2x128xf32> to vector<1x128xf32>
    %c1_27 = arith.constant 1 : index
    %c0_28 = arith.constant 0 : index
    %c0_29 = arith.constant 0 : index
    %101 = vector.load %arg3[%c1_27, %c0_28, %c0_29] : memref<12x32x32xf32, #tpu.memory_space<vmem>>, vector<1x32x32xf32>
    %102 = vector.shape_cast %101 : vector<1x32x32xf32> to vector<32x32xf32>
    %cst_30 = arith.constant dense<0.000000e+00> : vector<32x512xf32>
    %103 = tpu.matmul %102, %96, %cst_30 {dimension_numbers = #tpu.dot_dimension_numbers<[1], [0], [0], [1], [0, 0, 1, 1], [], []>} : vector<32x32xf32>, vector<32x512xf32>, vector<32x512xf32> -> vector<32x512xf32>
    %cst_31 = arith.constant dense<0.000000e+00> : vector<512xf32>
    %104 = vector.multi_reduction <add>, %103, %cst_31 [0] : vector<32x512xf32> to vector<512xf32>
    %105 = vector.shape_cast %104 : vector<512xf32> to vector<1x512xf32>
    %106 = arith.mulf %103, %103 : vector<32x512xf32>
    %cst_32 = arith.constant dense<0.000000e+00> : vector<512xf32>
    %107 = vector.multi_reduction <add>, %106, %cst_32 [0] : vector<32x512xf32> to vector<512xf32>
    %108 = vector.shape_cast %107 : vector<512xf32> to vector<1x512xf32>
    %109 = vector.extract_strided_slice %105 {offsets = [0, 0], sizes = [1, 128], strides = [1, 1]} : vector<1x512xf32> to vector<1x128xf32>
    %110 = vector.extract_strided_slice %105 {offsets = [0, 128], sizes = [1, 128], strides = [1, 1]} : vector<1x512xf32> to vector<1x128xf32>
    %111 = arith.addf %109, %110 : vector<1x128xf32>
    %112 = vector.extract_strided_slice %105 {offsets = [0, 256], sizes = [1, 128], strides = [1, 1]} : vector<1x512xf32> to vector<1x128xf32>
    %113 = arith.addf %111, %112 : vector<1x128xf32>
    %114 = vector.extract_strided_slice %105 {offsets = [0, 384], sizes = [1, 128], strides = [1, 1]} : vector<1x512xf32> to vector<1x128xf32>
    %115 = arith.addf %113, %114 : vector<1x128xf32>
    %cst_33 = arith.constant 7.812500e-03 : f32
    %116 = vector.broadcast %cst_33 : f32 to vector<1x128xf32>
    %117 = arith.mulf %115, %116 : vector<1x128xf32>
    %118 = vector.extract_strided_slice %108 {offsets = [0, 0], sizes = [1, 128], strides = [1, 1]} : vector<1x512xf32> to vector<1x128xf32>
    %119 = vector.extract_strided_slice %108 {offsets = [0, 128], sizes = [1, 128], strides = [1, 1]} : vector<1x512xf32> to vector<1x128xf32>
    %120 = arith.addf %118, %119 : vector<1x128xf32>
    %121 = vector.extract_strided_slice %108 {offsets = [0, 256], sizes = [1, 128], strides = [1, 1]} : vector<1x512xf32> to vector<1x128xf32>
    %122 = arith.addf %120, %121 : vector<1x128xf32>
    %123 = vector.extract_strided_slice %108 {offsets = [0, 384], sizes = [1, 128], strides = [1, 1]} : vector<1x512xf32> to vector<1x128xf32>
    %124 = arith.addf %122, %123 : vector<1x128xf32>
    %cst_34 = arith.constant 7.812500e-03 : f32
    %125 = vector.broadcast %cst_34 : f32 to vector<1x128xf32>
    %126 = arith.mulf %124, %125 : vector<1x128xf32>
    %127 = arith.mulf %117, %117 : vector<1x128xf32>
    %128 = arith.subf %126, %127 : vector<1x128xf32>
    %cst_35 = arith.constant 9.99999974E-6 : f32
    %129 = vector.broadcast %cst_35 : f32 to vector<1x128xf32>
    %130 = arith.addf %128, %129 : vector<1x128xf32>
    %131 = math.rsqrt %130 : vector<1x128xf32>
    %132 = arith.mulf %99, %131 : vector<1x128xf32>
    %133 = arith.mulf %117, %132 : vector<1x128xf32>
    %134 = arith.subf %100, %133 : vector<1x128xf32>
    %135 = tpu.concatenate %132, %132, %132, %132 in 1 : vector<1x128xf32>, vector<1x128xf32>, vector<1x128xf32>, vector<1x128xf32> -> vector<1x512xf32>
    %136 = tpu.concatenate %134, %134, %134, %134 in 1 : vector<1x128xf32>, vector<1x128xf32>, vector<1x128xf32>, vector<1x128xf32> -> vector<1x512xf32>
    %137 = vector.broadcast %135 : vector<1x512xf32> to vector<32x512xf32>
    %138 = arith.mulf %103, %137 : vector<32x512xf32>
    %139 = vector.broadcast %136 : vector<1x512xf32> to vector<32x512xf32>
    %140 = arith.addf %138, %139 : vector<32x512xf32>
    %cst_36 = arith.constant 0.000000e+00 : f32
    %141 = vector.broadcast %cst_36 : f32 to vector<32x512xf32>
    %142 = arith.maximumf %140, %141 : vector<32x512xf32>
    %c3 = arith.constant 3 : index
    %c0_37 = arith.constant 0 : index
    %c0_38 = arith.constant 0 : index
    %143 = vector.load %arg4[%c3, %c0_37, %c0_38] : memref<12x2x128xf32, #tpu.memory_space<vmem>>, vector<1x2x128xf32>
    %144 = vector.shape_cast %143 : vector<1x2x128xf32> to vector<2x128xf32>
    %145 = vector.extract_strided_slice %144 {offsets = [0, 0], sizes = [1, 128], strides = [1, 1]} : vector<2x128xf32> to vector<1x128xf32>
    %146 = vector.extract_strided_slice %144 {offsets = [1, 0], sizes = [1, 128], strides = [1, 1]} : vector<2x128xf32> to vector<1x128xf32>
    %c2_39 = arith.constant 2 : index
    %c0_40 = arith.constant 0 : index
    %c0_41 = arith.constant 0 : index
    %147 = vector.load %arg3[%c2_39, %c0_40, %c0_41] : memref<12x32x32xf32, #tpu.memory_space<vmem>>, vector<1x32x32xf32>
    %148 = vector.shape_cast %147 : vector<1x32x32xf32> to vector<32x32xf32>
    %cst_42 = arith.constant dense<0.000000e+00> : vector<32x512xf32>
    %149 = tpu.matmul %148, %142, %cst_42 {dimension_numbers = #tpu.dot_dimension_numbers<[1], [0], [0], [1], [0, 0, 1, 1], [], []>} : vector<32x32xf32>, vector<32x512xf32>, vector<32x512xf32> -> vector<32x512xf32>
    %cst_43 = arith.constant dense<0.000000e+00> : vector<512xf32>
    %150 = vector.multi_reduction <add>, %149, %cst_43 [0] : vector<32x512xf32> to vector<512xf32>
    %151 = vector.shape_cast %150 : vector<512xf32> to vector<1x512xf32>
    %152 = arith.mulf %149, %149 : vector<32x512xf32>
    %cst_44 = arith.constant dense<0.000000e+00> : vector<512xf32>
    %153 = vector.multi_reduction <add>, %152, %cst_44 [0] : vector<32x512xf32> to vector<512xf32>
    %154 = vector.shape_cast %153 : vector<512xf32> to vector<1x512xf32>
    %155 = vector.extract_strided_slice %151 {offsets = [0, 0], sizes = [1, 128], strides = [1, 1]} : vector<1x512xf32> to vector<1x128xf32>
    %156 = vector.extract_strided_slice %151 {offsets = [0, 128], sizes = [1, 128], strides = [1, 1]} : vector<1x512xf32> to vector<1x128xf32>
    %157 = arith.addf %155, %156 : vector<1x128xf32>
    %158 = vector.extract_strided_slice %151 {offsets = [0, 256], sizes = [1, 128], strides = [1, 1]} : vector<1x512xf32> to vector<1x128xf32>
    %159 = arith.addf %157, %158 : vector<1x128xf32>
    %160 = vector.extract_strided_slice %151 {offsets = [0, 384], sizes = [1, 128], strides = [1, 1]} : vector<1x512xf32> to vector<1x128xf32>
    %161 = arith.addf %159, %160 : vector<1x128xf32>
    %cst_45 = arith.constant 7.812500e-03 : f32
    %162 = vector.broadcast %cst_45 : f32 to vector<1x128xf32>
    %163 = arith.mulf %161, %162 : vector<1x128xf32>
    %164 = vector.extract_strided_slice %154 {offsets = [0, 0], sizes = [1, 128], strides = [1, 1]} : vector<1x512xf32> to vector<1x128xf32>
    %165 = vector.extract_strided_slice %154 {offsets = [0, 128], sizes = [1, 128], strides = [1, 1]} : vector<1x512xf32> to vector<1x128xf32>
    %166 = arith.addf %164, %165 : vector<1x128xf32>
    %167 = vector.extract_strided_slice %154 {offsets = [0, 256], sizes = [1, 128], strides = [1, 1]} : vector<1x512xf32> to vector<1x128xf32>
    %168 = arith.addf %166, %167 : vector<1x128xf32>
    %169 = vector.extract_strided_slice %154 {offsets = [0, 384], sizes = [1, 128], strides = [1, 1]} : vector<1x512xf32> to vector<1x128xf32>
    %170 = arith.addf %168, %169 : vector<1x128xf32>
    %cst_46 = arith.constant 7.812500e-03 : f32
    %171 = vector.broadcast %cst_46 : f32 to vector<1x128xf32>
    %172 = arith.mulf %170, %171 : vector<1x128xf32>
    %173 = arith.mulf %163, %163 : vector<1x128xf32>
    %174 = arith.subf %172, %173 : vector<1x128xf32>
    %cst_47 = arith.constant 9.99999974E-6 : f32
    %175 = vector.broadcast %cst_47 : f32 to vector<1x128xf32>
    %176 = arith.addf %174, %175 : vector<1x128xf32>
    %177 = math.rsqrt %176 : vector<1x128xf32>
    %178 = arith.mulf %145, %177 : vector<1x128xf32>
    %179 = arith.mulf %163, %178 : vector<1x128xf32>
    %180 = arith.subf %146, %179 : vector<1x128xf32>
    %181 = tpu.concatenate %178, %178, %178, %178 in 1 : vector<1x128xf32>, vector<1x128xf32>, vector<1x128xf32>, vector<1x128xf32> -> vector<1x512xf32>
    %182 = tpu.concatenate %180, %180, %180, %180 in 1 : vector<1x128xf32>, vector<1x128xf32>, vector<1x128xf32>, vector<1x128xf32> -> vector<1x512xf32>
    %183 = vector.broadcast %181 : vector<1x512xf32> to vector<32x512xf32>
    %184 = arith.mulf %149, %183 : vector<32x512xf32>
    %185 = vector.broadcast %182 : vector<1x512xf32> to vector<32x512xf32>
    %186 = arith.addf %184, %185 : vector<32x512xf32>
    %cst_48 = arith.constant 0.000000e+00 : f32
    %187 = vector.broadcast %cst_48 : f32 to vector<32x512xf32>
    %188 = arith.maximumf %186, %187 : vector<32x512xf32>
    %189 = arith.addf %188, %96 : vector<32x512xf32>
    %cst_49 = arith.constant 0.000000e+00 : f32
    %190 = vector.broadcast %cst_49 : f32 to vector<32x512xf32>
    %191 = arith.maximumf %189, %190 : vector<32x512xf32>
    %c4 = arith.constant 4 : index
    %c0_50 = arith.constant 0 : index
    %c0_51 = arith.constant 0 : index
    %192 = vector.load %arg4[%c4, %c0_50, %c0_51] : memref<12x2x128xf32, #tpu.memory_space<vmem>>, vector<1x2x128xf32>
    %193 = vector.shape_cast %192 : vector<1x2x128xf32> to vector<2x128xf32>
    %194 = vector.extract_strided_slice %193 {offsets = [0, 0], sizes = [1, 128], strides = [1, 1]} : vector<2x128xf32> to vector<1x128xf32>
    %195 = vector.extract_strided_slice %193 {offsets = [1, 0], sizes = [1, 128], strides = [1, 1]} : vector<2x128xf32> to vector<1x128xf32>
    %c3_52 = arith.constant 3 : index
    %c0_53 = arith.constant 0 : index
    %c0_54 = arith.constant 0 : index
    %196 = vector.load %arg3[%c3_52, %c0_53, %c0_54] : memref<12x32x32xf32, #tpu.memory_space<vmem>>, vector<1x32x32xf32>
    %197 = vector.shape_cast %196 : vector<1x32x32xf32> to vector<32x32xf32>
    %cst_55 = arith.constant dense<0.000000e+00> : vector<32x512xf32>
    %198 = tpu.matmul %197, %191, %cst_55 {dimension_numbers = #tpu.dot_dimension_numbers<[1], [0], [0], [1], [0, 0, 1, 1], [], []>} : vector<32x32xf32>, vector<32x512xf32>, vector<32x512xf32> -> vector<32x512xf32>
    %cst_56 = arith.constant dense<0.000000e+00> : vector<512xf32>
    %199 = vector.multi_reduction <add>, %198, %cst_56 [0] : vector<32x512xf32> to vector<512xf32>
    %200 = vector.shape_cast %199 : vector<512xf32> to vector<1x512xf32>
    %201 = arith.mulf %198, %198 : vector<32x512xf32>
    %cst_57 = arith.constant dense<0.000000e+00> : vector<512xf32>
    %202 = vector.multi_reduction <add>, %201, %cst_57 [0] : vector<32x512xf32> to vector<512xf32>
    %203 = vector.shape_cast %202 : vector<512xf32> to vector<1x512xf32>
    %204 = vector.extract_strided_slice %200 {offsets = [0, 0], sizes = [1, 128], strides = [1, 1]} : vector<1x512xf32> to vector<1x128xf32>
    %205 = vector.extract_strided_slice %200 {offsets = [0, 128], sizes = [1, 128], strides = [1, 1]} : vector<1x512xf32> to vector<1x128xf32>
    %206 = arith.addf %204, %205 : vector<1x128xf32>
    %207 = vector.extract_strided_slice %200 {offsets = [0, 256], sizes = [1, 128], strides = [1, 1]} : vector<1x512xf32> to vector<1x128xf32>
    %208 = arith.addf %206, %207 : vector<1x128xf32>
    %209 = vector.extract_strided_slice %200 {offsets = [0, 384], sizes = [1, 128], strides = [1, 1]} : vector<1x512xf32> to vector<1x128xf32>
    %210 = arith.addf %208, %209 : vector<1x128xf32>
    %cst_58 = arith.constant 7.812500e-03 : f32
    %211 = vector.broadcast %cst_58 : f32 to vector<1x128xf32>
    %212 = arith.mulf %210, %211 : vector<1x128xf32>
    %213 = vector.extract_strided_slice %203 {offsets = [0, 0], sizes = [1, 128], strides = [1, 1]} : vector<1x512xf32> to vector<1x128xf32>
    %214 = vector.extract_strided_slice %203 {offsets = [0, 128], sizes = [1, 128], strides = [1, 1]} : vector<1x512xf32> to vector<1x128xf32>
    %215 = arith.addf %213, %214 : vector<1x128xf32>
    %216 = vector.extract_strided_slice %203 {offsets = [0, 256], sizes = [1, 128], strides = [1, 1]} : vector<1x512xf32> to vector<1x128xf32>
    %217 = arith.addf %215, %216 : vector<1x128xf32>
    %218 = vector.extract_strided_slice %203 {offsets = [0, 384], sizes = [1, 128], strides = [1, 1]} : vector<1x512xf32> to vector<1x128xf32>
    %219 = arith.addf %217, %218 : vector<1x128xf32>
    %cst_59 = arith.constant 7.812500e-03 : f32
    %220 = vector.broadcast %cst_59 : f32 to vector<1x128xf32>
    %221 = arith.mulf %219, %220 : vector<1x128xf32>
    %222 = arith.mulf %212, %212 : vector<1x128xf32>
    %223 = arith.subf %221, %222 : vector<1x128xf32>
    %cst_60 = arith.constant 9.99999974E-6 : f32
    %224 = vector.broadcast %cst_60 : f32 to vector<1x128xf32>
    %225 = arith.addf %223, %224 : vector<1x128xf32>
    %226 = math.rsqrt %225 : vector<1x128xf32>
    %227 = arith.mulf %194, %226 : vector<1x128xf32>
    %228 = arith.mulf %212, %227 : vector<1x128xf32>
    %229 = arith.subf %195, %228 : vector<1x128xf32>
    %230 = tpu.concatenate %227, %227, %227, %227 in 1 : vector<1x128xf32>, vector<1x128xf32>, vector<1x128xf32>, vector<1x128xf32> -> vector<1x512xf32>
    %231 = tpu.concatenate %229, %229, %229, %229 in 1 : vector<1x128xf32>, vector<1x128xf32>, vector<1x128xf32>, vector<1x128xf32> -> vector<1x512xf32>
    %232 = vector.broadcast %230 : vector<1x512xf32> to vector<32x512xf32>
    %233 = arith.mulf %198, %232 : vector<32x512xf32>
    %234 = vector.broadcast %231 : vector<1x512xf32> to vector<32x512xf32>
    %235 = arith.addf %233, %234 : vector<32x512xf32>
    %cst_61 = arith.constant 0.000000e+00 : f32
    %236 = vector.broadcast %cst_61 : f32 to vector<32x512xf32>
    %237 = arith.maximumf %235, %236 : vector<32x512xf32>
    %c5 = arith.constant 5 : index
    %c0_62 = arith.constant 0 : index
    %c0_63 = arith.constant 0 : index
    %238 = vector.load %arg4[%c5, %c0_62, %c0_63] : memref<12x2x128xf32, #tpu.memory_space<vmem>>, vector<1x2x128xf32>
    %239 = vector.shape_cast %238 : vector<1x2x128xf32> to vector<2x128xf32>
    %240 = vector.extract_strided_slice %239 {offsets = [0, 0], sizes = [1, 128], strides = [1, 1]} : vector<2x128xf32> to vector<1x128xf32>
    %241 = vector.extract_strided_slice %239 {offsets = [1, 0], sizes = [1, 128], strides = [1, 1]} : vector<2x128xf32> to vector<1x128xf32>
    %c4_64 = arith.constant 4 : index
    %c0_65 = arith.constant 0 : index
    %c0_66 = arith.constant 0 : index
    %242 = vector.load %arg3[%c4_64, %c0_65, %c0_66] : memref<12x32x32xf32, #tpu.memory_space<vmem>>, vector<1x32x32xf32>
    %243 = vector.shape_cast %242 : vector<1x32x32xf32> to vector<32x32xf32>
    %cst_67 = arith.constant dense<0.000000e+00> : vector<32x512xf32>
    %244 = tpu.matmul %243, %237, %cst_67 {dimension_numbers = #tpu.dot_dimension_numbers<[1], [0], [0], [1], [0, 0, 1, 1], [], []>} : vector<32x32xf32>, vector<32x512xf32>, vector<32x512xf32> -> vector<32x512xf32>
    %cst_68 = arith.constant dense<0.000000e+00> : vector<512xf32>
    %245 = vector.multi_reduction <add>, %244, %cst_68 [0] : vector<32x512xf32> to vector<512xf32>
    %246 = vector.shape_cast %245 : vector<512xf32> to vector<1x512xf32>
    %247 = arith.mulf %244, %244 : vector<32x512xf32>
    %cst_69 = arith.constant dense<0.000000e+00> : vector<512xf32>
    %248 = vector.multi_reduction <add>, %247, %cst_69 [0] : vector<32x512xf32> to vector<512xf32>
    %249 = vector.shape_cast %248 : vector<512xf32> to vector<1x512xf32>
    %250 = vector.extract_strided_slice %246 {offsets = [0, 0], sizes = [1, 128], strides = [1, 1]} : vector<1x512xf32> to vector<1x128xf32>
    %251 = vector.extract_strided_slice %246 {offsets = [0, 128], sizes = [1, 128], strides = [1, 1]} : vector<1x512xf32> to vector<1x128xf32>
    %252 = arith.addf %250, %251 : vector<1x128xf32>
    %253 = vector.extract_strided_slice %246 {offsets = [0, 256], sizes = [1, 128], strides = [1, 1]} : vector<1x512xf32> to vector<1x128xf32>
    %254 = arith.addf %252, %253 : vector<1x128xf32>
    %255 = vector.extract_strided_slice %246 {offsets = [0, 384], sizes = [1, 128], strides = [1, 1]} : vector<1x512xf32> to vector<1x128xf32>
    %256 = arith.addf %254, %255 : vector<1x128xf32>
    %cst_70 = arith.constant 7.812500e-03 : f32
    %257 = vector.broadcast %cst_70 : f32 to vector<1x128xf32>
    %258 = arith.mulf %256, %257 : vector<1x128xf32>
    %259 = vector.extract_strided_slice %249 {offsets = [0, 0], sizes = [1, 128], strides = [1, 1]} : vector<1x512xf32> to vector<1x128xf32>
    %260 = vector.extract_strided_slice %249 {offsets = [0, 128], sizes = [1, 128], strides = [1, 1]} : vector<1x512xf32> to vector<1x128xf32>
    %261 = arith.addf %259, %260 : vector<1x128xf32>
    %262 = vector.extract_strided_slice %249 {offsets = [0, 256], sizes = [1, 128], strides = [1, 1]} : vector<1x512xf32> to vector<1x128xf32>
    %263 = arith.addf %261, %262 : vector<1x128xf32>
    %264 = vector.extract_strided_slice %249 {offsets = [0, 384], sizes = [1, 128], strides = [1, 1]} : vector<1x512xf32> to vector<1x128xf32>
    %265 = arith.addf %263, %264 : vector<1x128xf32>
    %cst_71 = arith.constant 7.812500e-03 : f32
    %266 = vector.broadcast %cst_71 : f32 to vector<1x128xf32>
    %267 = arith.mulf %265, %266 : vector<1x128xf32>
    %268 = arith.mulf %258, %258 : vector<1x128xf32>
    %269 = arith.subf %267, %268 : vector<1x128xf32>
    %cst_72 = arith.constant 9.99999974E-6 : f32
    %270 = vector.broadcast %cst_72 : f32 to vector<1x128xf32>
    %271 = arith.addf %269, %270 : vector<1x128xf32>
    %272 = math.rsqrt %271 : vector<1x128xf32>
    %273 = arith.mulf %240, %272 : vector<1x128xf32>
    %274 = arith.mulf %258, %273 : vector<1x128xf32>
    %275 = arith.subf %241, %274 : vector<1x128xf32>
    %276 = tpu.concatenate %273, %273, %273, %273 in 1 : vector<1x128xf32>, vector<1x128xf32>, vector<1x128xf32>, vector<1x128xf32> -> vector<1x512xf32>
    %277 = tpu.concatenate %275, %275, %275, %275 in 1 : vector<1x128xf32>, vector<1x128xf32>, vector<1x128xf32>, vector<1x128xf32> -> vector<1x512xf32>
    %278 = vector.broadcast %276 : vector<1x512xf32> to vector<32x512xf32>
    %279 = arith.mulf %244, %278 : vector<32x512xf32>
    %280 = vector.broadcast %277 : vector<1x512xf32> to vector<32x512xf32>
    %281 = arith.addf %279, %280 : vector<32x512xf32>
    %cst_73 = arith.constant 0.000000e+00 : f32
    %282 = vector.broadcast %cst_73 : f32 to vector<32x512xf32>
    %283 = arith.maximumf %281, %282 : vector<32x512xf32>
    %284 = arith.addf %283, %191 : vector<32x512xf32>
    %cst_74 = arith.constant 0.000000e+00 : f32
    %285 = vector.broadcast %cst_74 : f32 to vector<32x512xf32>
    %286 = arith.maximumf %284, %285 : vector<32x512xf32>
    %c6 = arith.constant 6 : index
    %c0_75 = arith.constant 0 : index
    %c0_76 = arith.constant 0 : index
    %287 = vector.load %arg4[%c6, %c0_75, %c0_76] : memref<12x2x128xf32, #tpu.memory_space<vmem>>, vector<1x2x128xf32>
    %288 = vector.shape_cast %287 : vector<1x2x128xf32> to vector<2x128xf32>
    %289 = vector.extract_strided_slice %288 {offsets = [0, 0], sizes = [1, 128], strides = [1, 1]} : vector<2x128xf32> to vector<1x128xf32>
    %290 = vector.extract_strided_slice %288 {offsets = [1, 0], sizes = [1, 128], strides = [1, 1]} : vector<2x128xf32> to vector<1x128xf32>
    %c5_77 = arith.constant 5 : index
    %c0_78 = arith.constant 0 : index
    %c0_79 = arith.constant 0 : index
    %291 = vector.load %arg3[%c5_77, %c0_78, %c0_79] : memref<12x32x32xf32, #tpu.memory_space<vmem>>, vector<1x32x32xf32>
    %292 = vector.shape_cast %291 : vector<1x32x32xf32> to vector<32x32xf32>
    %cst_80 = arith.constant dense<0.000000e+00> : vector<32x512xf32>
    %293 = tpu.matmul %292, %286, %cst_80 {dimension_numbers = #tpu.dot_dimension_numbers<[1], [0], [0], [1], [0, 0, 1, 1], [], []>} : vector<32x32xf32>, vector<32x512xf32>, vector<32x512xf32> -> vector<32x512xf32>
    %cst_81 = arith.constant dense<0.000000e+00> : vector<512xf32>
    %294 = vector.multi_reduction <add>, %293, %cst_81 [0] : vector<32x512xf32> to vector<512xf32>
    %295 = vector.shape_cast %294 : vector<512xf32> to vector<1x512xf32>
    %296 = arith.mulf %293, %293 : vector<32x512xf32>
    %cst_82 = arith.constant dense<0.000000e+00> : vector<512xf32>
    %297 = vector.multi_reduction <add>, %296, %cst_82 [0] : vector<32x512xf32> to vector<512xf32>
    %298 = vector.shape_cast %297 : vector<512xf32> to vector<1x512xf32>
    %299 = vector.extract_strided_slice %295 {offsets = [0, 0], sizes = [1, 128], strides = [1, 1]} : vector<1x512xf32> to vector<1x128xf32>
    %300 = vector.extract_strided_slice %295 {offsets = [0, 128], sizes = [1, 128], strides = [1, 1]} : vector<1x512xf32> to vector<1x128xf32>
    %301 = arith.addf %299, %300 : vector<1x128xf32>
    %302 = vector.extract_strided_slice %295 {offsets = [0, 256], sizes = [1, 128], strides = [1, 1]} : vector<1x512xf32> to vector<1x128xf32>
    %303 = arith.addf %301, %302 : vector<1x128xf32>
    %304 = vector.extract_strided_slice %295 {offsets = [0, 384], sizes = [1, 128], strides = [1, 1]} : vector<1x512xf32> to vector<1x128xf32>
    %305 = arith.addf %303, %304 : vector<1x128xf32>
    %cst_83 = arith.constant 7.812500e-03 : f32
    %306 = vector.broadcast %cst_83 : f32 to vector<1x128xf32>
    %307 = arith.mulf %305, %306 : vector<1x128xf32>
    %308 = vector.extract_strided_slice %298 {offsets = [0, 0], sizes = [1, 128], strides = [1, 1]} : vector<1x512xf32> to vector<1x128xf32>
    %309 = vector.extract_strided_slice %298 {offsets = [0, 128], sizes = [1, 128], strides = [1, 1]} : vector<1x512xf32> to vector<1x128xf32>
    %310 = arith.addf %308, %309 : vector<1x128xf32>
    %311 = vector.extract_strided_slice %298 {offsets = [0, 256], sizes = [1, 128], strides = [1, 1]} : vector<1x512xf32> to vector<1x128xf32>
    %312 = arith.addf %310, %311 : vector<1x128xf32>
    %313 = vector.extract_strided_slice %298 {offsets = [0, 384], sizes = [1, 128], strides = [1, 1]} : vector<1x512xf32> to vector<1x128xf32>
    %314 = arith.addf %312, %313 : vector<1x128xf32>
    %cst_84 = arith.constant 7.812500e-03 : f32
    %315 = vector.broadcast %cst_84 : f32 to vector<1x128xf32>
    %316 = arith.mulf %314, %315 : vector<1x128xf32>
    %317 = arith.mulf %307, %307 : vector<1x128xf32>
    %318 = arith.subf %316, %317 : vector<1x128xf32>
    %cst_85 = arith.constant 9.99999974E-6 : f32
    %319 = vector.broadcast %cst_85 : f32 to vector<1x128xf32>
    %320 = arith.addf %318, %319 : vector<1x128xf32>
    %321 = math.rsqrt %320 : vector<1x128xf32>
    %322 = arith.mulf %289, %321 : vector<1x128xf32>
    %323 = arith.mulf %307, %322 : vector<1x128xf32>
    %324 = arith.subf %290, %323 : vector<1x128xf32>
    %325 = tpu.concatenate %322, %322, %322, %322 in 1 : vector<1x128xf32>, vector<1x128xf32>, vector<1x128xf32>, vector<1x128xf32> -> vector<1x512xf32>
    %326 = tpu.concatenate %324, %324, %324, %324 in 1 : vector<1x128xf32>, vector<1x128xf32>, vector<1x128xf32>, vector<1x128xf32> -> vector<1x512xf32>
    %327 = vector.broadcast %325 : vector<1x512xf32> to vector<32x512xf32>
    %328 = arith.mulf %293, %327 : vector<32x512xf32>
    %329 = vector.broadcast %326 : vector<1x512xf32> to vector<32x512xf32>
    %330 = arith.addf %328, %329 : vector<32x512xf32>
    %cst_86 = arith.constant 0.000000e+00 : f32
    %331 = vector.broadcast %cst_86 : f32 to vector<32x512xf32>
    %332 = arith.maximumf %330, %331 : vector<32x512xf32>
    %c7 = arith.constant 7 : index
    %c0_87 = arith.constant 0 : index
    %c0_88 = arith.constant 0 : index
    %333 = vector.load %arg4[%c7, %c0_87, %c0_88] : memref<12x2x128xf32, #tpu.memory_space<vmem>>, vector<1x2x128xf32>
    %334 = vector.shape_cast %333 : vector<1x2x128xf32> to vector<2x128xf32>
    %335 = vector.extract_strided_slice %334 {offsets = [0, 0], sizes = [1, 128], strides = [1, 1]} : vector<2x128xf32> to vector<1x128xf32>
    %336 = vector.extract_strided_slice %334 {offsets = [1, 0], sizes = [1, 128], strides = [1, 1]} : vector<2x128xf32> to vector<1x128xf32>
    %c6_89 = arith.constant 6 : index
    %c0_90 = arith.constant 0 : index
    %c0_91 = arith.constant 0 : index
    %337 = vector.load %arg3[%c6_89, %c0_90, %c0_91] : memref<12x32x32xf32, #tpu.memory_space<vmem>>, vector<1x32x32xf32>
    %338 = vector.shape_cast %337 : vector<1x32x32xf32> to vector<32x32xf32>
    %cst_92 = arith.constant dense<0.000000e+00> : vector<32x512xf32>
    %339 = tpu.matmul %338, %332, %cst_92 {dimension_numbers = #tpu.dot_dimension_numbers<[1], [0], [0], [1], [0, 0, 1, 1], [], []>} : vector<32x32xf32>, vector<32x512xf32>, vector<32x512xf32> -> vector<32x512xf32>
    %cst_93 = arith.constant dense<0.000000e+00> : vector<512xf32>
    %340 = vector.multi_reduction <add>, %339, %cst_93 [0] : vector<32x512xf32> to vector<512xf32>
    %341 = vector.shape_cast %340 : vector<512xf32> to vector<1x512xf32>
    %342 = arith.mulf %339, %339 : vector<32x512xf32>
    %cst_94 = arith.constant dense<0.000000e+00> : vector<512xf32>
    %343 = vector.multi_reduction <add>, %342, %cst_94 [0] : vector<32x512xf32> to vector<512xf32>
    %344 = vector.shape_cast %343 : vector<512xf32> to vector<1x512xf32>
    %345 = vector.extract_strided_slice %341 {offsets = [0, 0], sizes = [1, 128], strides = [1, 1]} : vector<1x512xf32> to vector<1x128xf32>
    %346 = vector.extract_strided_slice %341 {offsets = [0, 128], sizes = [1, 128], strides = [1, 1]} : vector<1x512xf32> to vector<1x128xf32>
    %347 = arith.addf %345, %346 : vector<1x128xf32>
    %348 = vector.extract_strided_slice %341 {offsets = [0, 256], sizes = [1, 128], strides = [1, 1]} : vector<1x512xf32> to vector<1x128xf32>
    %349 = arith.addf %347, %348 : vector<1x128xf32>
    %350 = vector.extract_strided_slice %341 {offsets = [0, 384], sizes = [1, 128], strides = [1, 1]} : vector<1x512xf32> to vector<1x128xf32>
    %351 = arith.addf %349, %350 : vector<1x128xf32>
    %cst_95 = arith.constant 7.812500e-03 : f32
    %352 = vector.broadcast %cst_95 : f32 to vector<1x128xf32>
    %353 = arith.mulf %351, %352 : vector<1x128xf32>
    %354 = vector.extract_strided_slice %344 {offsets = [0, 0], sizes = [1, 128], strides = [1, 1]} : vector<1x512xf32> to vector<1x128xf32>
    %355 = vector.extract_strided_slice %344 {offsets = [0, 128], sizes = [1, 128], strides = [1, 1]} : vector<1x512xf32> to vector<1x128xf32>
    %356 = arith.addf %354, %355 : vector<1x128xf32>
    %357 = vector.extract_strided_slice %344 {offsets = [0, 256], sizes = [1, 128], strides = [1, 1]} : vector<1x512xf32> to vector<1x128xf32>
    %358 = arith.addf %356, %357 : vector<1x128xf32>
    %359 = vector.extract_strided_slice %344 {offsets = [0, 384], sizes = [1, 128], strides = [1, 1]} : vector<1x512xf32> to vector<1x128xf32>
    %360 = arith.addf %358, %359 : vector<1x128xf32>
    %cst_96 = arith.constant 7.812500e-03 : f32
    %361 = vector.broadcast %cst_96 : f32 to vector<1x128xf32>
    %362 = arith.mulf %360, %361 : vector<1x128xf32>
    %363 = arith.mulf %353, %353 : vector<1x128xf32>
    %364 = arith.subf %362, %363 : vector<1x128xf32>
    %cst_97 = arith.constant 9.99999974E-6 : f32
    %365 = vector.broadcast %cst_97 : f32 to vector<1x128xf32>
    %366 = arith.addf %364, %365 : vector<1x128xf32>
    %367 = math.rsqrt %366 : vector<1x128xf32>
    %368 = arith.mulf %335, %367 : vector<1x128xf32>
    %369 = arith.mulf %353, %368 : vector<1x128xf32>
    %370 = arith.subf %336, %369 : vector<1x128xf32>
    %371 = tpu.concatenate %368, %368, %368, %368 in 1 : vector<1x128xf32>, vector<1x128xf32>, vector<1x128xf32>, vector<1x128xf32> -> vector<1x512xf32>
    %372 = tpu.concatenate %370, %370, %370, %370 in 1 : vector<1x128xf32>, vector<1x128xf32>, vector<1x128xf32>, vector<1x128xf32> -> vector<1x512xf32>
    %373 = vector.broadcast %371 : vector<1x512xf32> to vector<32x512xf32>
    %374 = arith.mulf %339, %373 : vector<32x512xf32>
    %375 = vector.broadcast %372 : vector<1x512xf32> to vector<32x512xf32>
    %376 = arith.addf %374, %375 : vector<32x512xf32>
    %cst_98 = arith.constant 0.000000e+00 : f32
    %377 = vector.broadcast %cst_98 : f32 to vector<32x512xf32>
    %378 = arith.maximumf %376, %377 : vector<32x512xf32>
    %379 = arith.addf %378, %286 : vector<32x512xf32>
    %cst_99 = arith.constant 0.000000e+00 : f32
    %380 = vector.broadcast %cst_99 : f32 to vector<32x512xf32>
    %381 = arith.maximumf %379, %380 : vector<32x512xf32>
    %c8 = arith.constant 8 : index
    %c0_100 = arith.constant 0 : index
    %c0_101 = arith.constant 0 : index
    %382 = vector.load %arg4[%c8, %c0_100, %c0_101] : memref<12x2x128xf32, #tpu.memory_space<vmem>>, vector<1x2x128xf32>
    %383 = vector.shape_cast %382 : vector<1x2x128xf32> to vector<2x128xf32>
    %384 = vector.extract_strided_slice %383 {offsets = [0, 0], sizes = [1, 128], strides = [1, 1]} : vector<2x128xf32> to vector<1x128xf32>
    %385 = vector.extract_strided_slice %383 {offsets = [1, 0], sizes = [1, 128], strides = [1, 1]} : vector<2x128xf32> to vector<1x128xf32>
    %c7_102 = arith.constant 7 : index
    %c0_103 = arith.constant 0 : index
    %c0_104 = arith.constant 0 : index
    %386 = vector.load %arg3[%c7_102, %c0_103, %c0_104] : memref<12x32x32xf32, #tpu.memory_space<vmem>>, vector<1x32x32xf32>
    %387 = vector.shape_cast %386 : vector<1x32x32xf32> to vector<32x32xf32>
    %cst_105 = arith.constant dense<0.000000e+00> : vector<32x512xf32>
    %388 = tpu.matmul %387, %381, %cst_105 {dimension_numbers = #tpu.dot_dimension_numbers<[1], [0], [0], [1], [0, 0, 1, 1], [], []>} : vector<32x32xf32>, vector<32x512xf32>, vector<32x512xf32> -> vector<32x512xf32>
    %cst_106 = arith.constant dense<0.000000e+00> : vector<512xf32>
    %389 = vector.multi_reduction <add>, %388, %cst_106 [0] : vector<32x512xf32> to vector<512xf32>
    %390 = vector.shape_cast %389 : vector<512xf32> to vector<1x512xf32>
    %391 = arith.mulf %388, %388 : vector<32x512xf32>
    %cst_107 = arith.constant dense<0.000000e+00> : vector<512xf32>
    %392 = vector.multi_reduction <add>, %391, %cst_107 [0] : vector<32x512xf32> to vector<512xf32>
    %393 = vector.shape_cast %392 : vector<512xf32> to vector<1x512xf32>
    %394 = vector.extract_strided_slice %390 {offsets = [0, 0], sizes = [1, 128], strides = [1, 1]} : vector<1x512xf32> to vector<1x128xf32>
    %395 = vector.extract_strided_slice %390 {offsets = [0, 128], sizes = [1, 128], strides = [1, 1]} : vector<1x512xf32> to vector<1x128xf32>
    %396 = arith.addf %394, %395 : vector<1x128xf32>
    %397 = vector.extract_strided_slice %390 {offsets = [0, 256], sizes = [1, 128], strides = [1, 1]} : vector<1x512xf32> to vector<1x128xf32>
    %398 = arith.addf %396, %397 : vector<1x128xf32>
    %399 = vector.extract_strided_slice %390 {offsets = [0, 384], sizes = [1, 128], strides = [1, 1]} : vector<1x512xf32> to vector<1x128xf32>
    %400 = arith.addf %398, %399 : vector<1x128xf32>
    %cst_108 = arith.constant 7.812500e-03 : f32
    %401 = vector.broadcast %cst_108 : f32 to vector<1x128xf32>
    %402 = arith.mulf %400, %401 : vector<1x128xf32>
    %403 = vector.extract_strided_slice %393 {offsets = [0, 0], sizes = [1, 128], strides = [1, 1]} : vector<1x512xf32> to vector<1x128xf32>
    %404 = vector.extract_strided_slice %393 {offsets = [0, 128], sizes = [1, 128], strides = [1, 1]} : vector<1x512xf32> to vector<1x128xf32>
    %405 = arith.addf %403, %404 : vector<1x128xf32>
    %406 = vector.extract_strided_slice %393 {offsets = [0, 256], sizes = [1, 128], strides = [1, 1]} : vector<1x512xf32> to vector<1x128xf32>
    %407 = arith.addf %405, %406 : vector<1x128xf32>
    %408 = vector.extract_strided_slice %393 {offsets = [0, 384], sizes = [1, 128], strides = [1, 1]} : vector<1x512xf32> to vector<1x128xf32>
    %409 = arith.addf %407, %408 : vector<1x128xf32>
    %cst_109 = arith.constant 7.812500e-03 : f32
    %410 = vector.broadcast %cst_109 : f32 to vector<1x128xf32>
    %411 = arith.mulf %409, %410 : vector<1x128xf32>
    %412 = arith.mulf %402, %402 : vector<1x128xf32>
    %413 = arith.subf %411, %412 : vector<1x128xf32>
    %cst_110 = arith.constant 9.99999974E-6 : f32
    %414 = vector.broadcast %cst_110 : f32 to vector<1x128xf32>
    %415 = arith.addf %413, %414 : vector<1x128xf32>
    %416 = math.rsqrt %415 : vector<1x128xf32>
    %417 = arith.mulf %384, %416 : vector<1x128xf32>
    %418 = arith.mulf %402, %417 : vector<1x128xf32>
    %419 = arith.subf %385, %418 : vector<1x128xf32>
    %420 = tpu.concatenate %417, %417, %417, %417 in 1 : vector<1x128xf32>, vector<1x128xf32>, vector<1x128xf32>, vector<1x128xf32> -> vector<1x512xf32>
    %421 = tpu.concatenate %419, %419, %419, %419 in 1 : vector<1x128xf32>, vector<1x128xf32>, vector<1x128xf32>, vector<1x128xf32> -> vector<1x512xf32>
    %422 = vector.broadcast %420 : vector<1x512xf32> to vector<32x512xf32>
    %423 = arith.mulf %388, %422 : vector<32x512xf32>
    %424 = vector.broadcast %421 : vector<1x512xf32> to vector<32x512xf32>
    %425 = arith.addf %423, %424 : vector<32x512xf32>
    %cst_111 = arith.constant 0.000000e+00 : f32
    %426 = vector.broadcast %cst_111 : f32 to vector<32x512xf32>
    %427 = arith.maximumf %425, %426 : vector<32x512xf32>
    %c9 = arith.constant 9 : index
    %c0_112 = arith.constant 0 : index
    %c0_113 = arith.constant 0 : index
    %428 = vector.load %arg4[%c9, %c0_112, %c0_113] : memref<12x2x128xf32, #tpu.memory_space<vmem>>, vector<1x2x128xf32>
    %429 = vector.shape_cast %428 : vector<1x2x128xf32> to vector<2x128xf32>
    %430 = vector.extract_strided_slice %429 {offsets = [0, 0], sizes = [1, 128], strides = [1, 1]} : vector<2x128xf32> to vector<1x128xf32>
    %431 = vector.extract_strided_slice %429 {offsets = [1, 0], sizes = [1, 128], strides = [1, 1]} : vector<2x128xf32> to vector<1x128xf32>
    %c8_114 = arith.constant 8 : index
    %c0_115 = arith.constant 0 : index
    %c0_116 = arith.constant 0 : index
    %432 = vector.load %arg3[%c8_114, %c0_115, %c0_116] : memref<12x32x32xf32, #tpu.memory_space<vmem>>, vector<1x32x32xf32>
    %433 = vector.shape_cast %432 : vector<1x32x32xf32> to vector<32x32xf32>
    %cst_117 = arith.constant dense<0.000000e+00> : vector<32x512xf32>
    %434 = tpu.matmul %433, %427, %cst_117 {dimension_numbers = #tpu.dot_dimension_numbers<[1], [0], [0], [1], [0, 0, 1, 1], [], []>} : vector<32x32xf32>, vector<32x512xf32>, vector<32x512xf32> -> vector<32x512xf32>
    %cst_118 = arith.constant dense<0.000000e+00> : vector<512xf32>
    %435 = vector.multi_reduction <add>, %434, %cst_118 [0] : vector<32x512xf32> to vector<512xf32>
    %436 = vector.shape_cast %435 : vector<512xf32> to vector<1x512xf32>
    %437 = arith.mulf %434, %434 : vector<32x512xf32>
    %cst_119 = arith.constant dense<0.000000e+00> : vector<512xf32>
    %438 = vector.multi_reduction <add>, %437, %cst_119 [0] : vector<32x512xf32> to vector<512xf32>
    %439 = vector.shape_cast %438 : vector<512xf32> to vector<1x512xf32>
    %440 = vector.extract_strided_slice %436 {offsets = [0, 0], sizes = [1, 128], strides = [1, 1]} : vector<1x512xf32> to vector<1x128xf32>
    %441 = vector.extract_strided_slice %436 {offsets = [0, 128], sizes = [1, 128], strides = [1, 1]} : vector<1x512xf32> to vector<1x128xf32>
    %442 = arith.addf %440, %441 : vector<1x128xf32>
    %443 = vector.extract_strided_slice %436 {offsets = [0, 256], sizes = [1, 128], strides = [1, 1]} : vector<1x512xf32> to vector<1x128xf32>
    %444 = arith.addf %442, %443 : vector<1x128xf32>
    %445 = vector.extract_strided_slice %436 {offsets = [0, 384], sizes = [1, 128], strides = [1, 1]} : vector<1x512xf32> to vector<1x128xf32>
    %446 = arith.addf %444, %445 : vector<1x128xf32>
    %cst_120 = arith.constant 7.812500e-03 : f32
    %447 = vector.broadcast %cst_120 : f32 to vector<1x128xf32>
    %448 = arith.mulf %446, %447 : vector<1x128xf32>
    %449 = vector.extract_strided_slice %439 {offsets = [0, 0], sizes = [1, 128], strides = [1, 1]} : vector<1x512xf32> to vector<1x128xf32>
    %450 = vector.extract_strided_slice %439 {offsets = [0, 128], sizes = [1, 128], strides = [1, 1]} : vector<1x512xf32> to vector<1x128xf32>
    %451 = arith.addf %449, %450 : vector<1x128xf32>
    %452 = vector.extract_strided_slice %439 {offsets = [0, 256], sizes = [1, 128], strides = [1, 1]} : vector<1x512xf32> to vector<1x128xf32>
    %453 = arith.addf %451, %452 : vector<1x128xf32>
    %454 = vector.extract_strided_slice %439 {offsets = [0, 384], sizes = [1, 128], strides = [1, 1]} : vector<1x512xf32> to vector<1x128xf32>
    %455 = arith.addf %453, %454 : vector<1x128xf32>
    %cst_121 = arith.constant 7.812500e-03 : f32
    %456 = vector.broadcast %cst_121 : f32 to vector<1x128xf32>
    %457 = arith.mulf %455, %456 : vector<1x128xf32>
    %458 = arith.mulf %448, %448 : vector<1x128xf32>
    %459 = arith.subf %457, %458 : vector<1x128xf32>
    %cst_122 = arith.constant 9.99999974E-6 : f32
    %460 = vector.broadcast %cst_122 : f32 to vector<1x128xf32>
    %461 = arith.addf %459, %460 : vector<1x128xf32>
    %462 = math.rsqrt %461 : vector<1x128xf32>
    %463 = arith.mulf %430, %462 : vector<1x128xf32>
    %464 = arith.mulf %448, %463 : vector<1x128xf32>
    %465 = arith.subf %431, %464 : vector<1x128xf32>
    %466 = tpu.concatenate %463, %463, %463, %463 in 1 : vector<1x128xf32>, vector<1x128xf32>, vector<1x128xf32>, vector<1x128xf32> -> vector<1x512xf32>
    %467 = tpu.concatenate %465, %465, %465, %465 in 1 : vector<1x128xf32>, vector<1x128xf32>, vector<1x128xf32>, vector<1x128xf32> -> vector<1x512xf32>
    %468 = vector.broadcast %466 : vector<1x512xf32> to vector<32x512xf32>
    %469 = arith.mulf %434, %468 : vector<32x512xf32>
    %470 = vector.broadcast %467 : vector<1x512xf32> to vector<32x512xf32>
    %471 = arith.addf %469, %470 : vector<32x512xf32>
    %cst_123 = arith.constant 0.000000e+00 : f32
    %472 = vector.broadcast %cst_123 : f32 to vector<32x512xf32>
    %473 = arith.maximumf %471, %472 : vector<32x512xf32>
    %474 = arith.addf %473, %381 : vector<32x512xf32>
    %cst_124 = arith.constant 0.000000e+00 : f32
    %475 = vector.broadcast %cst_124 : f32 to vector<32x512xf32>
    %476 = arith.maximumf %474, %475 : vector<32x512xf32>
    %c10 = arith.constant 10 : index
    %c0_125 = arith.constant 0 : index
    %c0_126 = arith.constant 0 : index
    %477 = vector.load %arg4[%c10, %c0_125, %c0_126] : memref<12x2x128xf32, #tpu.memory_space<vmem>>, vector<1x2x128xf32>
    %478 = vector.shape_cast %477 : vector<1x2x128xf32> to vector<2x128xf32>
    %479 = vector.extract_strided_slice %478 {offsets = [0, 0], sizes = [1, 128], strides = [1, 1]} : vector<2x128xf32> to vector<1x128xf32>
    %480 = vector.extract_strided_slice %478 {offsets = [1, 0], sizes = [1, 128], strides = [1, 1]} : vector<2x128xf32> to vector<1x128xf32>
    %c9_127 = arith.constant 9 : index
    %c0_128 = arith.constant 0 : index
    %c0_129 = arith.constant 0 : index
    %481 = vector.load %arg3[%c9_127, %c0_128, %c0_129] : memref<12x32x32xf32, #tpu.memory_space<vmem>>, vector<1x32x32xf32>
    %482 = vector.shape_cast %481 : vector<1x32x32xf32> to vector<32x32xf32>
    %cst_130 = arith.constant dense<0.000000e+00> : vector<32x512xf32>
    %483 = tpu.matmul %482, %476, %cst_130 {dimension_numbers = #tpu.dot_dimension_numbers<[1], [0], [0], [1], [0, 0, 1, 1], [], []>} : vector<32x32xf32>, vector<32x512xf32>, vector<32x512xf32> -> vector<32x512xf32>
    %cst_131 = arith.constant dense<0.000000e+00> : vector<512xf32>
    %484 = vector.multi_reduction <add>, %483, %cst_131 [0] : vector<32x512xf32> to vector<512xf32>
    %485 = vector.shape_cast %484 : vector<512xf32> to vector<1x512xf32>
    %486 = arith.mulf %483, %483 : vector<32x512xf32>
    %cst_132 = arith.constant dense<0.000000e+00> : vector<512xf32>
    %487 = vector.multi_reduction <add>, %486, %cst_132 [0] : vector<32x512xf32> to vector<512xf32>
    %488 = vector.shape_cast %487 : vector<512xf32> to vector<1x512xf32>
    %489 = vector.extract_strided_slice %485 {offsets = [0, 0], sizes = [1, 128], strides = [1, 1]} : vector<1x512xf32> to vector<1x128xf32>
    %490 = vector.extract_strided_slice %485 {offsets = [0, 128], sizes = [1, 128], strides = [1, 1]} : vector<1x512xf32> to vector<1x128xf32>
    %491 = arith.addf %489, %490 : vector<1x128xf32>
    %492 = vector.extract_strided_slice %485 {offsets = [0, 256], sizes = [1, 128], strides = [1, 1]} : vector<1x512xf32> to vector<1x128xf32>
    %493 = arith.addf %491, %492 : vector<1x128xf32>
    %494 = vector.extract_strided_slice %485 {offsets = [0, 384], sizes = [1, 128], strides = [1, 1]} : vector<1x512xf32> to vector<1x128xf32>
    %495 = arith.addf %493, %494 : vector<1x128xf32>
    %cst_133 = arith.constant 7.812500e-03 : f32
    %496 = vector.broadcast %cst_133 : f32 to vector<1x128xf32>
    %497 = arith.mulf %495, %496 : vector<1x128xf32>
    %498 = vector.extract_strided_slice %488 {offsets = [0, 0], sizes = [1, 128], strides = [1, 1]} : vector<1x512xf32> to vector<1x128xf32>
    %499 = vector.extract_strided_slice %488 {offsets = [0, 128], sizes = [1, 128], strides = [1, 1]} : vector<1x512xf32> to vector<1x128xf32>
    %500 = arith.addf %498, %499 : vector<1x128xf32>
    %501 = vector.extract_strided_slice %488 {offsets = [0, 256], sizes = [1, 128], strides = [1, 1]} : vector<1x512xf32> to vector<1x128xf32>
    %502 = arith.addf %500, %501 : vector<1x128xf32>
    %503 = vector.extract_strided_slice %488 {offsets = [0, 384], sizes = [1, 128], strides = [1, 1]} : vector<1x512xf32> to vector<1x128xf32>
    %504 = arith.addf %502, %503 : vector<1x128xf32>
    %cst_134 = arith.constant 7.812500e-03 : f32
    %505 = vector.broadcast %cst_134 : f32 to vector<1x128xf32>
    %506 = arith.mulf %504, %505 : vector<1x128xf32>
    %507 = arith.mulf %497, %497 : vector<1x128xf32>
    %508 = arith.subf %506, %507 : vector<1x128xf32>
    %cst_135 = arith.constant 9.99999974E-6 : f32
    %509 = vector.broadcast %cst_135 : f32 to vector<1x128xf32>
    %510 = arith.addf %508, %509 : vector<1x128xf32>
    %511 = math.rsqrt %510 : vector<1x128xf32>
    %512 = arith.mulf %479, %511 : vector<1x128xf32>
    %513 = arith.mulf %497, %512 : vector<1x128xf32>
    %514 = arith.subf %480, %513 : vector<1x128xf32>
    %515 = tpu.concatenate %512, %512, %512, %512 in 1 : vector<1x128xf32>, vector<1x128xf32>, vector<1x128xf32>, vector<1x128xf32> -> vector<1x512xf32>
    %516 = tpu.concatenate %514, %514, %514, %514 in 1 : vector<1x128xf32>, vector<1x128xf32>, vector<1x128xf32>, vector<1x128xf32> -> vector<1x512xf32>
    %517 = vector.broadcast %515 : vector<1x512xf32> to vector<32x512xf32>
    %518 = arith.mulf %483, %517 : vector<32x512xf32>
    %519 = vector.broadcast %516 : vector<1x512xf32> to vector<32x512xf32>
    %520 = arith.addf %518, %519 : vector<32x512xf32>
    %cst_136 = arith.constant 0.000000e+00 : f32
    %521 = vector.broadcast %cst_136 : f32 to vector<32x512xf32>
    %522 = arith.maximumf %520, %521 : vector<32x512xf32>
    %c11 = arith.constant 11 : index
    %c0_137 = arith.constant 0 : index
    %c0_138 = arith.constant 0 : index
    %523 = vector.load %arg4[%c11, %c0_137, %c0_138] : memref<12x2x128xf32, #tpu.memory_space<vmem>>, vector<1x2x128xf32>
    %524 = vector.shape_cast %523 : vector<1x2x128xf32> to vector<2x128xf32>
    %525 = vector.extract_strided_slice %524 {offsets = [0, 0], sizes = [1, 128], strides = [1, 1]} : vector<2x128xf32> to vector<1x128xf32>
    %526 = vector.extract_strided_slice %524 {offsets = [1, 0], sizes = [1, 128], strides = [1, 1]} : vector<2x128xf32> to vector<1x128xf32>
    %c10_139 = arith.constant 10 : index
    %c0_140 = arith.constant 0 : index
    %c0_141 = arith.constant 0 : index
    %527 = vector.load %arg3[%c10_139, %c0_140, %c0_141] : memref<12x32x32xf32, #tpu.memory_space<vmem>>, vector<1x32x32xf32>
    %528 = vector.shape_cast %527 : vector<1x32x32xf32> to vector<32x32xf32>
    %cst_142 = arith.constant dense<0.000000e+00> : vector<32x512xf32>
    %529 = tpu.matmul %528, %522, %cst_142 {dimension_numbers = #tpu.dot_dimension_numbers<[1], [0], [0], [1], [0, 0, 1, 1], [], []>} : vector<32x32xf32>, vector<32x512xf32>, vector<32x512xf32> -> vector<32x512xf32>
    %cst_143 = arith.constant dense<0.000000e+00> : vector<512xf32>
    %530 = vector.multi_reduction <add>, %529, %cst_143 [0] : vector<32x512xf32> to vector<512xf32>
    %531 = vector.shape_cast %530 : vector<512xf32> to vector<1x512xf32>
    %532 = arith.mulf %529, %529 : vector<32x512xf32>
    %cst_144 = arith.constant dense<0.000000e+00> : vector<512xf32>
    %533 = vector.multi_reduction <add>, %532, %cst_144 [0] : vector<32x512xf32> to vector<512xf32>
    %534 = vector.shape_cast %533 : vector<512xf32> to vector<1x512xf32>
    %535 = vector.extract_strided_slice %531 {offsets = [0, 0], sizes = [1, 128], strides = [1, 1]} : vector<1x512xf32> to vector<1x128xf32>
    %536 = vector.extract_strided_slice %531 {offsets = [0, 128], sizes = [1, 128], strides = [1, 1]} : vector<1x512xf32> to vector<1x128xf32>
    %537 = arith.addf %535, %536 : vector<1x128xf32>
    %538 = vector.extract_strided_slice %531 {offsets = [0, 256], sizes = [1, 128], strides = [1, 1]} : vector<1x512xf32> to vector<1x128xf32>
    %539 = arith.addf %537, %538 : vector<1x128xf32>
    %540 = vector.extract_strided_slice %531 {offsets = [0, 384], sizes = [1, 128], strides = [1, 1]} : vector<1x512xf32> to vector<1x128xf32>
    %541 = arith.addf %539, %540 : vector<1x128xf32>
    %cst_145 = arith.constant 7.812500e-03 : f32
    %542 = vector.broadcast %cst_145 : f32 to vector<1x128xf32>
    %543 = arith.mulf %541, %542 : vector<1x128xf32>
    %544 = vector.extract_strided_slice %534 {offsets = [0, 0], sizes = [1, 128], strides = [1, 1]} : vector<1x512xf32> to vector<1x128xf32>
    %545 = vector.extract_strided_slice %534 {offsets = [0, 128], sizes = [1, 128], strides = [1, 1]} : vector<1x512xf32> to vector<1x128xf32>
    %546 = arith.addf %544, %545 : vector<1x128xf32>
    %547 = vector.extract_strided_slice %534 {offsets = [0, 256], sizes = [1, 128], strides = [1, 1]} : vector<1x512xf32> to vector<1x128xf32>
    %548 = arith.addf %546, %547 : vector<1x128xf32>
    %549 = vector.extract_strided_slice %534 {offsets = [0, 384], sizes = [1, 128], strides = [1, 1]} : vector<1x512xf32> to vector<1x128xf32>
    %550 = arith.addf %548, %549 : vector<1x128xf32>
    %cst_146 = arith.constant 7.812500e-03 : f32
    %551 = vector.broadcast %cst_146 : f32 to vector<1x128xf32>
    %552 = arith.mulf %550, %551 : vector<1x128xf32>
    %553 = arith.mulf %543, %543 : vector<1x128xf32>
    %554 = arith.subf %552, %553 : vector<1x128xf32>
    %cst_147 = arith.constant 9.99999974E-6 : f32
    %555 = vector.broadcast %cst_147 : f32 to vector<1x128xf32>
    %556 = arith.addf %554, %555 : vector<1x128xf32>
    %557 = math.rsqrt %556 : vector<1x128xf32>
    %558 = arith.mulf %525, %557 : vector<1x128xf32>
    %559 = arith.mulf %543, %558 : vector<1x128xf32>
    %560 = arith.subf %526, %559 : vector<1x128xf32>
    %561 = tpu.concatenate %558, %558, %558, %558 in 1 : vector<1x128xf32>, vector<1x128xf32>, vector<1x128xf32>, vector<1x128xf32> -> vector<1x512xf32>
    %562 = tpu.concatenate %560, %560, %560, %560 in 1 : vector<1x128xf32>, vector<1x128xf32>, vector<1x128xf32>, vector<1x128xf32> -> vector<1x512xf32>
    %563 = vector.broadcast %561 : vector<1x512xf32> to vector<32x512xf32>
    %564 = arith.mulf %529, %563 : vector<32x512xf32>
    %565 = vector.broadcast %562 : vector<1x512xf32> to vector<32x512xf32>
    %566 = arith.addf %564, %565 : vector<32x512xf32>
    %cst_148 = arith.constant 0.000000e+00 : f32
    %567 = vector.broadcast %cst_148 : f32 to vector<32x512xf32>
    %568 = arith.maximumf %566, %567 : vector<32x512xf32>
    %569 = arith.addf %568, %476 : vector<32x512xf32>
    %cst_149 = arith.constant 0.000000e+00 : f32
    %570 = vector.broadcast %cst_149 : f32 to vector<32x512xf32>
    %571 = arith.maximumf %569, %570 : vector<32x512xf32>
    %c11_150 = arith.constant 11 : index
    %c0_151 = arith.constant 0 : index
    %c0_152 = arith.constant 0 : index
    %572 = vector.load %arg3[%c11_150, %c0_151, %c0_152] : memref<12x32x32xf32, #tpu.memory_space<vmem>>, vector<1x32x32xf32>
    %573 = vector.shape_cast %572 : vector<1x32x32xf32> to vector<32x32xf32>
    %cst_153 = arith.constant dense<0.000000e+00> : vector<32x512xf32>
    %574 = tpu.matmul %573, %571, %cst_153 {dimension_numbers = #tpu.dot_dimension_numbers<[1], [0], [0], [1], [0, 0, 1, 1], [], []>} : vector<32x32xf32>, vector<32x512xf32>, vector<32x512xf32> -> vector<32x512xf32>
    %575 = vector.extract_strided_slice %574 {offsets = [0, 0], sizes = [1, 512], strides = [1, 1]} : vector<32x512xf32> to vector<1x512xf32>
    %c0_154 = arith.constant 0 : index
    %c0_155 = arith.constant 0 : index
    %576 = vector.load %arg5[%c0_154, %c0_155] : memref<1x1xf32, #tpu.memory_space<vmem>>, vector<1x1xf32>
    %577 = vector.broadcast %576 : vector<1x1xf32> to vector<1x512xf32>
    %578 = arith.addf %575, %577 : vector<1x512xf32>
    %c0_156 = arith.constant 0 : index
    %c0_157 = arith.constant 0 : index
    %579 = vector.load %arg6[%c0_156, %c0_157] : memref<1x512xf32, #tpu.memory_space<vmem>>, vector<1x512xf32>
    tpu.vector_store %arg6[%c0_156, %c0_157], %578 {strides = array<i32>} : memref<1x512xf32, #tpu.memory_space<vmem>>, vector<1x512xf32>,
    return
  }
  func.func @transform_0(%arg0: i32) -> (i32, i32) {
    %c0_i32 = arith.constant 0 : i32
    %c0_i32_0 = arith.constant 0 : i32
    %c0_i32_1 = arith.constant 0 : i32
    return %c0_i32, %c0_i32_0 : i32, i32
  }
  func.func @transform_1(%arg0: i32) -> (i32, i32) {
    %c0_i32 = arith.constant 0 : i32
    %c0_i32_0 = arith.constant 0 : i32
    %c0_i32_1 = arith.constant 0 : i32
    return %c0_i32, %c0_i32_0 : i32, i32
  }
  func.func @transform_2(%arg0: i32) -> (i32, i32, i32) {
    %c0_i32 = arith.constant 0 : i32
    %c0_i32_0 = arith.constant 0 : i32
    %c0_i32_1 = arith.constant 0 : i32
    %c0_i32_2 = arith.constant 0 : i32
    return %c0_i32, %c0_i32_0, %c0_i32_1 : i32, i32, i32
  }
  func.func @transform_3(%arg0: i32) -> (i32, i32, i32) {
    %c0_i32 = arith.constant 0 : i32
    %c0_i32_0 = arith.constant 0 : i32
    %c0_i32_1 = arith.constant 0 : i32
    %c0_i32_2 = arith.constant 0 : i32
    return %c0_i32, %c0_i32_0, %c0_i32_1 : i32, i32, i32
  }
  func.func @transform_4(%arg0: i32) -> (i32, i32) {
    %c0_i32 = arith.constant 0 : i32
    %c0_i32_0 = arith.constant 0 : i32
    %c0_i32_1 = arith.constant 0 : i32
    return %c0_i32, %c0_i32_0 : i32, i32
  }
  func.func @transform_5(%arg0: i32) -> (i32, i32) {
    %c0_i32 = arith.constant 0 : i32
    %c0_i32_0 = arith.constant 0 : i32
    %c0_i32_1 = arith.constant 0 : i32
    return %c0_i32, %c0_i32_0 : i32, i32
  }
}

</mosaic_0001>

<bundles_post_ra>
// kernel: resnet_forward.1
= control target key start
LH: loop header
LB: loop body
LE: loop exit
PB: predicated region body
PF: predicated region fallthrough
CT: control target
= control target key end

     0   :  { %s7424_s0 = inlined_call_operand.vmem [shape: f32[2,512], index: 0, kind: input, shape index: {}]   ;;  %s7425_s1 = inlined_call_operand.vmem [shape: f32[64,2], index: 1, kind: input, shape index: {}]   ;;  %s7426_s2 = inlined_call_operand.hbm [shape: f32[12,32,32], index: 2, kind: input, shape index: {}]   ;;  %s7427_s3 = inlined_call_operand.vmem [shape: f32[12,2,128], index: 3, kind: input, shape index: {}]   ;;  %s7428_s4 = inlined_call_operand.<no memory space> [shape: f32[1,1], index: 4, kind: input, shape index: {}]   ;;  %s7429_s5 = inlined_call_operand.hbm [shape: f32[1,512], index: 5, kind: output, shape index: {}]  }
   0x1   :  { %v10_v0 = vstv %s7428_s4 }
   0x2   :  { %11 = vst [vmem:[#allocation2] sm:$0x1] %v10_v0 }
   0x3   :  { %12 = vsyncpa [#allocation4], 0 }
   0x4   :  { %13 = vsyncpa [#allocation5], 0  ;;  %s5275_s20 = smov [#allocation3]   ;;  %s5227_s24 = scalar_lea.hbm %s7426_s2, 6144 }
   0x5   :  { %s23_s21 = sshll.u32 %s5275_s20, 4  ;;  %p5228_p0 = scmp.ne.s32.totalorder %s7426_s2, %s5227_s24  ;;  %s24_s21 = int_to_ptr.vmem [resolvable:$true] %s23_s21 }
   0x6   :  { %p5231_p1 = scmp.lt.u32.totalorder %s5227_s24, %s7426_s2 }
   0x8   :  { %p5233_p2 = pnand %p5231_p1, %p5228_p0 }
   0xa   :  { %5236 = shalt.err (!%p5233_p2)
}
   0xb   :  { %s5237_s4 = scalar_lea.vmem %s24_s21, 6144  ;;  %p5242_p4 = scmp.lt.s32.totalorder %s24_s21, %s24_s21 }
   0xc   :  { %p5238_p3 = scmp.ne.s32.totalorder %s24_s21, %s5237_s4  ;;  %p5243_p5 = scmp.lt.s32.totalorder %s5237_s4, %s5237_s4 }
   0xe   :  { %p5244_p6 = por %p5243_p5, %p5242_p4 }
  0x10   :  { %p5245_p7 = pnand %p5244_p6, %p5238_p3 }
  0x12   :  { %5248 = shalt.err (!%p5245_p7)
}
  0x13   :  { %s5276_s29 = smov 128   ;;  %s5277_s30 = smov 8  }
  0x14   :  { %29 = dma.hbm_to_vmem [thread:$0]  %s7426_s2, 6144, %s24_s21, [#allocation4], %s5276_s29, %s5276_s29, %s5277_s30  }
  0x15   :  { %5271 = dma.done.wait [#allocation4], 6144  }
  0x16   :  { %5272 = vsyncadd [#allocation4], 4294961152  ;;  %v7430_v1 = vlaneseq  ;;  %v5278_v2 = vmov 1983009808   ;;  %v7431_v4 = vmov 0.0   ;;  %v37_v8 = vld [vmem:[%s7424_s0] sm:$0xff] }
  0x17   :  { %v49_v3 = vunpack.c.l.s4 %v5278_v2  ;;  %162 = vmatprep.mubr.f32.mxu0 %v7431_v4  ;;  %275 = vmatprep.mubr.f32.mxu1 %v7431_v4  ;;  %v47_v10 = vcombine.high %v37_v8, %v37_v8  ;;  %vm89_vm0 = vcmask 1041408   ;;  %v38_v13 = vld [vmem:[%s7425_s1] sm:$0xff]  ;;  %vm64_vm1 = vcmask 15360   ;;  %v39_v15 = vld [vmem:[%s7425_s1 + $0x8] sm:$0xff]  ;;  %v40_v16 = vld [vmem:[%s7425_s1 + $0x10] sm:$0xff] }
  0x18   :  { %v5331_v5 = vshrl.u32 %v7430_v1, 7  ;;  %v41_v17 = vld [vmem:[%s7425_s1 + $0x18] sm:$0xff]  ;;  %v42_v18 = vld [vmem:[%s7425_s1 + $0x20] sm:$0xff]  ;;  %v43_v19 = vld [vmem:[%s7425_s1 + $0x28] sm:$0xff]  ;;  %vm493_vm2 = vcmask 261120  }
  0x19   :  { %v50_v6 = vunpack.c.0.s8 %v49_v3  ;;  %v44_v20 = vld [vmem:[%s7425_s1 + $0x30] sm:$0xff]  ;;  %v45_v21 = vld [vmem:[%s7425_s1 + $0x38] sm:$0xff] }
  0x1a   :  { %7535 = vst [vmem:[#allocation9_spill] sm:$0xff] %v5331_v5 }
  0x1b   :  { %v53_v7 = vsub.s32 %v50_v6, %v5331_v5 }
  0x1d   :  { %v54_v9 = vrot.slane %v37_v8, %v53_v7  ;;  %v61_v12 = vrot.slane %v47_v10, %v53_v7 }
  0x1f   :  { %v62_v11 = vcombine.high %v54_v9, %v54_v9  ;;  %v63_v14 = vcombine.high %v61_v12, %v61_v12 }
  0x21   :  { %4874 = vmatprep.subr.msk.mxu0 %vm89_vm0, %v62_v11  ;;  %4884 = vmatprep.subr.msk.mxu1 %vm89_vm0, %v63_v14 }
  0x22   :  { %4875 = vmatpush1.msk.msra.mxu0 %vm89_vm0, %v54_v9  ;;  %4885 = vmatpush1.msk.msra.mxu1 %vm89_vm0, %v61_v12 }
  0x23   :  { %4876 = vmatmul.mubr.msk.f32.vlgmr.msra.gmra.mrb[0].mxu0 %vm64_vm1, %v38_v13  ;;  %4886 = vmatmul.mubr.msk.f32.vlgmr.msra.gmra.mrb[0].mxu1 %vm64_vm1, %v38_v13 }
  0x24   :  { %168 = vmatprep.mubr.f32.mxu0 %v7431_v4  ;;  %281 = vmatprep.mubr.f32.mxu1 %v7431_v4 }
  0x27   :  { %4877 = vmatmul.mubr.msk.f32.gmra.mrb[2].mxu0 %vm64_vm1, %v39_v15  ;;  %4887 = vmatmul.mubr.msk.f32.gmra.mrb[2].mxu1 %vm64_vm1, %v39_v15 }
  0x28   :  { %174 = vmatprep.mubr.f32.mxu0 %v7431_v4  ;;  %287 = vmatprep.mubr.f32.mxu1 %v7431_v4 }
  0x2b   :  { %4878 = vmatmul.mubr.msk.f32.gmra.mrb[4].mxu0 %vm64_vm1, %v40_v16  ;;  %4888 = vmatmul.mubr.msk.f32.gmra.mrb[4].mxu1 %vm64_vm1, %v40_v16 }
  0x2c   :  { %180 = vmatprep.mubr.f32.mxu0 %v7431_v4  ;;  %293 = vmatprep.mubr.f32.mxu1 %v7431_v4 }
  0x2f   :  { %4879 = vmatmul.mubr.msk.f32.gmra.mrb[6].mxu0 %vm64_vm1, %v41_v17  ;;  %4889 = vmatmul.mubr.msk.f32.gmra.mrb[6].mxu1 %vm64_vm1, %v41_v17 }
  0x30   :  { %186 = vmatprep.mubr.f32.mxu0 %v7431_v4  ;;  %299 = vmatprep.mubr.f32.mxu1 %v7431_v4 }
  0x33   :  { %4880 = vmatmul.mubr.msk.f32.gmra.mrb[8].mxu0 %vm64_vm1, %v42_v18  ;;  %4890 = vmatmul.mubr.msk.f32.gmra.mrb[8].mxu1 %vm64_vm1, %v42_v18 }
  0x34   :  { %192 = vmatprep.mubr.f32.mxu0 %v7431_v4  ;;  %305 = vmatprep.mubr.f32.mxu1 %v7431_v4 }
  0x37   :  { %4881 = vmatmul.mubr.msk.f32.gmra.mrb[10].mxu0 %vm64_vm1, %v43_v19  ;;  %4891 = vmatmul.mubr.msk.f32.gmra.mrb[10].mxu1 %vm64_vm1, %v43_v19 }
  0x38   :  { %198 = vmatprep.mubr.f32.mxu0 %v7431_v4  ;;  %311 = vmatprep.mubr.f32.mxu1 %v7431_v4 }
  0x3b   :  { %4882 = vmatmul.mubr.msk.f32.gmra.mrb[12].mxu0 %vm64_vm1, %v44_v20  ;;  %4892 = vmatmul.mubr.msk.f32.gmra.mrb[12].mxu1 %vm64_vm1, %v44_v20 }
  0x3c   :  { %204 = vmatprep.mubr.f32.mxu0 %v7431_v4  ;;  %317 = vmatprep.mubr.f32.mxu1 %v7431_v4 }
  0x3f   :  { %4883 = vmatmul.mubr.msk.f32.gmra.mrb[14].mxu0 %vm64_vm1, %v45_v21  ;;  %4893 = vmatmul.mubr.msk.f32.gmra.mrb[14].mxu1 %vm64_vm1, %v45_v21 }
  0x40   :  { %570 = vmatprep.mubr.f32.mxu0 %v7431_v4  ;;  %659 = vmatprep.mubr.f32.mxu1 %v7431_v4 }
  0xf6   :  { %v5393_v22 = vpop.f32.mrb[0].mxu0  ;;  %v5397_v24 = vpop.f32.mrb[0].mxu1 }
  0xf7   :  { %v5395_v23 = vpop.f32.mrb[1].mxu0  ;;  %v5399_v25 = vpop.f32.mrb[1].mxu1 }
  0xfa   :  { %v5401_v26 = vpop.f32.mrb[2].mxu0  ;;  %v5405_v28 = vpop.f32.mrb[2].mxu1 }
  0xfb   :  { %v5403_v27 = vpop.f32.mrb[3].mxu0  ;;  %v5407_v29 = vpop.f32.mrb[3].mxu1 }
  0xfe   :  { %v5409_v30 = vpop.f32.mrb[4].mxu0  ;;  %v5413_v32 = vpop.f32.mrb[4].mxu1 }
  0xff   :  { %v5411_v31 = vpop.f32.mrb[5].mxu0  ;;  %7536 = vst [vmem:[#allocation10_spill] sm:$0xff] %v5413_v32  ;;  %v5415_v33 = vpop.f32.mrb[5].mxu1 }
 0x102   :  { %v5417_v34 = vpop.f32.mrb[6].mxu0  ;;  %v5421_v36 = vpop.f32.mrb[6].mxu1 }
 0x103   :  { %7537 = vst [vmem:[#allocation11_spill] sm:$0xff] %v5417_v34  ;;  %v5419_v35 = vpop.f32.mrb[7].mxu0  ;;  %7538 = vst [vmem:[#allocation12_spill] sm:$0xff] %v5421_v36  ;;  %v5423_v37 = vpop.f32.mrb[7].mxu1 }
 0x106   :  { %v5425_v38 = vpop.f32.mrb[8].mxu0  ;;  %v5429_v40 = vpop.f32.mrb[8].mxu1 }
 0x107   :  { %v5427_v39 = vpop.f32.mrb[9].mxu0  ;;  %v5431_v41 = vpop.f32.mrb[9].mxu1  ;;  %v361_v43 = vmul.f32 %v5425_v38, %v5425_v38  ;;  %v363_v51 = vmul.f32 %v5429_v40, %v5429_v40 }
 0x108   :  { %v362_v47 = vmul.f32 %v5427_v39, %v5427_v39  ;;  %v364_v56 = vmul.f32 %v5431_v41, %v5431_v41 }
 0x10a   :  { %v5433_v42 = vpop.f32.mrb[10].mxu0  ;;  %v5449_v50 = vpop.f32.mrb[10].mxu1 }
 0x10b   :  { %v325_v44 = vadd.f32 %v5433_v42, %v5425_v38  ;;  %v365_v45 = vmul.f32 %v5433_v42, %v5433_v42  ;;  %v5441_v46 = vpop.f32.mrb[11].mxu0  ;;  %v343_v53 = vadd.f32 %v5449_v50, %v5429_v40  ;;  %v367_v54 = vmul.f32 %v5449_v50, %v5449_v50  ;;  %v5457_v55 = vpop.f32.mrb[11].mxu1 }
 0x10c   :  { %v334_v48 = vadd.f32 %v5441_v46, %v5427_v39  ;;  %v366_v49 = vmul.f32 %v5441_v46, %v5441_v46  ;;  %v352_v58 = vadd.f32 %v5457_v55, %v5431_v41  ;;  %v368_v59 = vmul.f32 %v5457_v55, %v5457_v55 }
 0x10d   :  { %v377_v52 = vadd.f32 %v365_v45, %v361_v43  ;;  %v395_v61 = vadd.f32 %v367_v54, %v363_v51 }
 0x10e   :  { %v386_v57 = vadd.f32 %v366_v49, %v362_v47  ;;  %v5465_v60 = vpop.f32.mrb[12].mxu0  ;;  %v404_v2 = vadd.f32 %v368_v59, %v364_v56  ;;  %v5475_v7 = vpop.f32.mrb[12].mxu1 }
 0x10f   :  { %v326_v62 = vadd.f32 %v325_v44, %v5465_v60  ;;  %v369_v63 = vmul.f32 %v5465_v60, %v5465_v60  ;;  %v5470_v0 = vpop.f32.mrb[13].mxu0  ;;  %v344_v9 = vadd.f32 %v343_v53, %v5475_v7  ;;  %v371_v10 = vmul.f32 %v5475_v7, %v5475_v7  ;;  %v5480_v11 = vpop.f32.mrb[13].mxu1 }
 0x110   :  { %v335_v3 = vadd.f32 %v334_v48, %v5470_v0  ;;  %v370_v6 = vmul.f32 %v5470_v0, %v5470_v0  ;;  %v353_v13 = vadd.f32 %v352_v58, %v5480_v11  ;;  %v372_v14 = vmul.f32 %v5480_v11, %v5480_v11 }
 0x111   :  { %v378_v8 = vadd.f32 %v377_v52, %v369_v63  ;;  %v396_v16 = vadd.f32 %v395_v61, %v371_v10 }
 0x112   :  { %v387_v12 = vadd.f32 %v386_v57, %v370_v6  ;;  %v5485_v15 = vpop.f32.mrb[14].mxu0  ;;  %v405_v20 = vadd.f32 %v404_v2, %v372_v14  ;;  %v5495_v44 = vpop.f32.mrb[14].mxu1 }
 0x113   :  { %v327_v17 = vadd.f32 %v326_v62, %v5485_v15  ;;  %v373_v18 = vmul.f32 %v5485_v15, %v5485_v15  ;;  %v5490_v19 = vpop.f32.mrb[15].mxu0  ;;  %v345_v48 = vadd.f32 %v344_v9, %v5495_v44  ;;  %v375_v49 = vmul.f32 %v5495_v44, %v5495_v44  ;;  %v5500_v51 = vpop.f32.mrb[15].mxu1 }
 0x114   :  { %v336_v21 = vadd.f32 %v335_v3, %v5490_v19  ;;  %v374_v43 = vmul.f32 %v5490_v19, %v5490_v19  ;;  %v354_v54 = vadd.f32 %v353_v13, %v5500_v51  ;;  %v376_v56 = vmul.f32 %v5500_v51, %v5500_v51 }
 0x115   :  { %v328_v45 = vrot.slane %v327_v17, 4  ;;  %v379_v47 = vadd.f32 %v378_v8, %v373_v18  ;;  %v346_v59 = vrot.slane %v345_v48, 4  ;;  %v397_v61 = vadd.f32 %v396_v16, %v375_v49 }
 0x116   :  { %v337_v52 = vrot.slane %v336_v21, 4  ;;  %v388_v53 = vadd.f32 %v387_v12, %v374_v43  ;;  %v355_v2 = vrot.slane %v354_v54, 4  ;;  %v406_v3 = vadd.f32 %v405_v20, %v376_v56 }
 0x117   :  { %v329_v57 = vadd.f32 %v328_v45, %v327_v17  ;;  %v380_v58 = vrot.slane %v379_v47, 4  ;;  %v347_v9 = vadd.f32 %v346_v59, %v345_v48  ;;  %v398_v10 = vrot.slane %v397_v61, 4 }
 0x118   :  { %v338_v62 = vadd.f32 %v337_v52, %v336_v21  ;;  %v389_v63 = vrot.slane %v388_v53, 4  ;;  %v356_v12 = vadd.f32 %v355_v2, %v354_v54  ;;  %v407_v43 = vrot.slane %v406_v3, 4 }
 0x119   :  { %v330_v6 = vrot.slane %v329_v57, 2  ;;  %v381_v8 = vadd.f32 %v380_v58, %v379_v47  ;;  %v348_v4 = vrot.slane %v347_v9, 2  ;;  %v399_v36 = vadd.f32 %v398_v10, %v397_v61 }
 0x11a   :  { %v339_v14 = vrot.slane %v338_v62, 2  ;;  %v390_v18 = vadd.f32 %v389_v63, %v388_v53  ;;  %v357_v32 = vrot.slane %v356_v12, 2  ;;  %v408_v16 = vadd.f32 %v407_v43, %v406_v3 }
 0x11b   :  { %v331_v13 = vadd.f32 %v330_v6, %v329_v57  ;;  %v382_v1 = vrot.slane %v381_v8, 2  ;;  %v349_v52 = vadd.f32 %v348_v4, %v347_v9  ;;  %v400_v20 = vrot.slane %v399_v36, 2 }
 0x11c   :  { %v340_v17 = vadd.f32 %v339_v14, %v338_v62  ;;  %v391_v45 = vrot.slane %v390_v18, 2  ;;  %v358_v48 = vadd.f32 %v357_v32, %v356_v12  ;;  %v409_v58 = vrot.slane %v408_v16, 2 }
 0x11d   :  { %v332_v21 = vrot.slane %v331_v13, 1  ;;  %v383_v49 = vadd.f32 %v382_v1, %v381_v8  ;;  %v350_v54 = vrot.slane %v349_v52, 1  ;;  %v401_v63 = vadd.f32 %v400_v20, %v399_v36 }
 0x11e   :  { %v341_v56 = vrot.slane %v340_v17, 1  ;;  %v392_v47 = vadd.f32 %v391_v45, %v390_v18  ;;  %v359_v6 = vrot.slane %v358_v48, 1  ;;  %v410_v61 = vadd.f32 %v409_v58, %v408_v16  ;;  %v324_v16 = vld [vmem:[%s7427_s3] sm:$0x3] }
 0x11f   :  { %v333_v59 = vadd.f32 %v332_v21, %v331_v13  ;;  %v384_v53 = vrot.slane %v383_v49, 1  ;;  %v351_v10 = vadd.f32 %v350_v54, %v349_v52  ;;  %v402_v14 = vrot.slane %v401_v63, 1 }
 0x120   :  { %v342_v57 = vadd.f32 %v341_v56, %v340_v17  ;;  %v393_v2 = vrot.slane %v392_v47, 1  ;;  %v411_v1 = vrot.slane %v410_v61, 1  ;;  %v360_v18 = vadd.f32 %v359_v6, %v358_v48 }
 0x121   :  { %v385_v62 = vadd.f32 %v384_v53, %v383_v49  ;;  %v403_v4 = vadd.f32 %v402_v14, %v401_v63  ;;  %v5509_v49 = vsub.s32 0, %v5331_v5 }
 0x122   :  { %v394_v3 = vadd.f32 %v393_v2, %v392_v47  ;;  %v413_v43 = vadd.f32 %v342_v57, %v333_v59  ;;  %v412_v12 = vadd.f32 %v411_v1, %v410_v61  ;;  %v5513_v59 = vsub.s32 1, %v5331_v5 }
 0x124   :  { %v417_v8 = vadd.f32 %v394_v3, %v385_v62  ;;  %v414_v9 = vadd.f32 %v413_v43, %v351_v10 }
 0x126   :  { %v418_v32 = vadd.f32 %v417_v8, %v403_v4  ;;  %v415_v13 = vadd.f32 %v414_v9, %v360_v18 }
 0x128   :  { %v416_v45 = vmul.f32 0.0078125, %v415_v13  ;;  %v419_v21 = vadd.f32 %v418_v32, %v412_v12 }
 0x12a   :  { %v420_v36 = vmul.f32 0.0078125, %v419_v21  ;;  %v421_v17 = vmul.f32 %v416_v45, %v416_v45 }
 0x12c   :  { %v422_v20 = vsub.f32 %v420_v36, %v421_v17 }
 0x12e   :  { %v423_v56 = vadd.f32 1e-05, %v422_v20 }
 0x130   :  { %5203 = vrsqrt.f32 %v423_v56 }
 0x13a   :  { %v5204_v52 = vpop.eup %5203 }
 0x13b   :  { %v425_v47 = vmul.f32 %v5204_v52, %v324_v16 }
 0x13d   :  { %v426_v48 = vmul.f32 %v425_v47, %v416_v45  ;;  %v434_v58 = vrot.slane %v425_v47, %v5509_v49 }
 0x13f   :  { %v428_v53 = vrot.slane %v426_v48, 7  ;;  %v450_v54 = vmul.f32 %v434_v58, %v5500_v51  ;;  %v436_v63 = vmul.f32 %v434_v58, %v5427_v39  ;;  %v440_v57 = vmul.f32 %v434_v58, %v5441_v46 }
 0x140   :  { %v438_v2 = vmul.f32 %v434_v58, %v5431_v41  ;;  %v442_v6 = vmul.f32 %v434_v58, %v5457_v55  ;;  %v435_v61 = vmul.f32 %v434_v58, %v5425_v38  ;;  %v439_v62 = vmul.f32 %v434_v58, %v5433_v42 }
 0x141   :  { %v430_v10 = vsub.f32 %v324_v16, %v428_v53  ;;  %v437_v14 = vmul.f32 %v434_v58, %v5429_v40  ;;  %v441_v3 = vmul.f32 %v434_v58, %v5449_v50  ;;  %v444_v43 = vmul.f32 %v434_v58, %v5470_v0 }
 0x142   :  { %v448_v51 = vmul.f32 %v434_v58, %v5490_v19  ;;  %v446_v39 = vmul.f32 %v434_v58, %v5480_v11  ;;  %v443_v46 = vmul.f32 %v434_v58, %v5465_v60  ;;  %v447_v41 = vmul.f32 %v434_v58, %v5485_v15 }
 0x143   :  { %v454_v55 = vrot.slane %v430_v10, %v5513_v59  ;;  %v445_v38 = vmul.f32 %v434_v58, %v5475_v7  ;;  %v449_v42 = vmul.f32 %v434_v58, %v5495_v44 }
 0x145   :  { %v470_v1 = vadd.f32 %v454_v55, %v450_v54  ;;  %v456_v40 = vadd.f32 %v454_v55, %v436_v63  ;;  %v460_v4 = vadd.f32 %v454_v55, %v440_v57  ;;  %v458_v50 = vadd.f32 %v454_v55, %v438_v2 }
 0x146   :  { %v462_v8 = vadd.f32 %v454_v55, %v442_v6  ;;  %v455_v0 = vadd.f32 %v454_v55, %v435_v61  ;;  %v459_v9 = vadd.f32 %v454_v55, %v439_v62  ;;  %v457_v19 = vadd.f32 %v454_v55, %v437_v14 }
 0x147   :  { %v472_v18 = vmax.f32 %v456_v40, 0.0  ;;  %v476_v11 = vmax.f32 %v460_v4, 0.0  ;;  %v474_v32 = vmax.f32 %v458_v50, 0.0  ;;  %v461_v60 = vadd.f32 %v454_v55, %v441_v3 }
 0x148   :  { %v478_v12 = vmax.f32 %v462_v8, 0.0  ;;  %v471_v15 = vmax.f32 %v455_v0, 0.0  ;;  %v475_v13 = vmax.f32 %v459_v9, 0.0  ;;  %v473_v45 = vmax.f32 %v457_v19, 0.0 }
 0x149   :  { %v5001_v21 = vpack.c.bf16 %v476_v11, %v472_v18  ;;  %v477_v7 = vmax.f32 %v461_v60, 0.0  ;;  %v464_v36 = vadd.f32 %v454_v55, %v444_v43  ;;  %v468_v44 = vadd.f32 %v454_v55, %v448_v51  ;;  %v489_v51 = vld [vmem:[#allocation3] sm:$0xff] }
 0x14a   :  { %v5009_v17 = vpack.c.bf16 %v478_v12, %v474_v32  ;;  %v5003_v20 = vpack.c.bf16 %v475_v13, %v471_v15  ;;  %v466_v56 = vadd.f32 %v454_v55, %v446_v39  ;;  %v486_v16 = vmax.f32 %v470_v1, 0.0 }
 0x14b   :  { %5002 = vmatprep.subr.bf16.mxu0 %v5001_v21  ;;  %v5011_v52 = vpack.c.bf16 %v477_v7, %v473_v45  ;;  %v480_v47 = vmax.f32 %v464_v36, 0.0  ;;  %v484_v48 = vmax.f32 %v468_v44, 0.0  ;;  %v463_v58 = vadd.f32 %v454_v55, %v443_v46  ;;  %v490_v46 = vld [vmem:[#allocation3 + $0x8] sm:$0xff] }
 0x14c   :  { %5010 = vmatprep.subr.bf16.mxu1 %v5009_v17  ;;  %5004 = vmatpush1.bf16.msra.mxu0 %v5003_v20  ;;  %v482_v53 = vmax.f32 %v466_v56, 0.0  ;;  %v467_v54 = vadd.f32 %v454_v55, %v447_v41  ;;  %v465_v63 = vadd.f32 %v454_v55, %v445_v38  ;;  %v469_v57 = vadd.f32 %v454_v55, %v449_v42  ;;  %v491_v41 = vld [vmem:[#allocation3 + $0x10] sm:$0xff]  ;;  %v492_v55 = vld [vmem:[#allocation3 + $0x18] sm:$0xff] }
 0x14d   :  { %5012 = vmatpush1.bf16.msra.mxu1 %v5011_v52  ;;  %v5005_v2 = vpack.c.bf16 %v484_v48, %v480_v47  ;;  %v479_v6 = vmax.f32 %v463_v58, 0.0  ;;  %v7539_v39 = vmov 0.0  }
 0x14e   :  { %v5013_v61 = vpack.c.bf16 %v486_v16, %v482_v53  ;;  %v483_v62 = vmax.f32 %v467_v54, 0.0  ;;  %v481_v10 = vmax.f32 %v465_v63, 0.0  ;;  %v485_v14 = vmax.f32 %v469_v57, 0.0 }
 0x14f   :  { %5006 = vmatprep.subr.bf16.mxu0 %v5005_v2 }
 0x150   :  { %5014 = vmatprep.subr.bf16.mxu1 %v5013_v61  ;;  %v5007_v3 = vpack.c.bf16 %v483_v62, %v479_v6  ;;  %v5015_v43 = vpack.c.bf16 %v485_v14, %v481_v10 }
 0x152   :  { %5008 = vmatpush1.bf16.msra.mxu0 %v5007_v3  ;;  %5016 = vmatpush1.bf16.msra.mxu1 %v5015_v43 }
 0x155   :  { %4895 = vmatmul.mubr.msk.f32.vlgmr.msra.gmra.mrb[16].mxu0 %vm493_vm2, %v489_v51  ;;  %4899 = vmatmul.mubr.msk.f32.vlgmr.msra.gmra.mrb[16].mxu1 %vm493_vm2, %v489_v51 }
 0x156   :  { %576 = vmatprep.mubr.f32.mxu0 %v7539_v39  ;;  %665 = vmatprep.mubr.f32.mxu1 %v7539_v39 }
 0x159   :  { %4896 = vmatmul.mubr.msk.f32.gmra.mrb[18].mxu0 %vm493_vm2, %v490_v46  ;;  %4900 = vmatmul.mubr.msk.f32.gmra.mrb[18].mxu1 %vm493_vm2, %v490_v46 }
 0x15a   :  { %582 = vmatprep.mubr.f32.mxu0 %v7539_v39  ;;  %671 = vmatprep.mubr.f32.mxu1 %v7539_v39 }
 0x15d   :  { %4897 = vmatmul.mubr.msk.f32.gmra.mrb[20].mxu0 %vm493_vm2, %v491_v41  ;;  %4901 = vmatmul.mubr.msk.f32.gmra.mrb[20].mxu1 %vm493_vm2, %v491_v41 }
 0x15e   :  { %588 = vmatprep.mubr.f32.mxu0 %v7539_v39  ;;  %677 = vmatprep.mubr.f32.mxu1 %v7539_v39 }
 0x161   :  { %4898 = vmatmul.mubr.msk.f32.gmra.mrb[22].mxu0 %vm493_vm2, %v492_v55  ;;  %4902 = vmatmul.mubr.msk.f32.gmra.mrb[22].mxu1 %vm493_vm2, %v492_v55 }
 0x162   :  { %961 = vmatprep.mubr.f32.mxu0 %v7539_v39  ;;  %1050 = vmatprep.mubr.f32.mxu1 %v7539_v39 }
 0x228   :  { %v5548_v38 = vpop.f32.mrb[16].mxu0  ;;  %v5550_v42 = vpop.f32.mrb[16].mxu1 }
 0x229   :  { %v5552_v1 = vpop.f32.mrb[17].mxu0  ;;  %v5554_v40 = vpop.f32.mrb[17].mxu1  ;;  %v722_v4 = vmul.f32 %v5550_v42, %v5550_v42  ;;  %v720_v50 = vmul.f32 %v5548_v38, %v5548_v38 }
 0x22a   :  { %v721_v8 = vmul.f32 %v5552_v1, %v5552_v1  ;;  %v723_v9 = vmul.f32 %v5554_v40, %v5554_v40 }
 0x22c   :  { %v5562_v0 = vpop.f32.mrb[18].mxu0  ;;  %v5566_v19 = vpop.f32.mrb[18].mxu1 }
 0x22d   :  { %v684_v18 = vadd.f32 %v5562_v0, %v5548_v38  ;;  %v724_v11 = vmul.f32 %v5562_v0, %v5562_v0  ;;  %v5572_v32 = vpop.f32.mrb[19].mxu0  ;;  %v702_v60 = vadd.f32 %v5566_v19, %v5550_v42  ;;  %v726_v12 = vmul.f32 %v5566_v19, %v5566_v19  ;;  %v5578_v15 = vpop.f32.mrb[19].mxu1 }
 0x22e   :  { %v693_v13 = vadd.f32 %v5572_v32, %v5552_v1  ;;  %v725_v45 = vmul.f32 %v5572_v32, %v5572_v32  ;;  %v711_v21 = vadd.f32 %v5578_v15, %v5554_v40  ;;  %v727_v7 = vmul.f32 %v5578_v15, %v5578_v15 }
 0x22f   :  { %v736_v36 = vadd.f32 %v724_v11, %v720_v50  ;;  %v754_v44 = vadd.f32 %v726_v12, %v722_v4 }
 0x230   :  { %v745_v17 = vadd.f32 %v725_v45, %v721_v8  ;;  %v5588_v20 = vpop.f32.mrb[20].mxu0  ;;  %v763_v56 = vadd.f32 %v727_v7, %v723_v9  ;;  %v5590_v16 = vpop.f32.mrb[20].mxu1 }
 0x231   :  { %v685_v52 = vadd.f32 %v684_v18, %v5588_v20  ;;  %v728_v47 = vmul.f32 %v5588_v20, %v5588_v20  ;;  %v5595_v48 = vpop.f32.mrb[21].mxu0  ;;  %v703_v58 = vadd.f32 %v702_v60, %v5590_v16  ;;  %v730_v53 = vmul.f32 %v5590_v16, %v5590_v16  ;;  %v5600_v54 = vpop.f32.mrb[21].mxu1 }
 0x232   :  { %v694_v63 = vadd.f32 %v693_v13, %v5595_v48  ;;  %v729_v57 = vmul.f32 %v5595_v48, %v5595_v48  ;;  %v712_v2 = vadd.f32 %v711_v21, %v5600_v54  ;;  %v731_v6 = vmul.f32 %v5600_v54, %v5600_v54 }
 0x233   :  { %v737_v61 = vadd.f32 %v736_v36, %v728_v47  ;;  %v755_v62 = vadd.f32 %v754_v44, %v730_v53 }
 0x234   :  { %v746_v10 = vadd.f32 %v745_v17, %v729_v57  ;;  %v5608_v14 = vpop.f32.mrb[22].mxu0  ;;  %v764_v3 = vadd.f32 %v763_v56, %v731_v6  ;;  %v5610_v43 = vpop.f32.mrb[22].mxu1 }
 0x235   :  { %v686_v51 = vadd.f32 %v685_v52, %v5608_v14  ;;  %v732_v46 = vmul.f32 %v5608_v14, %v5608_v14  ;;  %v5615_v41 = vpop.f32.mrb[23].mxu0  ;;  %v704_v55 = vadd.f32 %v703_v58, %v5610_v43  ;;  %v734_v4 = vmul.f32 %v5610_v43, %v5610_v43  ;;  %v5620_v50 = vpop.f32.mrb[23].mxu1 }
 0x236   :  { %v695_v8 = vadd.f32 %v694_v63, %v5615_v41  ;;  %v733_v9 = vmul.f32 %v5615_v41, %v5615_v41  ;;  %v713_v18 = vadd.f32 %v712_v2, %v5620_v50  ;;  %v735_v11 = vmul.f32 %v5620_v50, %v5620_v50 }
 0x237   :  { %v687_v60 = vrot.slane %v686_v51, 4  ;;  %v738_v12 = vadd.f32 %v737_v61, %v732_v46  ;;  %v705_v13 = vrot.slane %v704_v55, 4  ;;  %v756_v45 = vadd.f32 %v755_v62, %v734_v4 }
 0x238   :  { %v696_v21 = vrot.slane %v695_v8, 4  ;;  %v747_v7 = vadd.f32 %v746_v10, %v733_v9  ;;  %v714_v36 = vrot.slane %v713_v18, 4  ;;  %v765_v44 = vadd.f32 %v764_v3, %v735_v11 }
 0x239   :  { %v688_v17 = vadd.f32 %v687_v60, %v686_v51  ;;  %v739_v56 = vrot.slane %v738_v12, 4  ;;  %v706_v52 = vadd.f32 %v705_v13, %v704_v55  ;;  %v757_v47 = vrot.slane %v756_v45, 4 }
 0x23a   :  { %v697_v58 = vadd.f32 %v696_v21, %v695_v8  ;;  %v748_v53 = vrot.slane %v747_v7, 4  ;;  %v715_v63 = vadd.f32 %v714_v36, %v713_v18  ;;  %v766_v57 = vrot.slane %v765_v44, 4 }
 0x23b   :  { %v689_v2 = vrot.slane %v688_v17, 2  ;;  %v740_v6 = vadd.f32 %v739_v56, %v738_v12  ;;  %v707_v5 = vrot.slane %v706_v52, 2  ;;  %v758_v39 = vadd.f32 %v757_v47, %v756_v45 }
 0x23c   :  { %v698_v34 = vrot.slane %v697_v58, 2  ;;  %v749_v61 = vadd.f32 %v748_v53, %v747_v7  ;;  %v716_v46 = vrot.slane %v715_v63, 2  ;;  %v767_v62 = vadd.f32 %v766_v57, %v765_v44 }
 0x23d   :  { %v690_v4 = vadd.f32 %v689_v2, %v688_v17  ;;  %v741_v10 = vrot.slane %v740_v6, 2  ;;  %v708_v9 = vadd.f32 %v707_v5, %v706_v52  ;;  %v759_v3 = vrot.slane %v758_v39, 2 }
 0x23e   :  { %v699_v51 = vadd.f32 %v698_v34, %v697_v58  ;;  %v750_v11 = vrot.slane %v749_v61, 2  ;;  %v717_v55 = vadd.f32 %v716_v46, %v715_v63  ;;  %v768_v60 = vrot.slane %v767_v62, 2 }
 0x23f   :  { %v691_v8 = vrot.slane %v690_v4, 1  ;;  %v742_v13 = vadd.f32 %v741_v10, %v740_v6  ;;  %v760_v18 = vadd.f32 %v759_v3, %v758_v39  ;;  %v709_v12 = vrot.slane %v708_v9, 1 }
 0x240   :  { %v700_v21 = vrot.slane %v699_v51, 1  ;;  %v751_v36 = vadd.f32 %v750_v11, %v749_v61  ;;  %v769_v56 = vadd.f32 %v768_v60, %v767_v62  ;;  %v718_v17 = vrot.slane %v717_v55, 1 }
 0x241   :  { %v692_v45 = vadd.f32 %v691_v8, %v690_v4  ;;  %v743_v47 = vrot.slane %v742_v13, 1  ;;  %v761_v44 = vrot.slane %v760_v18, 1  ;;  %v710_v34 = vadd.f32 %v709_v12, %v708_v9  ;;  %v4894_v8 = vld [vmem:[%s7427_s3 + $0x2] sm:$0x3] }
 0x242   :  { %v701_v7 = vadd.f32 %v700_v21, %v699_v51  ;;  %v752_v53 = vrot.slane %v751_v36, 1  ;;  %v770_v58 = vrot.slane %v769_v56, 1  ;;  %v719_v6 = vadd.f32 %v718_v17, %v717_v55 }
 0x243   :  { %v744_v57 = vadd.f32 %v743_v47, %v742_v13  ;;  %v762_v2 = vadd.f32 %v761_v44, %v760_v18 }
 0x244   :  { %v753_v5 = vadd.f32 %v752_v53, %v751_v36  ;;  %v772_v52 = vadd.f32 %v701_v7, %v692_v45  ;;  %v771_v10 = vadd.f32 %v770_v58, %v769_v56 }
 0x246   :  { %v776_v63 = vadd.f32 %v753_v5, %v744_v57  ;;  %v773_v46 = vadd.f32 %v772_v52, %v710_v34 }
 0x248   :  { %v777_v39 = vadd.f32 %v776_v63, %v762_v2  ;;  %v774_v61 = vadd.f32 %v773_v46, %v719_v6 }
 0x24a   :  { %v775_v3 = vmul.f32 0.0078125, %v774_v61  ;;  %v778_v62 = vadd.f32 %v777_v39, %v771_v10 }
 0x24c   :  { %v779_v4 = vmul.f32 0.0078125, %v778_v62  ;;  %v780_v11 = vmul.f32 %v775_v3, %v775_v3 }
 0x24e   :  { %v781_v51 = vsub.f32 %v779_v4, %v780_v11 }
 0x250   :  { %v782_v60 = vadd.f32 1e-05, %v781_v51 }
 0x252   :  { %5205 = vrsqrt.f32 %v782_v60 }
 0x25c   :  { %v5206_v9 = vpop.eup %5205 }
 0x25d   :  { %v784_v13 = vmul.f32 %v5206_v9, %v4894_v8 }
 0x25f   :  { %v785_v21 = vmul.f32 %v784_v13, %v775_v3  ;;  %v793_v18 = vrot.slane %v784_v13, %v5509_v49 }
 0x261   :  { %v787_v55 = vrot.slane %v785_v21, 7  ;;  %v809_v36 = vmul.f32 %v793_v18, %v5620_v50  ;;  %v795_v12 = vmul.f32 %v793_v18, %v5552_v1  ;;  %v799_v56 = vmul.f32 %v793_v18, %v5572_v32 }
 0x262   :  { %v797_v45 = vmul.f32 %v793_v18, %v5554_v40  ;;  %v801_v47 = vmul.f32 %v793_v18, %v5578_v15  ;;  %v794_v7 = vmul.f32 %v793_v18, %v5548_v38  ;;  %v798_v53 = vmul.f32 %v793_v18, %v5562_v0 }
 0x263   :  { %v789_v44 = vsub.f32 %v4894_v8, %v787_v55  ;;  %v796_v17 = vmul.f32 %v793_v18, %v5550_v42  ;;  %v800_v57 = vmul.f32 %v793_v18, %v5566_v19  ;;  %v803_v5 = vmul.f32 %v793_v18, %v5595_v48 }
 0x264   :  { %v807_v50 = vmul.f32 %v793_v18, %v5615_v41  ;;  %v805_v1 = vmul.f32 %v793_v18, %v5600_v54  ;;  %v802_v32 = vmul.f32 %v793_v18, %v5588_v20  ;;  %v806_v40 = vmul.f32 %v793_v18, %v5608_v14 }
 0x265   :  { %v813_v15 = vrot.slane %v789_v44, %v5513_v59  ;;  %v804_v38 = vmul.f32 %v793_v18, %v5590_v16  ;;  %v808_v0 = vmul.f32 %v793_v18, %v5610_v43 }
 0x267   :  { %v829_v52 = vadd.f32 %v813_v15, %v809_v36  ;;  %v815_v42 = vadd.f32 %v813_v15, %v795_v12  ;;  %v819_v34 = vadd.f32 %v813_v15, %v799_v56  ;;  %v817_v19 = vadd.f32 %v813_v15, %v797_v45 }
 0x268   :  { %v821_v58 = vadd.f32 %v813_v15, %v801_v47  ;;  %v814_v48 = vadd.f32 %v813_v15, %v794_v7  ;;  %v818_v63 = vadd.f32 %v813_v15, %v798_v53  ;;  %v816_v41 = vadd.f32 %v813_v15, %v796_v17 }
 0x269   :  { %v845_v2 = vmax.f32 %v829_v52, 0.0  ;;  %v831_v54 = vmax.f32 %v815_v42, 0.0  ;;  %v835_v46 = vmax.f32 %v819_v34, 0.0  ;;  %v833_v20 = vmax.f32 %v817_v19, 0.0 }
 0x26a   :  { %v837_v6 = vmax.f32 %v821_v58, 0.0  ;;  %v830_v14 = vmax.f32 %v814_v48, 0.0  ;;  %v834_v39 = vmax.f32 %v818_v63, 0.0  ;;  %v820_v10 = vadd.f32 %v813_v15, %v800_v57  ;;  %v7543_v48 = vld [vmem:[#allocation10_spill] sm:$0xff] }
 0x26b   :  { %v5650_v16 = vadd.f32 %v831_v54, %v5395_v23  ;;  %v5653_v43 = vadd.f32 %v835_v46, %v5403_v27  ;;  %v5656_v61 = vadd.f32 %v833_v20, %v5399_v25  ;;  %v832_v3 = vmax.f32 %v816_v41, 0.0  ;;  %v7545_v41 = vld [vmem:[#allocation12_spill] sm:$0xff] }
 0x26c   :  { %v5659_v62 = vadd.f32 %v837_v6, %v5407_v29  ;;  %v5662_v4 = vadd.f32 %v830_v14, %v5393_v22  ;;  %v5665_v11 = vadd.f32 %v834_v39, %v5401_v26  ;;  %v836_v51 = vmax.f32 %v820_v10, 0.0  ;;  %v881_v14 = vld [vmem:[#allocation3 + $0x20] sm:$0xff]  ;;  %v882_v10 = vld [vmem:[#allocation3 + $0x28] sm:$0xff] }
 0x26d   :  { %v7450_v23 = vmax.f32 %v5650_v16, 0.0  ;;  %v7449_v60 = vmax.f32 %v5653_v43, 0.0  ;;  %v7448_v27 = vmax.f32 %v5656_v61, 0.0  ;;  %v5671_v25 = vadd.f32 %v832_v3, %v5397_v24  ;;  %v883_v3 = vld [vmem:[#allocation3 + $0x30] sm:$0xff] }
 0x26e   :  { %v7447_v8 = vmax.f32 %v5659_v62, 0.0  ;;  %v7446_v29 = vmax.f32 %v5662_v4, 0.0  ;;  %v7445_v22 = vmax.f32 %v5665_v11, 0.0  ;;  %v5677_v9 = vadd.f32 %v836_v51, %v5405_v28  ;;  %v884_v51 = vld [vmem:[#allocation3 + $0x38] sm:$0xff] }
 0x26f   :  { %v5017_v26 = vpack.c.bf16 %v7449_v60, %v7450_v23  ;;  %v7444_v13 = vmax.f32 %v5671_v25, 0.0  ;;  %v823_v21 = vadd.f32 %v813_v15, %v803_v5  ;;  %v827_v18 = vadd.f32 %v813_v15, %v807_v50 }
 0x270   :  { %v5025_v24 = vpack.c.bf16 %v7447_v8, %v7448_v27  ;;  %v5019_v28 = vpack.c.bf16 %v7445_v22, %v7446_v29  ;;  %v7443_v55 = vmax.f32 %v5677_v9, 0.0  ;;  %v825_v36 = vadd.f32 %v813_v15, %v805_v1 }
 0x271   :  { %5018 = vmatprep.subr.bf16.mxu0 %v5017_v26  ;;  %v839_v12 = vmax.f32 %v823_v21, 0.0  ;;  %v843_v56 = vmax.f32 %v827_v18, 0.0  ;;  %v5694_v45 = vadd.f32 %v845_v2, %v5423_v37  ;;  %v822_v47 = vadd.f32 %v813_v15, %v802_v32 }
 0x272   :  { %5026 = vmatprep.subr.bf16.mxu1 %v5025_v24  ;;  %5020 = vmatpush1.bf16.msra.mxu0 %v5019_v28  ;;  %v5027_v7 = vpack.c.bf16 %v7443_v55, %v7444_v13  ;;  %v841_v53 = vmax.f32 %v825_v36, 0.0  ;;  %v826_v44 = vadd.f32 %v813_v15, %v806_v40  ;;  %v824_v17 = vadd.f32 %v813_v15, %v804_v38  ;;  %v7541_v38 = vld [vmem:[#allocation11_spill] sm:$0xff] }
 0x273   :  { %v5701_v57 = vadd.f32 %v839_v12, %v5411_v31  ;;  %v5704_v5 = vadd.f32 %v843_v56, %v5419_v35  ;;  %v7442_v37 = vmax.f32 %v5694_v45, 0.0  ;;  %v838_v50 = vmax.f32 %v822_v47, 0.0 }
 0x274   :  { %5028 = vmatpush1.bf16.msra.mxu1 %v5027_v7  ;;  %v5708_v1 = vadd.f32 %v841_v53, %v5415_v33  ;;  %v842_v32 = vmax.f32 %v826_v44, 0.0  ;;  %v828_v52 = vadd.f32 %v813_v15, %v808_v0  ;;  %v840_v42 = vmax.f32 %v824_v17, 0.0 }
 0x275   :  { %v7441_v34 = vmax.f32 %v5701_v57, 0.0  ;;  %v7440_v40 = vmax.f32 %v5704_v5, 0.0  ;;  %v5713_v31 = vadd.f32 %v838_v50, %v5409_v30  ;;  %v7547_v39 = vmov 0.0  }
 0x276   :  { %v7439_v35 = vmax.f32 %v5708_v1, 0.0  ;;  %v5717_v19 = vadd.f32 %v842_v32, %v7541_v38  ;;  %v844_v58 = vmax.f32 %v828_v52, 0.0  ;;  %v5720_v63 = vadd.f32 %v840_v42, %v7543_v48 }
 0x277   :  { %7540 = vst [vmem:[#allocation13_spill] sm:$0xff] %v5713_v31  ;;  %v5021_v33 = vpack.c.bf16 %v7440_v40, %v7441_v34  ;;  %v7438_v15 = vmax.f32 %v5713_v31, 0.0 }
 0x278   :  { %7542 = vst [vmem:[#allocation11_spill] sm:$0xff] %v5717_v19  ;;  %7544 = vst [vmem:[#allocation10_spill] sm:$0xff] %v5720_v63  ;;  %v5029_v30 = vpack.c.bf16 %v7442_v37, %v7439_v35  ;;  %v7437_v0 = vmax.f32 %v5717_v19, 0.0  ;;  %v5733_v2 = vadd.f32 %v844_v58, %v7545_v41  ;;  %v7436_v54 = vmax.f32 %v5720_v63, 0.0 }
 0x279   :  { %5022 = vmatprep.subr.bf16.mxu0 %v5021_v33 }
 0x27a   :  { %7546 = vst [vmem:[#allocation12_spill] sm:$0xff] %v5733_v2  ;;  %5030 = vmatprep.subr.bf16.mxu1 %v5029_v30  ;;  %v5023_v46 = vpack.c.bf16 %v7437_v0, %v7438_v15  ;;  %v7435_v20 = vmax.f32 %v5733_v2, 0.0 }
 0x27c   :  { %5024 = vmatpush1.bf16.msra.mxu0 %v5023_v46  ;;  %v5031_v6 = vpack.c.bf16 %v7435_v20, %v7436_v54 }
 0x27e   :  { %5032 = vmatpush1.bf16.msra.mxu1 %v5031_v6 }
 0x27f   :  { %4904 = vmatmul.mubr.msk.f32.vlgmr.msra.gmra.mrb[24].mxu0 %vm493_vm2, %v881_v14 }
 0x280   :  { %967 = vmatprep.mubr.f32.mxu0 %v7547_v39 }
 0x281   :  { %4908 = vmatmul.mubr.msk.f32.vlgmr.msra.gmra.mrb[24].mxu1 %vm493_vm2, %v881_v14 }
 0x282   :  { %1056 = vmatprep.mubr.f32.mxu1 %v7547_v39 }
 0x283   :  { %4905 = vmatmul.mubr.msk.f32.gmra.mrb[26].mxu0 %vm493_vm2, %v882_v10 }
 0x284   :  { %973 = vmatprep.mubr.f32.mxu0 %v7547_v39 }
 0x285   :  { %4909 = vmatmul.mubr.msk.f32.gmra.mrb[26].mxu1 %vm493_vm2, %v882_v10 }
 0x286   :  { %1062 = vmatprep.mubr.f32.mxu1 %v7547_v39 }
 0x287   :  { %4906 = vmatmul.mubr.msk.f32.gmra.mrb[28].mxu0 %vm493_vm2, %v883_v3 }
 0x288   :  { %979 = vmatprep.mubr.f32.mxu0 %v7547_v39 }
 0x289   :  { %4910 = vmatmul.mubr.msk.f32.gmra.mrb[28].mxu1 %vm493_vm2, %v883_v3 }
 0x28a   :  { %1068 = vmatprep.mubr.f32.mxu1 %v7547_v39 }
 0x28b   :  { %4907 = vmatmul.mubr.msk.f32.gmra.mrb[30].mxu0 %vm493_vm2, %v884_v51 }
 0x28c   :  { %1320 = vmatprep.mubr.f32.mxu0 %v7547_v39 }
 0x28d   :  { %4911 = vmatmul.mubr.msk.f32.gmra.mrb[30].mxu1 %vm493_vm2, %v884_v51 }
 0x28e   :  { %1409 = vmatprep.mubr.f32.mxu1 %v7547_v39 }
 0x352   :  { %v5761_v26 = vpop.f32.mrb[24].mxu0 }
 0x353   :  { %v5763_v21 = vpop.f32.mrb[25].mxu0  ;;  %v1111_v36 = vmul.f32 %v5761_v26, %v5761_v26 }
 0x354   :  { %v5765_v18 = vpop.f32.mrb[24].mxu1  ;;  %v1112_v53 = vmul.f32 %v5763_v21, %v5763_v21 }
 0x355   :  { %v5767_v24 = vpop.f32.mrb[25].mxu1  ;;  %v1113_v7 = vmul.f32 %v5765_v18, %v5765_v18 }
 0x356   :  { %v5769_v28 = vpop.f32.mrb[26].mxu0  ;;  %v1114_v33 = vmul.f32 %v5767_v24, %v5767_v24 }
 0x357   :  { %v1075_v12 = vadd.f32 %v5769_v28, %v5761_v26  ;;  %v1115_v56 = vmul.f32 %v5769_v28, %v5769_v28  ;;  %v5777_v47 = vpop.f32.mrb[27].mxu0 }
 0x358   :  { %v1084_v44 = vadd.f32 %v5777_v47, %v5763_v21  ;;  %v1116_v17 = vmul.f32 %v5777_v47, %v5777_v47  ;;  %v5787_v50 = vpop.f32.mrb[26].mxu1 }
 0x359   :  { %v1127_v32 = vadd.f32 %v1115_v56, %v1111_v36  ;;  %v1093_v52 = vadd.f32 %v5787_v50, %v5765_v18  ;;  %v1117_v42 = vmul.f32 %v5787_v50, %v5787_v50  ;;  %v5793_v38 = vpop.f32.mrb[27].mxu1 }
 0x35a   :  { %v1136_v58 = vadd.f32 %v1116_v17, %v1112_v53  ;;  %v5795_v48 = vpop.f32.mrb[28].mxu0  ;;  %v1102_v30 = vadd.f32 %v5793_v38, %v5767_v24  ;;  %v1118_v41 = vmul.f32 %v5793_v38, %v5793_v38 }
 0x35b   :  { %v1076_v46 = vadd.f32 %v1075_v12, %v5795_v48  ;;  %v1119_v6 = vmul.f32 %v5795_v48, %v5795_v48  ;;  %v5806_v14 = vpop.f32.mrb[29].mxu0  ;;  %v1145_v10 = vadd.f32 %v1117_v42, %v1113_v7 }
 0x35c   :  { %v1085_v3 = vadd.f32 %v1084_v44, %v5806_v14  ;;  %v1120_v51 = vmul.f32 %v5806_v14, %v5806_v14  ;;  %v1154_v36 = vadd.f32 %v1118_v41, %v1114_v33  ;;  %v5811_v56 = vpop.f32.mrb[28].mxu1 }
 0x35d   :  { %v1128_v53 = vadd.f32 %v1127_v32, %v1119_v6  ;;  %v1094_v17 = vadd.f32 %v1093_v52, %v5811_v56  ;;  %v1121_v12 = vmul.f32 %v5811_v56, %v5811_v56  ;;  %v5816_v20 = vpop.f32.mrb[29].mxu1 }
 0x35e   :  { %v1137_v54 = vadd.f32 %v1136_v58, %v1120_v51  ;;  %v5818_v0 = vpop.f32.mrb[30].mxu0  ;;  %v1103_v7 = vadd.f32 %v1102_v30, %v5816_v20  ;;  %v1122_v44 = vmul.f32 %v5816_v20, %v5816_v20 }
 0x35f   :  { %v1077_v42 = vadd.f32 %v1076_v46, %v5818_v0  ;;  %v1123_v32 = vmul.f32 %v5818_v0, %v5818_v0  ;;  %v5826_v33 = vpop.f32.mrb[31].mxu0  ;;  %v1146_v52 = vadd.f32 %v1145_v10, %v1121_v12 }
 0x360   :  { %v1086_v41 = vadd.f32 %v1085_v3, %v5826_v33  ;;  %v1124_v58 = vmul.f32 %v5826_v33, %v5826_v33  ;;  %v1155_v6 = vadd.f32 %v1154_v36, %v1122_v44  ;;  %v5831_v51 = vpop.f32.mrb[30].mxu1 }
 0x361   :  { %v1078_v30 = vrot.slane %v1077_v42, 4  ;;  %v1129_v15 = vadd.f32 %v1128_v53, %v1123_v32  ;;  %v1095_v35 = vadd.f32 %v1094_v17, %v5831_v51  ;;  %v1125_v46 = vmul.f32 %v5831_v51, %v5831_v51  ;;  %v5836_v40 = vpop.f32.mrb[31].mxu1 }
 0x362   :  { %v1087_v34 = vrot.slane %v1086_v41, 4  ;;  %v1138_v37 = vadd.f32 %v1137_v54, %v1124_v58  ;;  %v1104_v10 = vadd.f32 %v1103_v7, %v5836_v40  ;;  %v1126_v3 = vmul.f32 %v5836_v40, %v5836_v40 }
 0x363   :  { %v1079_v12 = vadd.f32 %v1078_v30, %v1077_v42  ;;  %v1130_v36 = vrot.slane %v1129_v15, 4  ;;  %v1096_v44 = vrot.slane %v1095_v35, 4  ;;  %v1147_v55 = vadd.f32 %v1146_v52, %v1125_v46 }
 0x364   :  { %v1088_v13 = vadd.f32 %v1087_v34, %v1086_v41  ;;  %v1139_v53 = vrot.slane %v1138_v37, 4  ;;  %v1105_v32 = vrot.slane %v1104_v10, 4  ;;  %v1156_v17 = vadd.f32 %v1155_v6, %v1126_v3 }
 0x365   :  { %v1080_v22 = vrot.slane %v1079_v12, 2  ;;  %v1131_v29 = vadd.f32 %v1130_v36, %v1129_v15  ;;  %v1097_v8 = vadd.f32 %v1096_v44, %v1095_v35  ;;  %v1148_v27 = vrot.slane %v1147_v55, 4 }
 0x366   :  { %v1089_v60 = vrot.slane %v1088_v13, 2  ;;  %v1140_v23 = vadd.f32 %v1139_v53, %v1138_v37  ;;  %v1106_v54 = vadd.f32 %v1105_v32, %v1104_v10  ;;  %v1157_v58 = vrot.slane %v1156_v17, 4 }
 0x367   :  { %v1081_v7 = vadd.f32 %v1080_v22, %v1079_v12  ;;  %v1132_v2 = vrot.slane %v1131_v29, 2  ;;  %v1098_v63 = vrot.slane %v1097_v8, 2  ;;  %v1149_v19 = vadd.f32 %v1148_v27, %v1147_v55 }
 0x368   :  { %v1090_v42 = vadd.f32 %v1089_v60, %v1088_v13  ;;  %v1141_v30 = vrot.slane %v1140_v23, 2  ;;  %v1107_v31 = vrot.slane %v1106_v54, 2  ;;  %v1158_v52 = vadd.f32 %v1157_v58, %v1156_v17 }
 0x369   :  { %v1082_v34 = vrot.slane %v1081_v7, 1  ;;  %v1133_v41 = vadd.f32 %v1132_v2, %v1131_v29  ;;  %v1099_v46 = vadd.f32 %v1098_v63, %v1097_v8  ;;  %v1150_v6 = vrot.slane %v1149_v19, 2 }
 0x36a   :  { %v1091_v3 = vrot.slane %v1090_v42, 1  ;;  %v1142_v15 = vadd.f32 %v1141_v30, %v1140_v23  ;;  %v1108_v35 = vadd.f32 %v1107_v31, %v1106_v54  ;;  %v1159_v36 = vrot.slane %v1158_v52, 2 }
 0x36b   :  { %v1083_v44 = vadd.f32 %v1082_v34, %v1081_v7  ;;  %v1134_v37 = vrot.slane %v1133_v41, 1  ;;  %v1100_v10 = vrot.slane %v1099_v46, 1  ;;  %v1151_v53 = vadd.f32 %v1150_v6, %v1149_v19 }
 0x36c   :  { %v1092_v22 = vadd.f32 %v1091_v3, %v1090_v42  ;;  %v1143_v12 = vrot.slane %v1142_v15, 1  ;;  %v1109_v32 = vrot.slane %v1108_v35, 1  ;;  %v1160_v27 = vadd.f32 %v1159_v36, %v1158_v52  ;;  %v4903_v52 = vld [vmem:[%s7427_s3 + $0x4] sm:$0x3] }
 0x36d   :  { %v1135_v60 = vadd.f32 %v1134_v37, %v1133_v41  ;;  %v1152_v13 = vrot.slane %v1151_v53, 1  ;;  %v1101_v58 = vadd.f32 %v1100_v10, %v1099_v46 }
 0x36e   :  { %v1144_v55 = vadd.f32 %v1143_v12, %v1142_v15  ;;  %v1163_v17 = vadd.f32 %v1092_v22, %v1083_v44  ;;  %v1161_v29 = vrot.slane %v1160_v27, 1  ;;  %v1110_v23 = vadd.f32 %v1109_v32, %v1108_v35 }
 0x36f   :  { %v1153_v63 = vadd.f32 %v1152_v13, %v1151_v53 }
 0x370   :  { %v1167_v8 = vadd.f32 %v1144_v55, %v1135_v60  ;;  %v1164_v2 = vadd.f32 %v1163_v17, %v1101_v58  ;;  %v1162_v54 = vadd.f32 %v1161_v29, %v1160_v27 }
 0x372   :  { %v1168_v31 = vadd.f32 %v1167_v8, %v1153_v63  ;;  %v1165_v7 = vadd.f32 %v1164_v2, %v1110_v23 }
 0x374   :  { %v1166_v30 = vmul.f32 0.0078125, %v1165_v7  ;;  %v1169_v34 = vadd.f32 %v1168_v31, %v1162_v54 }
 0x376   :  { %v1170_v19 = vmul.f32 0.0078125, %v1169_v34  ;;  %v1171_v42 = vmul.f32 %v1166_v30, %v1166_v30 }
 0x378   :  { %v1172_v6 = vsub.f32 %v1170_v19, %v1171_v42 }
 0x37a   :  { %v1173_v3 = vadd.f32 1e-05, %v1172_v6 }
 0x37c   :  { %5207 = vrsqrt.f32 %v1173_v3 }
 0x386   :  { %v5208_v41 = vpop.eup %5207 }
 0x387   :  { %v1175_v46 = vmul.f32 %v5208_v41, %v4903_v52 }
 0x389   :  { %v1176_v15 = vmul.f32 %v1175_v46, %v1166_v30  ;;  %v1184_v36 = vrot.slane %v1175_v46, %v5509_v49 }
 0x38b   :  { %v1178_v35 = vrot.slane %v1176_v15, 7  ;;  %v1200_v44 = vmul.f32 %v1184_v36, %v5836_v40  ;;  %v1186_v37 = vmul.f32 %v1184_v36, %v5763_v21  ;;  %v1190_v10 = vmul.f32 %v1184_v36, %v5777_v47 }
 0x38c   :  { %v1188_v53 = vmul.f32 %v1184_v36, %v5767_v24  ;;  %v1192_v22 = vmul.f32 %v1184_v36, %v5793_v38  ;;  %v1185_v12 = vmul.f32 %v1184_v36, %v5761_v26  ;;  %v1189_v32 = vmul.f32 %v1184_v36, %v5769_v28 }
 0x38d   :  { %v1180_v27 = vsub.f32 %v4903_v52, %v1178_v35  ;;  %v1187_v60 = vmul.f32 %v1184_v36, %v5765_v18  ;;  %v1191_v13 = vmul.f32 %v1184_v36, %v5787_v50  ;;  %v1194_v55 = vmul.f32 %v1184_v36, %v5806_v14 }
 0x38e   :  { %v1198_v40 = vmul.f32 %v1184_v36, %v5826_v33  ;;  %v1196_v21 = vmul.f32 %v1184_v36, %v5816_v20  ;;  %v1193_v47 = vmul.f32 %v1184_v36, %v5795_v48  ;;  %v1197_v24 = vmul.f32 %v1184_v36, %v5818_v0 }
 0x38f   :  { %v1204_v38 = vrot.slane %v1180_v27, %v5513_v59  ;;  %v1195_v26 = vmul.f32 %v1184_v36, %v5811_v56  ;;  %v1199_v28 = vmul.f32 %v1184_v36, %v5831_v51 }
 0x391   :  { %v1220_v17 = vadd.f32 %v1204_v38, %v1200_v44  ;;  %v1206_v18 = vadd.f32 %v1204_v38, %v1186_v37  ;;  %v1210_v58 = vadd.f32 %v1204_v38, %v1190_v10  ;;  %v1208_v50 = vadd.f32 %v1204_v38, %v1188_v53 }
 0x392   :  { %v1212_v29 = vadd.f32 %v1204_v38, %v1192_v22  ;;  %v1205_v14 = vadd.f32 %v1204_v38, %v1185_v12  ;;  %v1209_v8 = vadd.f32 %v1204_v38, %v1189_v32  ;;  %v1207_v33 = vadd.f32 %v1204_v38, %v1187_v60 }
 0x393   :  { %v1222_v63 = vmax.f32 %v1206_v18, 0.0  ;;  %v1226_v20 = vmax.f32 %v1210_v58, 0.0  ;;  %v1224_v2 = vmax.f32 %v1208_v50, 0.0  ;;  %v1211_v48 = vadd.f32 %v1204_v38, %v1191_v13  ;;  %v1240_v13 = vld [vmem:[#allocation3 + $0x40] sm:$0xff] }
 0x394   :  { %v1228_v23 = vmax.f32 %v1212_v29, 0.0  ;;  %v1221_v0 = vmax.f32 %v1205_v14, 0.0  ;;  %v1225_v31 = vmax.f32 %v1209_v8, 0.0  ;;  %v1223_v54 = vmax.f32 %v1207_v33, 0.0 }
 0x395   :  { %v5033_v7 = vpack.c.bf16 %v1226_v20, %v1222_v63  ;;  %v1227_v56 = vmax.f32 %v1211_v48, 0.0  ;;  %v1214_v30 = vadd.f32 %v1204_v38, %v1194_v55  ;;  %v1218_v51 = vadd.f32 %v1204_v38, %v1198_v40  ;;  %v1241_v55 = vld [vmem:[#allocation3 + $0x48] sm:$0xff]  ;;  %v1242_v40 = vld [vmem:[#allocation3 + $0x50] sm:$0xff] }
 0x396   :  { %v5041_v34 = vpack.c.bf16 %v1228_v23, %v1224_v2  ;;  %v5035_v19 = vpack.c.bf16 %v1225_v31, %v1221_v0  ;;  %v1216_v42 = vadd.f32 %v1204_v38, %v1196_v21  ;;  %v1236_v6 = vmax.f32 %v1220_v17, 0.0  ;;  %v1243_v21 = vld [vmem:[#allocation3 + $0x58] sm:$0xff] }
 0x397   :  { %5034 = vmatprep.subr.bf16.mxu0 %v5033_v7  ;;  %v5043_v3 = vpack.c.bf16 %v1227_v56, %v1223_v54  ;;  %v1230_v52 = vmax.f32 %v1214_v30, 0.0  ;;  %v1234_v41 = vmax.f32 %v1218_v51, 0.0  ;;  %v1213_v46 = vadd.f32 %v1204_v38, %v1193_v47 }
 0x398   :  { %5042 = vmatprep.subr.bf16.mxu1 %v5041_v34  ;;  %5036 = vmatpush1.bf16.msra.mxu0 %v5035_v19  ;;  %v1232_v15 = vmax.f32 %v1216_v42, 0.0  ;;  %v1217_v36 = vadd.f32 %v1204_v38, %v1197_v24  ;;  %v1215_v35 = vadd.f32 %v1204_v38, %v1195_v26  ;;  %v1219_v44 = vadd.f32 %v1204_v38, %v1199_v28 }
 0x399   :  { %5044 = vmatpush1.bf16.msra.mxu1 %v5043_v3  ;;  %v5037_v37 = vpack.c.bf16 %v1234_v41, %v1230_v52  ;;  %v1229_v10 = vmax.f32 %v1213_v46, 0.0 }
 0x39a   :  { %v5045_v53 = vpack.c.bf16 %v1236_v6, %v1232_v15  ;;  %v1233_v22 = vmax.f32 %v1217_v36, 0.0  ;;  %v1231_v12 = vmax.f32 %v1215_v35, 0.0  ;;  %v1235_v32 = vmax.f32 %v1219_v44, 0.0 }
 0x39b   :  { %5038 = vmatprep.subr.bf16.mxu0 %v5037_v37 }
 0x39c   :  { %5046 = vmatprep.subr.bf16.mxu1 %v5045_v53  ;;  %v5039_v27 = vpack.c.bf16 %v1233_v22, %v1229_v10  ;;  %v5047_v60 = vpack.c.bf16 %v1235_v32, %v1231_v12 }
 0x39e   :  { %5040 = vmatpush1.bf16.msra.mxu0 %v5039_v27  ;;  %5048 = vmatpush1.bf16.msra.mxu1 %v5047_v60 }
 0x3a1   :  { %4913 = vmatmul.mubr.msk.f32.vlgmr.msra.gmra.mrb[32].mxu0 %vm493_vm2, %v1240_v13  ;;  %4917 = vmatmul.mubr.msk.f32.vlgmr.msra.gmra.mrb[32].mxu1 %vm493_vm2, %v1240_v13 }
 0x3a2   :  { %1326 = vmatprep.mubr.f32.mxu0 %v7547_v39  ;;  %1415 = vmatprep.mubr.f32.mxu1 %v7547_v39 }
 0x3a5   :  { %4914 = vmatmul.mubr.msk.f32.gmra.mrb[34].mxu0 %vm493_vm2, %v1241_v55  ;;  %4918 = vmatmul.mubr.msk.f32.gmra.mrb[34].mxu1 %vm493_vm2, %v1241_v55 }
 0x3a6   :  { %1332 = vmatprep.mubr.f32.mxu0 %v7547_v39  ;;  %1421 = vmatprep.mubr.f32.mxu1 %v7547_v39 }
 0x3a9   :  { %4915 = vmatmul.mubr.msk.f32.gmra.mrb[36].mxu0 %vm493_vm2, %v1242_v40  ;;  %4919 = vmatmul.mubr.msk.f32.gmra.mrb[36].mxu1 %vm493_vm2, %v1242_v40 }
 0x3aa   :  { %1338 = vmatprep.mubr.f32.mxu0 %v7547_v39  ;;  %1427 = vmatprep.mubr.f32.mxu1 %v7547_v39 }
 0x3ad   :  { %4916 = vmatmul.mubr.msk.f32.gmra.mrb[38].mxu0 %vm493_vm2, %v1243_v21  ;;  %4920 = vmatmul.mubr.msk.f32.gmra.mrb[38].mxu1 %vm493_vm2, %v1243_v21 }
 0x3ae   :  { %1711 = vmatprep.mubr.f32.mxu0 %v7547_v39  ;;  %1800 = vmatprep.mubr.f32.mxu1 %v7547_v39 }
 0x474   :  { %v5878_v47 = vpop.f32.mrb[32].mxu0  ;;  %v5880_v24 = vpop.f32.mrb[32].mxu1 }
 0x475   :  { %v5882_v38 = vpop.f32.mrb[33].mxu0  ;;  %v5884_v26 = vpop.f32.mrb[33].mxu1  ;;  %v1472_v28 = vmul.f32 %v5880_v24, %v5880_v24  ;;  %v1470_v17 = vmul.f32 %v5878_v47, %v5878_v47 }
 0x476   :  { %v1471_v18 = vmul.f32 %v5882_v38, %v5882_v38  ;;  %v1473_v50 = vmul.f32 %v5884_v26, %v5884_v26 }
 0x478   :  { %v5892_v58 = vpop.f32.mrb[34].mxu0  ;;  %v5896_v29 = vpop.f32.mrb[34].mxu1 }
 0x479   :  { %v1434_v14 = vadd.f32 %v5892_v58, %v5878_v47  ;;  %v1474_v8 = vmul.f32 %v5892_v58, %v5892_v58  ;;  %v5902_v33 = vpop.f32.mrb[35].mxu0  ;;  %v1452_v63 = vadd.f32 %v5896_v29, %v5880_v24  ;;  %v1476_v20 = vmul.f32 %v5896_v29, %v5896_v29  ;;  %v5908_v2 = vpop.f32.mrb[35].mxu1 }
 0x47a   :  { %v1443_v48 = vadd.f32 %v5902_v33, %v5882_v38  ;;  %v1475_v23 = vmul.f32 %v5902_v33, %v5902_v33  ;;  %v1461_v0 = vadd.f32 %v5908_v2, %v5884_v26  ;;  %v1477_v31 = vmul.f32 %v5908_v2, %v5908_v2 }
 0x47b   :  { %v1486_v54 = vadd.f32 %v1474_v8, %v1470_v17  ;;  %v1504_v7 = vadd.f32 %v1476_v20, %v1472_v28 }
 0x47c   :  { %v1495_v56 = vadd.f32 %v1475_v23, %v1471_v18  ;;  %v5918_v30 = vpop.f32.mrb[36].mxu0  ;;  %v1513_v51 = vadd.f32 %v1477_v31, %v1473_v50  ;;  %v5920_v34 = vpop.f32.mrb[36].mxu1 }
 0x47d   :  { %v1435_v19 = vadd.f32 %v1434_v14, %v5918_v30  ;;  %v1478_v42 = vmul.f32 %v5918_v30, %v5918_v30  ;;  %v5925_v6 = vpop.f32.mrb[37].mxu0  ;;  %v1453_v3 = vadd.f32 %v1452_v63, %v5920_v34  ;;  %v1480_v52 = vmul.f32 %v5920_v34, %v5920_v34  ;;  %v5930_v41 = vpop.f32.mrb[37].mxu1 }
 0x47e   :  { %v1444_v46 = vadd.f32 %v1443_v48, %v5925_v6  ;;  %v1479_v15 = vmul.f32 %v5925_v6, %v5925_v6  ;;  %v1462_v36 = vadd.f32 %v1461_v0, %v5930_v41  ;;  %v1481_v35 = vmul.f32 %v5930_v41, %v5930_v41 }
 0x47f   :  { %v1487_v44 = vadd.f32 %v1486_v54, %v1478_v42  ;;  %v1505_v37 = vadd.f32 %v1504_v7, %v1480_v52 }
 0x480   :  { %v1496_v10 = vadd.f32 %v1495_v56, %v1479_v15  ;;  %v5938_v53 = vpop.f32.mrb[38].mxu0  ;;  %v1514_v22 = vadd.f32 %v1513_v51, %v1481_v35  ;;  %v5940_v12 = vpop.f32.mrb[38].mxu1 }
 0x481   :  { %v1436_v32 = vadd.f32 %v1435_v19, %v5938_v53  ;;  %v1482_v27 = vmul.f32 %v5938_v53, %v5938_v53  ;;  %v5945_v60 = vpop.f32.mrb[39].mxu0  ;;  %v1454_v13 = vadd.f32 %v1453_v3, %v5940_v12  ;;  %v1484_v55 = vmul.f32 %v5940_v12, %v5940_v12  ;;  %v5950_v40 = vpop.f32.mrb[39].mxu1 }
 0x482   :  { %v1445_v21 = vadd.f32 %v1444_v46, %v5945_v60  ;;  %v1483_v28 = vmul.f32 %v5945_v60, %v5945_v60  ;;  %v1463_v17 = vadd.f32 %v1462_v36, %v5950_v40  ;;  %v1485_v18 = vmul.f32 %v5950_v40, %v5950_v40 }
 0x483   :  { %v1437_v50 = vrot.slane %v1436_v32, 4  ;;  %v1488_v14 = vadd.f32 %v1487_v44, %v1482_v27  ;;  %v1455_v8 = vrot.slane %v1454_v13, 4  ;;  %v1506_v63 = vadd.f32 %v1505_v37, %v1484_v55 }
 0x484   :  { %v1446_v20 = vrot.slane %v1445_v21, 4  ;;  %v1497_v48 = vadd.f32 %v1496_v10, %v1483_v28  ;;  %v1464_v23 = vrot.slane %v1463_v17, 4  ;;  %v1515_v0 = vadd.f32 %v1514_v22, %v1485_v18 }
 0x485   :  { %v1438_v31 = vadd.f32 %v1437_v50, %v1436_v32  ;;  %v1489_v54 = vrot.slane %v1488_v14, 4  ;;  %v1456_v7 = vadd.f32 %v1455_v8, %v1454_v13  ;;  %v1507_v56 = vrot.slane %v1506_v63, 4 }
 0x486   :  { %v1447_v51 = vadd.f32 %v1446_v20, %v1445_v21  ;;  %v1498_v19 = vrot.slane %v1497_v48, 4  ;;  %v1465_v42 = vadd.f32 %v1464_v23, %v1463_v17  ;;  %v1516_v3 = vrot.slane %v1515_v0, 4 }
 0x487   :  { %v1439_v52 = vrot.slane %v1438_v31, 2  ;;  %v1490_v46 = vadd.f32 %v1489_v54, %v1488_v14  ;;  %v1457_v15 = vrot.slane %v1456_v7, 2  ;;  %v1508_v36 = vadd.f32 %v1507_v56, %v1506_v63 }
 0x488   :  { %v1448_v35 = vrot.slane %v1447_v51, 2  ;;  %v1499_v44 = vadd.f32 %v1498_v19, %v1497_v48  ;;  %v1466_v27 = vrot.slane %v1465_v42, 2  ;;  %v1517_v37 = vadd.f32 %v1516_v3, %v1515_v0 }
 0x489   :  { %v1440_v55 = vadd.f32 %v1439_v52, %v1438_v31  ;;  %v1491_v10 = vrot.slane %v1490_v46, 2  ;;  %v1458_v28 = vadd.f32 %v1457_v15, %v1456_v7  ;;  %v1509_v22 = vrot.slane %v1508_v36, 2 }
 0x48a   :  { %v1449_v32 = vadd.f32 %v1448_v35, %v1447_v51  ;;  %v1500_v18 = vrot.slane %v1499_v44, 2  ;;  %v1467_v13 = vadd.f32 %v1466_v27, %v1465_v42  ;;  %v1518_v50 = vrot.slane %v1517_v37, 2 }
 0x48b   :  { %v1441_v21 = vrot.slane %v1440_v55, 1  ;;  %v1492_v8 = vadd.f32 %v1491_v10, %v1490_v46  ;;  %v1510_v17 = vadd.f32 %v1509_v22, %v1508_v36  ;;  %v1459_v14 = vrot.slane %v1458_v28, 1 }
 0x48c   :  { %v1450_v20 = vrot.slane %v1449_v32, 1  ;;  %v1501_v23 = vadd.f32 %v1500_v18, %v1499_v44  ;;  %v1519_v54 = vadd.f32 %v1518_v50, %v1517_v37  ;;  %v1468_v31 = vrot.slane %v1467_v13, 1 }
 0x48d   :  { %v1442_v63 = vadd.f32 %v1441_v21, %v1440_v55  ;;  %v1493_v56 = vrot.slane %v1492_v8, 1  ;;  %v1511_v0 = vrot.slane %v1510_v17, 1  ;;  %v1460_v51 = vadd.f32 %v1459_v14, %v1458_v28  ;;  %v4912_v21 = vld [vmem:[%s7427_s3 + $0x6] sm:$0x3] }
 0x48e   :  { %v1451_v48 = vadd.f32 %v1450_v20, %v1449_v32  ;;  %v1502_v19 = vrot.slane %v1501_v23, 1  ;;  %v1520_v15 = vrot.slane %v1519_v54, 1  ;;  %v1469_v46 = vadd.f32 %v1468_v31, %v1467_v13 }
 0x48f   :  { %v1494_v3 = vadd.f32 %v1493_v56, %v1492_v8  ;;  %v1512_v35 = vadd.f32 %v1511_v0, %v1510_v17 }
 0x490   :  { %v1503_v7 = vadd.f32 %v1502_v19, %v1501_v23  ;;  %v1522_v52 = vadd.f32 %v1451_v48, %v1442_v63  ;;  %v1521_v10 = vadd.f32 %v1520_v15, %v1519_v54 }
 0x492   :  { %v1526_v42 = vadd.f32 %v1503_v7, %v1494_v3  ;;  %v1523_v27 = vadd.f32 %v1522_v52, %v1460_v51 }
 0x494   :  { %v1527_v36 = vadd.f32 %v1526_v42, %v1512_v35  ;;  %v1524_v44 = vadd.f32 %v1523_v27, %v1469_v46 }
 0x496   :  { %v1525_v22 = vmul.f32 0.0078125, %v1524_v44  ;;  %v1528_v37 = vadd.f32 %v1527_v36, %v1521_v10 }
 0x498   :  { %v1529_v55 = vmul.f32 0.0078125, %v1528_v37  ;;  %v1530_v18 = vmul.f32 %v1525_v22, %v1525_v22  ;;  %v7550_v37 = vmax.f32 %v5656_v61, 0.0 }
 0x49a   :  { %v1531_v32 = vsub.f32 %v1529_v55, %v1530_v18 }
 0x49c   :  { %v1532_v50 = vadd.f32 1e-05, %v1531_v32  ;;  %v7551_v32 = vmax.f32 %v5659_v62, 0.0 }
 0x49e   :  { %5209 = vrsqrt.f32 %v1532_v50 }
 0x4a8   :  { %v5210_v28 = vpop.eup %5209 }
 0x4a9   :  { %v1534_v8 = vmul.f32 %v5210_v28, %v4912_v21 }
 0x4ab   :  { %v1535_v20 = vmul.f32 %v1534_v8, %v1525_v22  ;;  %v1543_v17 = vrot.slane %v1534_v8, %v5509_v49 }
 0x4ad   :  { %v1537_v13 = vrot.slane %v1535_v20, 7  ;;  %v1559_v23 = vmul.f32 %v1543_v17, %v5950_v40  ;;  %v1545_v14 = vmul.f32 %v1543_v17, %v5882_v38  ;;  %v1549_v54 = vmul.f32 %v1543_v17, %v5902_v33 }
 0x4ae   :  { %v1547_v63 = vmul.f32 %v1543_v17, %v5884_v26  ;;  %v1551_v56 = vmul.f32 %v1543_v17, %v5908_v2  ;;  %v1544_v48 = vmul.f32 %v1543_v17, %v5878_v47  ;;  %v1548_v19 = vmul.f32 %v1543_v17, %v5892_v58 }
 0x4af   :  { %v1539_v0 = vsub.f32 %v4912_v21, %v1537_v13  ;;  %v1546_v31 = vmul.f32 %v1543_v17, %v5880_v24  ;;  %v1550_v3 = vmul.f32 %v1543_v17, %v5896_v29  ;;  %v1553_v7 = vmul.f32 %v1543_v17, %v5925_v6 }
 0x4b0   :  { %v1557_v40 = vmul.f32 %v1543_v17, %v5945_v60  ;;  %v1555_v38 = vmul.f32 %v1543_v17, %v5930_v41  ;;  %v1552_v33 = vmul.f32 %v1543_v17, %v5918_v30  ;;  %v1556_v26 = vmul.f32 %v1543_v17, %v5938_v53 }
 0x4b1   :  { %v1563_v2 = vrot.slane %v1539_v0, %v5513_v59  ;;  %v1554_v47 = vmul.f32 %v1543_v17, %v5920_v34  ;;  %v1558_v58 = vmul.f32 %v1543_v17, %v5940_v12  ;;  %v7548_v34 = vmax.f32 %v5650_v16, 0.0 }
 0x4b2   :  { %v7549_v12 = vmax.f32 %v5653_v43, 0.0  ;;  %v7552_v21 = vmax.f32 %v5662_v4, 0.0  ;;  %v7553_v16 = vmax.f32 %v5665_v11, 0.0  ;;  %v7554_v13 = vmax.f32 %v5671_v25, 0.0 }
 0x4b3   :  { %v1579_v52 = vadd.f32 %v1563_v2, %v1559_v23  ;;  %v1565_v24 = vadd.f32 %v1563_v2, %v1545_v14  ;;  %v1569_v51 = vadd.f32 %v1563_v2, %v1549_v54  ;;  %v1567_v29 = vadd.f32 %v1563_v2, %v1547_v63 }
 0x4b4   :  { %v1571_v15 = vadd.f32 %v1563_v2, %v1551_v56  ;;  %v1564_v6 = vadd.f32 %v1563_v2, %v1544_v48  ;;  %v1568_v42 = vadd.f32 %v1563_v2, %v1548_v19  ;;  %v1566_v60 = vadd.f32 %v1563_v2, %v1546_v31 }
 0x4b5   :  { %v1595_v35 = vmax.f32 %v1579_v52, 0.0  ;;  %v1581_v41 = vmax.f32 %v1565_v24, 0.0  ;;  %v1585_v27 = vmax.f32 %v1569_v51, 0.0  ;;  %v1583_v30 = vmax.f32 %v1567_v29, 0.0 }
 0x4b6   :  { %v1587_v46 = vmax.f32 %v1571_v15, 0.0  ;;  %v1580_v53 = vmax.f32 %v1564_v6, 0.0  ;;  %v1584_v36 = vmax.f32 %v1568_v42, 0.0  ;;  %v1570_v10 = vadd.f32 %v1563_v2, %v1550_v3 }
 0x4b7   :  { %v5981_v44 = vadd.f32 %v1581_v41, %v7548_v34  ;;  %v5985_v22 = vadd.f32 %v1585_v27, %v7549_v12  ;;  %v5989_v55 = vadd.f32 %v1583_v30, %v7550_v37  ;;  %v1582_v18 = vmax.f32 %v1566_v60, 0.0  ;;  %v7563_v34 = vld [vmem:[#allocation11_spill] sm:$0xff] }
 0x4b8   :  { %v5993_v50 = vadd.f32 %v1587_v46, %v7551_v32  ;;  %v5997_v28 = vadd.f32 %v1580_v53, %v7552_v21  ;;  %v6001_v8 = vadd.f32 %v1584_v36, %v7553_v16  ;;  %v1586_v43 = vmax.f32 %v1570_v10, 0.0  ;;  %v7560_v53 = vld [vmem:[#allocation13_spill] sm:$0xff] }
 0x4b9   :  { %v7470_v20 = vmax.f32 %v5981_v44, 0.0  ;;  %v7469_v61 = vmax.f32 %v5985_v22, 0.0  ;;  %v7468_v17 = vmax.f32 %v5989_v55, 0.0  ;;  %v6008_v62 = vadd.f32 %v1582_v18, %v7554_v13  ;;  %v7566_v18 = vld [vmem:[#allocation10_spill] sm:$0xff]  ;;  %v7569_v13 = vld [vmem:[#allocation12_spill] sm:$0xff] }
 0x4ba   :  { %v7467_v23 = vmax.f32 %v5993_v50, 0.0  ;;  %v7466_v4 = vmax.f32 %v5997_v28, 0.0  ;;  %v7465_v14 = vmax.f32 %v6001_v8, 0.0  ;;  %v7555_v11 = vmax.f32 %v5677_v9, 0.0 }
 0x4bb   :  { %v5049_v63 = vpack.c.bf16 %v7469_v61, %v7470_v20  ;;  %v7464_v56 = vmax.f32 %v6008_v62, 0.0  ;;  %v1573_v25 = vadd.f32 %v1563_v2, %v1553_v7  ;;  %v1577_v48 = vadd.f32 %v1563_v2, %v1557_v40 }
 0x4bc   :  { %v6015_v54 = vadd.f32 %v1586_v43, %v7555_v11  ;;  %v5057_v19 = vpack.c.bf16 %v7467_v23, %v7468_v17  ;;  %v5051_v9 = vpack.c.bf16 %v7465_v14, %v7466_v4  ;;  %v1575_v31 = vadd.f32 %v1563_v2, %v1555_v38 }
 0x4bd   :  { %5050 = vmatprep.subr.bf16.mxu0 %v5049_v63  ;;  %v1589_v3 = vmax.f32 %v1573_v25, 0.0  ;;  %v1593_v52 = vmax.f32 %v1577_v48, 0.0  ;;  %v7556_v24 = vmax.f32 %v5694_v45, 0.0  ;;  %v1572_v40 = vadd.f32 %v1563_v2, %v1552_v33 }
 0x4be   :  { %v7463_v0 = vmax.f32 %v6015_v54, 0.0  ;;  %5058 = vmatprep.subr.bf16.mxu1 %v5057_v19  ;;  %5052 = vmatpush1.bf16.msra.mxu0 %v5051_v9  ;;  %v1591_v29 = vmax.f32 %v1575_v31, 0.0  ;;  %v1576_v15 = vadd.f32 %v1563_v2, %v1556_v26  ;;  %v1574_v6 = vadd.f32 %v1563_v2, %v1554_v47  ;;  %v1631_v31 = vld [vmem:[#allocation3 + $0x60] sm:$0xff] }
 0x4bf   :  { %v6033_v7 = vadd.f32 %v1595_v35, %v7556_v24  ;;  %v7557_v38 = vmax.f32 %v5701_v57, 0.0  ;;  %v7558_v60 = vmax.f32 %v5704_v5, 0.0  ;;  %v1588_v35 = vmax.f32 %v1572_v40, 0.0  ;;  %v1634_v24 = vld [vmem:[#allocation3 + $0x78] sm:$0xff] }
 0x4c0   :  { %v5059_v51 = vpack.c.bf16 %v7463_v0, %v7464_v56  ;;  %v7559_v41 = vmax.f32 %v5708_v1, 0.0  ;;  %v1592_v30 = vmax.f32 %v1576_v15, 0.0  ;;  %v1578_v46 = vadd.f32 %v1563_v2, %v1558_v58 }
 0x4c1   :  { %v6041_v42 = vadd.f32 %v1589_v3, %v7557_v38  ;;  %v6045_v45 = vadd.f32 %v1593_v52, %v7558_v60  ;;  %v7462_v33 = vmax.f32 %v6033_v7, 0.0  ;;  %v1590_v26 = vmax.f32 %v1574_v6, 0.0  ;;  %v1632_v3 = vld [vmem:[#allocation3 + $0x68] sm:$0xff]  ;;  %v1633_v52 = vld [vmem:[#allocation3 + $0x70] sm:$0xff] }
 0x4c2   :  { %5060 = vmatpush1.bf16.msra.mxu1 %v5059_v51  ;;  %v6050_v27 = vadd.f32 %v1591_v29, %v7559_v41  ;;  %v7561_v36 = vmax.f32 %v7560_v53, 0.0  ;;  %v7564_v12 = vmax.f32 %v7563_v34, 0.0  ;;  %v1594_v1 = vmax.f32 %v1578_v46, 0.0 }
 0x4c3   :  { %v7461_v47 = vmax.f32 %v6041_v42, 0.0  ;;  %v7460_v57 = vmax.f32 %v6045_v45, 0.0  ;;  %v7567_v32 = vmax.f32 %v7566_v18, 0.0  ;;  %v7570_v11 = vmax.f32 %v7569_v13, 0.0 }
 0x4c4   :  { %v6056_v5 = vadd.f32 %v1588_v35, %v7561_v36  ;;  %v7459_v10 = vmax.f32 %v6050_v27, 0.0  ;;  %v6061_v37 = vadd.f32 %v1592_v30, %v7564_v12 }
 0x4c5   :  { %v6065_v21 = vadd.f32 %v1590_v26, %v7567_v32  ;;  %v5053_v2 = vpack.c.bf16 %v7460_v57, %v7461_v47  ;;  %v6079_v63 = vadd.f32 %v1594_v1, %v7570_v11 }
 0x4c6   :  { %7562 = vst [vmem:[#allocation13_spill] sm:$0xff] %v6056_v5  ;;  %7565 = vst [vmem:[#allocation11_spill] sm:$0xff] %v6061_v37  ;;  %v7458_v58 = vmax.f32 %v6056_v5, 0.0  ;;  %v5061_v16 = vpack.c.bf16 %v7462_v33, %v7459_v10  ;;  %v7457_v43 = vmax.f32 %v6061_v37, 0.0 }
 0x4c7   :  { %7568 = vst [vmem:[#allocation10_spill] sm:$0xff] %v6065_v21  ;;  %7571 = vst [vmem:[#allocation12_spill] sm:$0xff] %v6079_v63  ;;  %v7456_v25 = vmax.f32 %v6065_v21, 0.0  ;;  %5054 = vmatprep.subr.bf16.mxu0 %v5053_v2  ;;  %v7455_v19 = vmax.f32 %v6079_v63, 0.0 }
 0x4c8   :  { %5062 = vmatprep.subr.bf16.mxu1 %v5061_v16  ;;  %v5055_v48 = vpack.c.bf16 %v7457_v43, %v7458_v58 }
 0x4c9   :  { %v5063_v9 = vpack.c.bf16 %v7455_v19, %v7456_v25 }
 0x4ca   :  { %5056 = vmatpush1.bf16.msra.mxu0 %v5055_v48 }
 0x4cb   :  { %5064 = vmatpush1.bf16.msra.mxu1 %v5063_v9 }
 0x4cd   :  { %4922 = vmatmul.mubr.msk.f32.vlgmr.msra.gmra.mrb[40].mxu0 %vm493_vm2, %v1631_v31 }
 0x4ce   :  { %1717 = vmatprep.mubr.f32.mxu0 %v7547_v39  ;;  %4926 = vmatmul.mubr.msk.f32.vlgmr.msra.gmra.mrb[40].mxu1 %vm493_vm2, %v1631_v31 }
 0x4cf   :  { %1806 = vmatprep.mubr.f32.mxu1 %v7547_v39 }
 0x4d1   :  { %4923 = vmatmul.mubr.msk.f32.gmra.mrb[42].mxu0 %vm493_vm2, %v1632_v3 }
 0x4d2   :  { %1723 = vmatprep.mubr.f32.mxu0 %v7547_v39  ;;  %4927 = vmatmul.mubr.msk.f32.gmra.mrb[42].mxu1 %vm493_vm2, %v1632_v3 }
 0x4d3   :  { %1812 = vmatprep.mubr.f32.mxu1 %v7547_v39 }
 0x4d5   :  { %4924 = vmatmul.mubr.msk.f32.gmra.mrb[44].mxu0 %vm493_vm2, %v1633_v52 }
 0x4d6   :  { %1729 = vmatprep.mubr.f32.mxu0 %v7547_v39  ;;  %4928 = vmatmul.mubr.msk.f32.gmra.mrb[44].mxu1 %vm493_vm2, %v1633_v52 }
 0x4d7   :  { %1818 = vmatprep.mubr.f32.mxu1 %v7547_v39 }
 0x4d9   :  { %4925 = vmatmul.mubr.msk.f32.gmra.mrb[46].mxu0 %vm493_vm2, %v1634_v24 }
 0x4da   :  { %2070 = vmatprep.mubr.f32.mxu0 %v7547_v39  ;;  %4929 = vmatmul.mubr.msk.f32.gmra.mrb[46].mxu1 %vm493_vm2, %v1634_v24 }
 0x4db   :  { %2159 = vmatprep.mubr.f32.mxu1 %v7547_v39 }
 0x5a0   :  { %v6107_v40 = vpop.f32.mrb[40].mxu0 }
 0x5a1   :  { %v6109_v51 = vpop.f32.mrb[41].mxu0  ;;  %v6111_v29 = vpop.f32.mrb[40].mxu1  ;;  %v1861_v38 = vmul.f32 %v6107_v40, %v6107_v40 }
 0x5a2   :  { %v6113_v15 = vpop.f32.mrb[41].mxu1  ;;  %v1863_v30 = vmul.f32 %v6111_v29, %v6111_v29  ;;  %v1862_v46 = vmul.f32 %v6109_v51, %v6109_v51 }
 0x5a3   :  { %v1864_v16 = vmul.f32 %v6113_v15, %v6113_v15 }
 0x5a4   :  { %v6115_v6 = vpop.f32.mrb[42].mxu0 }
 0x5a5   :  { %v1825_v60 = vadd.f32 %v6115_v6, %v6107_v40  ;;  %v1865_v35 = vmul.f32 %v6115_v6, %v6115_v6  ;;  %v6123_v41 = vpop.f32.mrb[43].mxu0  ;;  %v6133_v36 = vpop.f32.mrb[42].mxu1 }
 0x5a6   :  { %v1834_v26 = vadd.f32 %v6123_v41, %v6109_v51  ;;  %v1866_v53 = vmul.f32 %v6123_v41, %v6123_v41  ;;  %v1843_v12 = vadd.f32 %v6133_v36, %v6111_v29  ;;  %v1867_v1 = vmul.f32 %v6133_v36, %v6133_v36  ;;  %v6139_v18 = vpop.f32.mrb[43].mxu1 }
 0x5a7   :  { %v1877_v34 = vadd.f32 %v1865_v35, %v1861_v38  ;;  %v1852_v13 = vadd.f32 %v6139_v18, %v6113_v15  ;;  %v1868_v11 = vmul.f32 %v6139_v18, %v6139_v18 }
 0x5a8   :  { %v1886_v32 = vadd.f32 %v1866_v53, %v1862_v46  ;;  %v6141_v2 = vpop.f32.mrb[44].mxu0  ;;  %v1895_v3 = vadd.f32 %v1867_v1, %v1863_v30 }
 0x5a9   :  { %v1826_v48 = vadd.f32 %v1825_v60, %v6141_v2  ;;  %v1869_v9 = vmul.f32 %v6141_v2, %v6141_v2  ;;  %v6152_v31 = vpop.f32.mrb[45].mxu0  ;;  %v1904_v38 = vadd.f32 %v1868_v11, %v1864_v16  ;;  %v6157_v35 = vpop.f32.mrb[44].mxu1 }
 0x5aa   :  { %v1835_v52 = vadd.f32 %v1834_v26, %v6152_v31  ;;  %v1870_v24 = vmul.f32 %v6152_v31, %v6152_v31  ;;  %v1844_v53 = vadd.f32 %v1843_v12, %v6157_v35  ;;  %v1871_v60 = vmul.f32 %v6157_v35, %v6157_v35  ;;  %v6162_v19 = vpop.f32.mrb[45].mxu1 }
 0x5ab   :  { %v1878_v46 = vadd.f32 %v1877_v34, %v1869_v9  ;;  %v1853_v30 = vadd.f32 %v1852_v13, %v6162_v19  ;;  %v1872_v26 = vmul.f32 %v6162_v19, %v6162_v19 }
 0x5ac   :  { %v1887_v25 = vadd.f32 %v1886_v32, %v1870_v24  ;;  %v6164_v43 = vpop.f32.mrb[46].mxu0  ;;  %v1896_v12 = vadd.f32 %v1895_v3, %v1871_v60 }
 0x5ad   :  { %v1827_v1 = vadd.f32 %v1826_v48, %v6164_v43  ;;  %v1873_v34 = vmul.f32 %v6164_v43, %v6164_v43  ;;  %v6172_v16 = vpop.f32.mrb[47].mxu0  ;;  %v1905_v9 = vadd.f32 %v1904_v38, %v1872_v26  ;;  %v6177_v24 = vpop.f32.mrb[46].mxu1 }
 0x5ae   :  { %v1836_v11 = vadd.f32 %v1835_v52, %v6172_v16  ;;  %v1874_v32 = vmul.f32 %v6172_v16, %v6172_v16  ;;  %v1845_v10 = vadd.f32 %v1844_v53, %v6177_v24  ;;  %v1875_v48 = vmul.f32 %v6177_v24, %v6177_v24  ;;  %v6182_v57 = vpop.f32.mrb[47].mxu1 }
 0x5af   :  { %v1828_v13 = vrot.slane %v1827_v1, 4  ;;  %v1879_v58 = vadd.f32 %v1878_v46, %v1873_v34  ;;  %v1854_v3 = vadd.f32 %v1853_v30, %v6182_v57  ;;  %v1876_v52 = vmul.f32 %v6182_v57, %v6182_v57 }
 0x5b0   :  { %v1837_v47 = vrot.slane %v1836_v11, 4  ;;  %v1888_v33 = vadd.f32 %v1887_v25, %v1874_v32  ;;  %v1846_v26 = vrot.slane %v1845_v10, 4  ;;  %v1897_v0 = vadd.f32 %v1896_v12, %v1875_v48 }
 0x5b1   :  { %v1829_v60 = vadd.f32 %v1828_v13, %v1827_v1  ;;  %v1880_v38 = vrot.slane %v1879_v58, 4  ;;  %v1855_v34 = vrot.slane %v1854_v3, 4  ;;  %v1906_v53 = vadd.f32 %v1905_v9, %v1876_v52 }
 0x5b2   :  { %v1838_v56 = vadd.f32 %v1837_v47, %v1836_v11  ;;  %v1889_v46 = vrot.slane %v1888_v33, 4  ;;  %v1847_v23 = vadd.f32 %v1846_v26, %v1845_v10  ;;  %v1898_v17 = vrot.slane %v1897_v0, 4 }
 0x5b3   :  { %v1830_v14 = vrot.slane %v1829_v60, 2  ;;  %v1881_v4 = vadd.f32 %v1880_v38, %v1879_v58  ;;  %v1856_v25 = vadd.f32 %v1855_v34, %v1854_v3  ;;  %v1907_v32 = vrot.slane %v1906_v53, 4 }
 0x5b4   :  { %v1839_v61 = vrot.slane %v1838_v56, 2  ;;  %v1890_v20 = vadd.f32 %v1889_v46, %v1888_v33  ;;  %v1848_v21 = vrot.slane %v1847_v23, 2  ;;  %v1899_v37 = vadd.f32 %v1898_v17, %v1897_v0 }
 0x5b5   :  { %v1831_v30 = vadd.f32 %v1830_v14, %v1829_v60  ;;  %v1882_v63 = vrot.slane %v1881_v4, 2  ;;  %v1857_v5 = vrot.slane %v1856_v25, 2  ;;  %v1908_v12 = vadd.f32 %v1907_v32, %v1906_v53 }
 0x5b6   :  { %v1840_v1 = vadd.f32 %v1839_v61, %v1838_v56  ;;  %v1891_v13 = vrot.slane %v1890_v20, 2  ;;  %v1849_v48 = vadd.f32 %v1848_v21, %v1847_v23  ;;  %v1900_v9 = vrot.slane %v1899_v37, 2 }
 0x5b7   :  { %v1832_v47 = vrot.slane %v1831_v30, 1  ;;  %v1883_v11 = vadd.f32 %v1882_v63, %v1881_v4  ;;  %v1858_v10 = vadd.f32 %v1857_v5, %v1856_v25  ;;  %v1909_v38 = vrot.slane %v1908_v12, 2 }
 0x5b8   :  { %v1841_v52 = vrot.slane %v1840_v1, 1  ;;  %v1892_v58 = vadd.f32 %v1891_v13, %v1890_v20  ;;  %v1850_v3 = vrot.slane %v1849_v48, 1  ;;  %v1901_v46 = vadd.f32 %v1900_v9, %v1899_v37 }
 0x5b9   :  { %v1833_v26 = vadd.f32 %v1832_v47, %v1831_v30  ;;  %v1884_v33 = vrot.slane %v1883_v11, 1  ;;  %v1859_v34 = vrot.slane %v1858_v10, 1  ;;  %v1910_v17 = vadd.f32 %v1909_v38, %v1908_v12  ;;  %v4921_v12 = vld [vmem:[%s7427_s3 + $0x8] sm:$0x3] }
 0x5ba   :  { %v1842_v14 = vadd.f32 %v1841_v52, %v1840_v1  ;;  %v1893_v60 = vrot.slane %v1892_v58, 1  ;;  %v1902_v56 = vrot.slane %v1901_v46, 1  ;;  %v1851_v32 = vadd.f32 %v1850_v3, %v1849_v48 }
 0x5bb   :  { %v1885_v61 = vadd.f32 %v1884_v33, %v1883_v11  ;;  %v1911_v4 = vrot.slane %v1910_v17, 1  ;;  %v1860_v20 = vadd.f32 %v1859_v34, %v1858_v10 }
 0x5bc   :  { %v1894_v0 = vadd.f32 %v1893_v60, %v1892_v58  ;;  %v1913_v53 = vadd.f32 %v1842_v14, %v1833_v26  ;;  %v1903_v21 = vadd.f32 %v1902_v56, %v1901_v46 }
 0x5bd   :  { %v1912_v25 = vadd.f32 %v1911_v4, %v1910_v17 }
 0x5be   :  { %v1917_v23 = vadd.f32 %v1894_v0, %v1885_v61  ;;  %v1914_v63 = vadd.f32 %v1913_v53, %v1851_v32 }
 0x5c0   :  { %v1918_v5 = vadd.f32 %v1917_v23, %v1903_v21  ;;  %v1915_v30 = vadd.f32 %v1914_v63, %v1860_v20 }
 0x5c2   :  { %v1916_v13 = vmul.f32 0.0078125, %v1915_v30  ;;  %v1919_v47 = vadd.f32 %v1918_v5, %v1912_v25 }
 0x5c4   :  { %v1920_v37 = vmul.f32 0.0078125, %v1919_v47  ;;  %v1921_v1 = vmul.f32 %v1916_v13, %v1916_v13 }
 0x5c6   :  { %v1922_v9 = vsub.f32 %v1920_v37, %v1921_v1 }
 0x5c8   :  { %v1923_v52 = vadd.f32 1e-05, %v1922_v9 }
 0x5ca   :  { %5211 = vrsqrt.f32 %v1923_v52 }
 0x5d4   :  { %v5212_v11 = vpop.eup %5211 }
 0x5d5   :  { %v1925_v48 = vmul.f32 %v5212_v11, %v4921_v12 }
 0x5d7   :  { %v1926_v58 = vmul.f32 %v1925_v48, %v1916_v13  ;;  %v1934_v38 = vrot.slane %v1925_v48, %v5509_v49 }
 0x5d9   :  { %v1928_v10 = vrot.slane %v1926_v58, 7  ;;  %v1950_v26 = vmul.f32 %v1934_v38, %v6182_v57  ;;  %v1936_v33 = vmul.f32 %v1934_v38, %v6109_v51  ;;  %v1940_v3 = vmul.f32 %v1934_v38, %v6123_v41 }
 0x5da   :  { %v1938_v46 = vmul.f32 %v1934_v38, %v6113_v15  ;;  %v1942_v14 = vmul.f32 %v1934_v38, %v6139_v18  ;;  %v1935_v60 = vmul.f32 %v1934_v38, %v6107_v40  ;;  %v1939_v34 = vmul.f32 %v1934_v38, %v6115_v6 }
 0x5db   :  { %v1930_v17 = vsub.f32 %v4921_v12, %v1928_v10  ;;  %v1937_v61 = vmul.f32 %v1934_v38, %v6111_v29  ;;  %v1941_v56 = vmul.f32 %v1934_v38, %v6133_v36  ;;  %v1944_v0 = vmul.f32 %v1934_v38, %v6152_v31 }
 0x5dc   :  { %v1948_v57 = vmul.f32 %v1934_v38, %v6172_v16  ;;  %v1946_v51 = vmul.f32 %v1934_v38, %v6162_v19  ;;  %v1943_v41 = vmul.f32 %v1934_v38, %v6141_v2  ;;  %v1947_v15 = vmul.f32 %v1934_v38, %v6164_v43 }
 0x5dd   :  { %v1954_v18 = vrot.slane %v1930_v17, %v5513_v59  ;;  %v1945_v40 = vmul.f32 %v1934_v38, %v6157_v35  ;;  %v1949_v6 = vmul.f32 %v1934_v38, %v6177_v24 }
 0x5df   :  { %v1970_v53 = vadd.f32 %v1954_v18, %v1950_v26  ;;  %v1956_v29 = vadd.f32 %v1954_v18, %v1936_v33  ;;  %v1960_v32 = vadd.f32 %v1954_v18, %v1940_v3  ;;  %v1958_v36 = vadd.f32 %v1954_v18, %v1938_v46 }
 0x5e0   :  { %v1962_v4 = vadd.f32 %v1954_v18, %v1942_v14  ;;  %v1955_v31 = vadd.f32 %v1954_v18, %v1935_v60  ;;  %v1959_v23 = vadd.f32 %v1954_v18, %v1939_v34  ;;  %v1957_v16 = vadd.f32 %v1954_v18, %v1937_v61 }
 0x5e1   :  { %v1972_v21 = vmax.f32 %v1956_v29, 0.0  ;;  %v1976_v19 = vmax.f32 %v1960_v32, 0.0  ;;  %v1974_v63 = vmax.f32 %v1958_v36, 0.0  ;;  %v1961_v2 = vadd.f32 %v1954_v18, %v1941_v56  ;;  %v1990_v56 = vld [vmem:[#allocation3 + $0x80] sm:$0xff] }
 0x5e2   :  { %v1978_v20 = vmax.f32 %v1962_v4, 0.0  ;;  %v1971_v43 = vmax.f32 %v1955_v31, 0.0  ;;  %v1975_v5 = vmax.f32 %v1959_v23, 0.0  ;;  %v1973_v25 = vmax.f32 %v1957_v16, 0.0 }
 0x5e3   :  { %v5065_v30 = vpack.c.bf16 %v1976_v19, %v1972_v21  ;;  %v1977_v35 = vmax.f32 %v1961_v2, 0.0  ;;  %v1964_v13 = vadd.f32 %v1954_v18, %v1944_v0  ;;  %v1968_v24 = vadd.f32 %v1954_v18, %v1948_v57  ;;  %v1991_v0 = vld [vmem:[#allocation3 + $0x88] sm:$0xff]  ;;  %v1992_v57 = vld [vmem:[#allocation3 + $0x90] sm:$0xff] }
 0x5e4   :  { %v5073_v47 = vpack.c.bf16 %v1978_v20, %v1974_v63  ;;  %v5067_v37 = vpack.c.bf16 %v1975_v5, %v1971_v43  ;;  %v1966_v1 = vadd.f32 %v1954_v18, %v1946_v51  ;;  %v1986_v9 = vmax.f32 %v1970_v53, 0.0  ;;  %v1993_v51 = vld [vmem:[#allocation3 + $0x98] sm:$0xff] }
 0x5e5   :  { %5066 = vmatprep.subr.bf16.mxu0 %v5065_v30  ;;  %v5075_v52 = vpack.c.bf16 %v1977_v35, %v1973_v25  ;;  %v1980_v12 = vmax.f32 %v1964_v13, 0.0  ;;  %v1984_v11 = vmax.f32 %v1968_v24, 0.0  ;;  %v1963_v48 = vadd.f32 %v1954_v18, %v1943_v41 }
 0x5e6   :  { %5074 = vmatprep.subr.bf16.mxu1 %v5073_v47  ;;  %5068 = vmatpush1.bf16.msra.mxu0 %v5067_v37  ;;  %v1982_v58 = vmax.f32 %v1966_v1, 0.0  ;;  %v1967_v38 = vadd.f32 %v1954_v18, %v1947_v15  ;;  %v1965_v10 = vadd.f32 %v1954_v18, %v1945_v40  ;;  %v1969_v26 = vadd.f32 %v1954_v18, %v1949_v6 }
 0x5e7   :  { %5076 = vmatpush1.bf16.msra.mxu1 %v5075_v52  ;;  %v5069_v33 = vpack.c.bf16 %v1984_v11, %v1980_v12  ;;  %v1979_v3 = vmax.f32 %v1963_v48, 0.0 }
 0x5e8   :  { %v5077_v46 = vpack.c.bf16 %v1986_v9, %v1982_v58  ;;  %v1983_v14 = vmax.f32 %v1967_v38, 0.0  ;;  %v1981_v60 = vmax.f32 %v1965_v10, 0.0  ;;  %v1985_v34 = vmax.f32 %v1969_v26, 0.0 }
 0x5e9   :  { %5070 = vmatprep.subr.bf16.mxu0 %v5069_v33 }
 0x5ea   :  { %5078 = vmatprep.subr.bf16.mxu1 %v5077_v46  ;;  %v5071_v17 = vpack.c.bf16 %v1983_v14, %v1979_v3  ;;  %v5079_v61 = vpack.c.bf16 %v1985_v34, %v1981_v60 }
 0x5ec   :  { %5072 = vmatpush1.bf16.msra.mxu0 %v5071_v17  ;;  %5080 = vmatpush1.bf16.msra.mxu1 %v5079_v61 }
 0x5ef   :  { %4931 = vmatmul.mubr.msk.f32.vlgmr.msra.gmra.mrb[48].mxu0 %vm493_vm2, %v1990_v56  ;;  %4935 = vmatmul.mubr.msk.f32.vlgmr.msra.gmra.mrb[48].mxu1 %vm493_vm2, %v1990_v56 }
 0x5f0   :  { %2076 = vmatprep.mubr.f32.mxu0 %v7547_v39  ;;  %2165 = vmatprep.mubr.f32.mxu1 %v7547_v39 }
 0x5f3   :  { %4932 = vmatmul.mubr.msk.f32.gmra.mrb[50].mxu0 %vm493_vm2, %v1991_v0  ;;  %4936 = vmatmul.mubr.msk.f32.gmra.mrb[50].mxu1 %vm493_vm2, %v1991_v0 }
 0x5f4   :  { %2082 = vmatprep.mubr.f32.mxu0 %v7547_v39  ;;  %2171 = vmatprep.mubr.f32.mxu1 %v7547_v39 }
 0x5f7   :  { %4933 = vmatmul.mubr.msk.f32.gmra.mrb[52].mxu0 %vm493_vm2, %v1992_v57  ;;  %4937 = vmatmul.mubr.msk.f32.gmra.mrb[52].mxu1 %vm493_vm2, %v1992_v57 }
 0x5f8   :  { %2088 = vmatprep.mubr.f32.mxu0 %v7547_v39  ;;  %2177 = vmatprep.mubr.f32.mxu1 %v7547_v39 }
 0x5fb   :  { %4934 = vmatmul.mubr.msk.f32.gmra.mrb[54].mxu0 %vm493_vm2, %v1993_v51  ;;  %4938 = vmatmul.mubr.msk.f32.gmra.mrb[54].mxu1 %vm493_vm2, %v1993_v51 }
 0x5fc   :  { %2461 = vmatprep.mubr.f32.mxu0 %v7547_v39  ;;  %2550 = vmatprep.mubr.f32.mxu1 %v7547_v39 }
 0x6c2   :  { %v6224_v41 = vpop.f32.mrb[48].mxu0  ;;  %v6226_v15 = vpop.f32.mrb[48].mxu1 }
 0x6c3   :  { %v6228_v18 = vpop.f32.mrb[49].mxu0  ;;  %v6230_v40 = vpop.f32.mrb[49].mxu1  ;;  %v2222_v6 = vmul.f32 %v6226_v15, %v6226_v15  ;;  %v2220_v53 = vmul.f32 %v6224_v41, %v6224_v41 }
 0x6c4   :  { %v2221_v29 = vmul.f32 %v6228_v18, %v6228_v18  ;;  %v2223_v36 = vmul.f32 %v6230_v40, %v6230_v40 }
 0x6c6   :  { %v6238_v32 = vpop.f32.mrb[50].mxu0  ;;  %v6242_v4 = vpop.f32.mrb[50].mxu1 }
 0x6c7   :  { %v2184_v31 = vadd.f32 %v6238_v32, %v6224_v41  ;;  %v2224_v23 = vmul.f32 %v6238_v32, %v6238_v32  ;;  %v6248_v16 = vpop.f32.mrb[51].mxu0  ;;  %v2202_v21 = vadd.f32 %v6242_v4, %v6226_v15  ;;  %v2226_v19 = vmul.f32 %v6242_v4, %v6242_v4  ;;  %v6254_v63 = vpop.f32.mrb[51].mxu1 }
 0x6c8   :  { %v2193_v2 = vadd.f32 %v6248_v16, %v6228_v18  ;;  %v2225_v20 = vmul.f32 %v6248_v16, %v6248_v16  ;;  %v2211_v43 = vadd.f32 %v6254_v63, %v6230_v40  ;;  %v2227_v5 = vmul.f32 %v6254_v63, %v6254_v63 }
 0x6c9   :  { %v2236_v25 = vadd.f32 %v2224_v23, %v2220_v53  ;;  %v2254_v30 = vadd.f32 %v2226_v19, %v2222_v6 }
 0x6ca   :  { %v2245_v35 = vadd.f32 %v2225_v20, %v2221_v29  ;;  %v6264_v13 = vpop.f32.mrb[52].mxu0  ;;  %v2263_v24 = vadd.f32 %v2227_v5, %v2223_v36  ;;  %v6266_v47 = vpop.f32.mrb[52].mxu1 }
 0x6cb   :  { %v2185_v37 = vadd.f32 %v2184_v31, %v6264_v13  ;;  %v2228_v1 = vmul.f32 %v6264_v13, %v6264_v13  ;;  %v6271_v9 = vpop.f32.mrb[53].mxu0  ;;  %v2203_v52 = vadd.f32 %v2202_v21, %v6266_v47  ;;  %v2230_v12 = vmul.f32 %v6266_v47, %v6266_v47  ;;  %v6276_v11 = vpop.f32.mrb[53].mxu1 }
 0x6cc   :  { %v2194_v48 = vadd.f32 %v2193_v2, %v6271_v9  ;;  %v2229_v58 = vmul.f32 %v6271_v9, %v6271_v9  ;;  %v2212_v38 = vadd.f32 %v2211_v43, %v6276_v11  ;;  %v2231_v10 = vmul.f32 %v6276_v11, %v6276_v11 }
 0x6cd   :  { %v2237_v26 = vadd.f32 %v2236_v25, %v2228_v1  ;;  %v2255_v33 = vadd.f32 %v2254_v30, %v2230_v12 }
 0x6ce   :  { %v2246_v3 = vadd.f32 %v2245_v35, %v2229_v58  ;;  %v6284_v46 = vpop.f32.mrb[54].mxu0  ;;  %v2264_v14 = vadd.f32 %v2263_v24, %v2231_v10  ;;  %v6286_v60 = vpop.f32.mrb[54].mxu1 }
 0x6cf   :  { %v2186_v34 = vadd.f32 %v2185_v37, %v6284_v46  ;;  %v2232_v17 = vmul.f32 %v6284_v46, %v6284_v46  ;;  %v6291_v61 = vpop.f32.mrb[55].mxu0  ;;  %v2204_v56 = vadd.f32 %v2203_v52, %v6286_v60  ;;  %v2234_v0 = vmul.f32 %v6286_v60, %v6286_v60  ;;  %v6296_v57 = vpop.f32.mrb[55].mxu1 }
 0x6d0   :  { %v2195_v51 = vadd.f32 %v2194_v48, %v6291_v61  ;;  %v2233_v6 = vmul.f32 %v6291_v61, %v6291_v61  ;;  %v2213_v53 = vadd.f32 %v2212_v38, %v6296_v57  ;;  %v2235_v29 = vmul.f32 %v6296_v57, %v6296_v57 }
 0x6d1   :  { %v2187_v36 = vrot.slane %v2186_v34, 4  ;;  %v2238_v31 = vadd.f32 %v2237_v26, %v2232_v17  ;;  %v2205_v23 = vrot.slane %v2204_v56, 4  ;;  %v2256_v21 = vadd.f32 %v2255_v33, %v2234_v0 }
 0x6d2   :  { %v2196_v19 = vrot.slane %v2195_v51, 4  ;;  %v2247_v2 = vadd.f32 %v2246_v3, %v2233_v6  ;;  %v2214_v20 = vrot.slane %v2213_v53, 4  ;;  %v2265_v43 = vadd.f32 %v2264_v14, %v2235_v29 }
 0x6d3   :  { %v2188_v5 = vadd.f32 %v2187_v36, %v2186_v34  ;;  %v2239_v25 = vrot.slane %v2238_v31, 4  ;;  %v2206_v30 = vadd.f32 %v2205_v23, %v2204_v56  ;;  %v2257_v35 = vrot.slane %v2256_v21, 4 }
 0x6d4   :  { %v2197_v24 = vadd.f32 %v2196_v19, %v2195_v51  ;;  %v2248_v37 = vrot.slane %v2247_v2, 4  ;;  %v2215_v1 = vadd.f32 %v2214_v20, %v2213_v53  ;;  %v2266_v52 = vrot.slane %v2265_v43, 4 }
 0x6d5   :  { %v2189_v12 = vrot.slane %v2188_v5, 2  ;;  %v2240_v48 = vadd.f32 %v2239_v25, %v2238_v31  ;;  %v2207_v58 = vrot.slane %v2206_v30, 2  ;;  %v2258_v38 = vadd.f32 %v2257_v35, %v2256_v21 }
 0x6d6   :  { %v2198_v10 = vrot.slane %v2197_v24, 2  ;;  %v2249_v26 = vadd.f32 %v2248_v37, %v2247_v2  ;;  %v2216_v17 = vrot.slane %v2215_v1, 2  ;;  %v2267_v33 = vadd.f32 %v2266_v52, %v2265_v43 }
 0x6d7   :  { %v2190_v0 = vadd.f32 %v2189_v12, %v2188_v5  ;;  %v2241_v3 = vrot.slane %v2240_v48, 2  ;;  %v2208_v6 = vadd.f32 %v2207_v58, %v2206_v30  ;;  %v2259_v14 = vrot.slane %v2258_v38, 2 }
 0x6d8   :  { %v2199_v34 = vadd.f32 %v2198_v10, %v2197_v24  ;;  %v2250_v29 = vrot.slane %v2249_v26, 2  ;;  %v2217_v56 = vadd.f32 %v2216_v17, %v2215_v1  ;;  %v2268_v36 = vrot.slane %v2267_v33, 2 }
 0x6d9   :  { %v2191_v51 = vrot.slane %v2190_v0, 1  ;;  %v2242_v23 = vadd.f32 %v2241_v3, %v2240_v48  ;;  %v2260_v53 = vadd.f32 %v2259_v14, %v2258_v38  ;;  %v2209_v31 = vrot.slane %v2208_v6, 1 }
 0x6da   :  { %v2200_v19 = vrot.slane %v2199_v34, 1  ;;  %v2251_v20 = vadd.f32 %v2250_v29, %v2249_v26  ;;  %v2269_v25 = vadd.f32 %v2268_v36, %v2267_v33  ;;  %v2218_v5 = vrot.slane %v2217_v56, 1 }
 0x6db   :  { %v2192_v21 = vadd.f32 %v2191_v51, %v2190_v0  ;;  %v2243_v35 = vrot.slane %v2242_v23, 1  ;;  %v2261_v43 = vrot.slane %v2260_v53, 1  ;;  %v2210_v24 = vadd.f32 %v2209_v31, %v2208_v6  ;;  %v4930_v51 = vld [vmem:[%s7427_s3 + $0xa] sm:$0x3] }
 0x6dc   :  { %v2201_v2 = vadd.f32 %v2200_v19, %v2199_v34  ;;  %v2252_v37 = vrot.slane %v2251_v20, 1  ;;  %v2270_v58 = vrot.slane %v2269_v25, 1  ;;  %v2219_v48 = vadd.f32 %v2218_v5, %v2217_v56 }
 0x6dd   :  { %v2244_v52 = vadd.f32 %v2243_v35, %v2242_v23  ;;  %v2262_v10 = vadd.f32 %v2261_v43, %v2260_v53 }
 0x6de   :  { %v2253_v30 = vadd.f32 %v2252_v37, %v2251_v20  ;;  %v2272_v12 = vadd.f32 %v2201_v2, %v2192_v21  ;;  %v2271_v3 = vadd.f32 %v2270_v58, %v2269_v25 }
 0x6e0   :  { %v2276_v1 = vadd.f32 %v2253_v30, %v2244_v52  ;;  %v2273_v17 = vadd.f32 %v2272_v12, %v2210_v24 }
 0x6e2   :  { %v2277_v38 = vadd.f32 %v2276_v1, %v2262_v10  ;;  %v2274_v26 = vadd.f32 %v2273_v17, %v2219_v48 }
 0x6e4   :  { %v2275_v14 = vmul.f32 0.0078125, %v2274_v26  ;;  %v2278_v33 = vadd.f32 %v2277_v38, %v2271_v3 }
 0x6e6   :  { %v2279_v0 = vmul.f32 0.0078125, %v2278_v33  ;;  %v2280_v29 = vmul.f32 %v2275_v14, %v2275_v14  ;;  %v7574_v33 = vmax.f32 %v5989_v55, 0.0 }
 0x6e8   :  { %v2281_v34 = vsub.f32 %v2279_v0, %v2280_v29 }
 0x6ea   :  { %v2282_v36 = vadd.f32 1e-05, %v2281_v34  ;;  %v7575_v34 = vmax.f32 %v5993_v50, 0.0 }
 0x6ec   :  { %5213 = vrsqrt.f32 %v2282_v36 }
 0x6f6   :  { %v5214_v6 = vpop.eup %5213 }
 0x6f7   :  { %v2284_v23 = vmul.f32 %v5214_v6, %v4930_v51 }
 0x6f9   :  { %v2285_v19 = vmul.f32 %v2284_v23, %v2275_v14  ;;  %v2293_v53 = vrot.slane %v2284_v23, %v5509_v49 }
 0x6fb   :  { %v2287_v56 = vrot.slane %v2285_v19, 7  ;;  %v2309_v20 = vmul.f32 %v2293_v53, %v6296_v57  ;;  %v2295_v31 = vmul.f32 %v2293_v53, %v6228_v18  ;;  %v2299_v25 = vmul.f32 %v2293_v53, %v6248_v16 }
 0x6fc   :  { %v2297_v21 = vmul.f32 %v2293_v53, %v6230_v40  ;;  %v2301_v35 = vmul.f32 %v2293_v53, %v6254_v63  ;;  %v2294_v2 = vmul.f32 %v2293_v53, %v6224_v41  ;;  %v2298_v37 = vmul.f32 %v2293_v53, %v6238_v32 }
 0x6fd   :  { %v2289_v43 = vsub.f32 %v4930_v51, %v2287_v56  ;;  %v2296_v5 = vmul.f32 %v2293_v53, %v6226_v15  ;;  %v2300_v52 = vmul.f32 %v2293_v53, %v6242_v4  ;;  %v2303_v30 = vmul.f32 %v2293_v53, %v6271_v9 }
 0x6fe   :  { %v2307_v57 = vmul.f32 %v2293_v53, %v6291_v61  ;;  %v2305_v18 = vmul.f32 %v2293_v53, %v6276_v11  ;;  %v2302_v16 = vmul.f32 %v2293_v53, %v6264_v13  ;;  %v2306_v40 = vmul.f32 %v2293_v53, %v6284_v46 }
 0x6ff   :  { %v2313_v63 = vrot.slane %v2289_v43, %v5513_v59  ;;  %v2304_v41 = vmul.f32 %v2293_v53, %v6266_v47  ;;  %v2308_v32 = vmul.f32 %v2293_v53, %v6286_v60  ;;  %v7572_v47 = vmax.f32 %v5981_v44, 0.0 }
 0x700   :  { %v7573_v60 = vmax.f32 %v5985_v22, 0.0  ;;  %v7576_v51 = vmax.f32 %v5997_v28, 0.0  ;;  %v7577_v44 = vmax.f32 %v6001_v8, 0.0  ;;  %v7578_v56 = vmax.f32 %v6008_v62, 0.0 }
 0x701   :  { %v2329_v12 = vadd.f32 %v2313_v63, %v2309_v20  ;;  %v2315_v15 = vadd.f32 %v2313_v63, %v2295_v31  ;;  %v2319_v24 = vadd.f32 %v2313_v63, %v2299_v25  ;;  %v2317_v4 = vadd.f32 %v2313_v63, %v2297_v21 }
 0x702   :  { %v2321_v58 = vadd.f32 %v2313_v63, %v2301_v35  ;;  %v2314_v9 = vadd.f32 %v2313_v63, %v2294_v2  ;;  %v2318_v1 = vadd.f32 %v2313_v63, %v2298_v37  ;;  %v2316_v61 = vadd.f32 %v2313_v63, %v2296_v5 }
 0x703   :  { %v2345_v10 = vmax.f32 %v2329_v12, 0.0  ;;  %v2331_v11 = vmax.f32 %v2315_v15, 0.0  ;;  %v2335_v17 = vmax.f32 %v2319_v24, 0.0  ;;  %v2333_v13 = vmax.f32 %v2317_v4, 0.0 }
 0x704   :  { %v2337_v48 = vmax.f32 %v2321_v58, 0.0  ;;  %v2330_v46 = vmax.f32 %v2314_v9, 0.0  ;;  %v2334_v38 = vmax.f32 %v2318_v1, 0.0  ;;  %v2320_v3 = vadd.f32 %v2313_v63, %v2300_v52 }
 0x705   :  { %v6327_v26 = vadd.f32 %v2331_v11, %v7572_v47  ;;  %v6331_v14 = vadd.f32 %v2335_v17, %v7573_v60  ;;  %v6335_v0 = vadd.f32 %v2333_v13, %v7574_v33  ;;  %v2332_v29 = vmax.f32 %v2316_v61, 0.0  ;;  %v7587_v47 = vld [vmem:[#allocation11_spill] sm:$0xff] }
 0x706   :  { %v6339_v36 = vadd.f32 %v2337_v48, %v7575_v34  ;;  %v6343_v6 = vadd.f32 %v2330_v46, %v7576_v51  ;;  %v6347_v23 = vadd.f32 %v2334_v38, %v7577_v44  ;;  %v2336_v22 = vmax.f32 %v2320_v3, 0.0  ;;  %v7584_v46 = vld [vmem:[#allocation13_spill] sm:$0xff] }
 0x707   :  { %v7490_v19 = vmax.f32 %v6327_v26, 0.0  ;;  %v7489_v55 = vmax.f32 %v6331_v14, 0.0  ;;  %v7488_v53 = vmax.f32 %v6335_v0, 0.0  ;;  %v6354_v50 = vadd.f32 %v2332_v29, %v7578_v56  ;;  %v7590_v29 = vld [vmem:[#allocation10_spill] sm:$0xff]  ;;  %v7593_v56 = vld [vmem:[#allocation12_spill] sm:$0xff] }
 0x708   :  { %v7487_v20 = vmax.f32 %v6339_v36, 0.0  ;;  %v7486_v28 = vmax.f32 %v6343_v6, 0.0  ;;  %v7485_v31 = vmax.f32 %v6347_v23, 0.0  ;;  %v7579_v8 = vmax.f32 %v6015_v54, 0.0 }
 0x709   :  { %v5081_v21 = vpack.c.bf16 %v7489_v55, %v7490_v19  ;;  %v7484_v35 = vmax.f32 %v6354_v50, 0.0  ;;  %v2323_v62 = vadd.f32 %v2313_v63, %v2303_v30  ;;  %v2327_v2 = vadd.f32 %v2313_v63, %v2307_v57 }
 0x70a   :  { %v6361_v25 = vadd.f32 %v2336_v22, %v7579_v8  ;;  %v5089_v37 = vpack.c.bf16 %v7487_v20, %v7488_v53  ;;  %v5083_v54 = vpack.c.bf16 %v7485_v31, %v7486_v28  ;;  %v2325_v5 = vadd.f32 %v2313_v63, %v2305_v18 }
 0x70b   :  { %5082 = vmatprep.subr.bf16.mxu0 %v5081_v21  ;;  %v2339_v52 = vmax.f32 %v2323_v62, 0.0  ;;  %v2343_v12 = vmax.f32 %v2327_v2, 0.0  ;;  %v7580_v15 = vmax.f32 %v6033_v7, 0.0  ;;  %v2322_v57 = vadd.f32 %v2313_v63, %v2302_v16 }
 0x70c   :  { %v7483_v43 = vmax.f32 %v6361_v25, 0.0  ;;  %5090 = vmatprep.subr.bf16.mxu1 %v5089_v37  ;;  %5084 = vmatpush1.bf16.msra.mxu0 %v5083_v54  ;;  %v2341_v4 = vmax.f32 %v2325_v5, 0.0  ;;  %v2326_v58 = vadd.f32 %v2313_v63, %v2306_v40  ;;  %v2324_v9 = vadd.f32 %v2313_v63, %v2304_v41  ;;  %v2381_v5 = vld [vmem:[#allocation3 + $0xa0] sm:$0xff] }
 0x70d   :  { %v6379_v30 = vadd.f32 %v2345_v10, %v7580_v15  ;;  %v7581_v18 = vmax.f32 %v6041_v42, 0.0  ;;  %v7582_v61 = vmax.f32 %v6045_v45, 0.0  ;;  %v2338_v10 = vmax.f32 %v2322_v57, 0.0  ;;  %v2384_v15 = vld [vmem:[#allocation3 + $0xb8] sm:$0xff] }
 0x70e   :  { %v5091_v24 = vpack.c.bf16 %v7483_v43, %v7484_v35  ;;  %v7583_v11 = vmax.f32 %v6050_v27, 0.0  ;;  %v2342_v13 = vmax.f32 %v2326_v58, 0.0  ;;  %v2328_v48 = vadd.f32 %v2313_v63, %v2308_v32 }
 0x70f   :  { %v6387_v1 = vadd.f32 %v2339_v52, %v7581_v18  ;;  %v6391_v7 = vadd.f32 %v2343_v12, %v7582_v61  ;;  %v7482_v16 = vmax.f32 %v6379_v30, 0.0  ;;  %v2340_v40 = vmax.f32 %v2324_v9, 0.0  ;;  %v2382_v52 = vld [vmem:[#allocation3 + $0xa8] sm:$0xff]  ;;  %v2383_v12 = vld [vmem:[#allocation3 + $0xb0] sm:$0xff] }
 0x710   :  { %5092 = vmatpush1.bf16.msra.mxu1 %v5091_v24  ;;  %v6396_v17 = vadd.f32 %v2341_v4, %v7583_v11  ;;  %v7585_v38 = vmax.f32 %v7584_v46, 0.0  ;;  %v7588_v60 = vmax.f32 %v7587_v47, 0.0  ;;  %v2344_v27 = vmax.f32 %v2328_v48, 0.0 }
 0x711   :  { %v7481_v41 = vmax.f32 %v6387_v1, 0.0  ;;  %v7480_v42 = vmax.f32 %v6391_v7, 0.0  ;;  %v7591_v34 = vmax.f32 %v7590_v29, 0.0  ;;  %v7594_v8 = vmax.f32 %v7593_v56, 0.0 }
 0x712   :  { %v6402_v45 = vadd.f32 %v2338_v10, %v7585_v38  ;;  %v7479_v3 = vmax.f32 %v6396_v17, 0.0  ;;  %v6407_v33 = vadd.f32 %v2342_v13, %v7588_v60 }
 0x713   :  { %v6411_v51 = vadd.f32 %v2340_v40, %v7591_v34  ;;  %v5085_v63 = vpack.c.bf16 %v7480_v42, %v7481_v41  ;;  %v6425_v21 = vadd.f32 %v2344_v27, %v7594_v8 }
 0x714   :  { %7586 = vst [vmem:[#allocation13_spill] sm:$0xff] %v6402_v45  ;;  %7589 = vst [vmem:[#allocation11_spill] sm:$0xff] %v6407_v33  ;;  %v7478_v32 = vmax.f32 %v6402_v45, 0.0  ;;  %v5093_v44 = vpack.c.bf16 %v7482_v16, %v7479_v3  ;;  %v7477_v22 = vmax.f32 %v6407_v33, 0.0 }
 0x715   :  { %7592 = vst [vmem:[#allocation10_spill] sm:$0xff] %v6411_v51  ;;  %7595 = vst [vmem:[#allocation12_spill] sm:$0xff] %v6425_v21  ;;  %v7476_v62 = vmax.f32 %v6411_v51, 0.0  ;;  %5086 = vmatprep.subr.bf16.mxu0 %v5085_v63  ;;  %v7475_v37 = vmax.f32 %v6425_v21, 0.0 }
 0x716   :  { %5094 = vmatprep.subr.bf16.mxu1 %v5093_v44  ;;  %v5087_v2 = vpack.c.bf16 %v7477_v22, %v7478_v32 }
 0x717   :  { %v5095_v54 = vpack.c.bf16 %v7475_v37, %v7476_v62 }
 0x718   :  { %5088 = vmatpush1.bf16.msra.mxu0 %v5087_v2 }
 0x719   :  { %5096 = vmatpush1.bf16.msra.mxu1 %v5095_v54 }
 0x71b   :  { %4940 = vmatmul.mubr.msk.f32.vlgmr.msra.gmra.mrb[56].mxu0 %vm493_vm2, %v2381_v5 }
 0x71c   :  { %2467 = vmatprep.mubr.f32.mxu0 %v7547_v39  ;;  %4944 = vmatmul.mubr.msk.f32.vlgmr.msra.gmra.mrb[56].mxu1 %vm493_vm2, %v2381_v5 }
 0x71d   :  { %2556 = vmatprep.mubr.f32.mxu1 %v7547_v39 }
 0x71f   :  { %4941 = vmatmul.mubr.msk.f32.gmra.mrb[58].mxu0 %vm493_vm2, %v2382_v52 }
 0x720   :  { %2473 = vmatprep.mubr.f32.mxu0 %v7547_v39  ;;  %4945 = vmatmul.mubr.msk.f32.gmra.mrb[58].mxu1 %vm493_vm2, %v2382_v52 }
 0x721   :  { %2562 = vmatprep.mubr.f32.mxu1 %v7547_v39 }
 0x723   :  { %4942 = vmatmul.mubr.msk.f32.gmra.mrb[60].mxu0 %vm493_vm2, %v2383_v12 }
 0x724   :  { %2479 = vmatprep.mubr.f32.mxu0 %v7547_v39  ;;  %4946 = vmatmul.mubr.msk.f32.gmra.mrb[60].mxu1 %vm493_vm2, %v2383_v12 }
 0x725   :  { %2568 = vmatprep.mubr.f32.mxu1 %v7547_v39 }
 0x727   :  { %4943 = vmatmul.mubr.msk.f32.gmra.mrb[62].mxu0 %vm493_vm2, %v2384_v15 }
 0x728   :  { %2820 = vmatprep.mubr.f32.mxu0 %v7547_v39  ;;  %4947 = vmatmul.mubr.msk.f32.gmra.mrb[62].mxu1 %vm493_vm2, %v2384_v15 }
 0x729   :  { %2909 = vmatprep.mubr.f32.mxu1 %v7547_v39 }
 0x7ee   :  { %v6453_v57 = vpop.f32.mrb[56].mxu0 }
 0x7ef   :  { %v6455_v24 = vpop.f32.mrb[57].mxu0  ;;  %v6457_v4 = vpop.f32.mrb[56].mxu1  ;;  %v2611_v18 = vmul.f32 %v6453_v57, %v6453_v57 }
 0x7f0   :  { %v6459_v58 = vpop.f32.mrb[57].mxu1  ;;  %v2613_v13 = vmul.f32 %v6457_v4, %v6457_v4  ;;  %v2612_v48 = vmul.f32 %v6455_v24, %v6455_v24 }
 0x7f1   :  { %v2614_v44 = vmul.f32 %v6459_v58, %v6459_v58 }
 0x7f2   :  { %v6461_v9 = vpop.f32.mrb[58].mxu0 }
 0x7f3   :  { %v2575_v61 = vadd.f32 %v6461_v9, %v6453_v57  ;;  %v2615_v10 = vmul.f32 %v6461_v9, %v6461_v9  ;;  %v6469_v11 = vpop.f32.mrb[59].mxu0  ;;  %v6479_v38 = vpop.f32.mrb[58].mxu1 }
 0x7f4   :  { %v2584_v40 = vadd.f32 %v6469_v11, %v6455_v24  ;;  %v2616_v46 = vmul.f32 %v6469_v11, %v6469_v11  ;;  %v2593_v60 = vadd.f32 %v6479_v38, %v6457_v4  ;;  %v2617_v27 = vmul.f32 %v6479_v38, %v6479_v38  ;;  %v6485_v29 = vpop.f32.mrb[59].mxu1 }
 0x7f5   :  { %v2627_v47 = vadd.f32 %v2615_v10, %v2611_v18  ;;  %v2602_v56 = vadd.f32 %v6485_v29, %v6459_v58  ;;  %v2618_v8 = vmul.f32 %v6485_v29, %v6485_v29 }
 0x7f6   :  { %v2636_v34 = vadd.f32 %v2616_v46, %v2612_v48  ;;  %v6487_v63 = vpop.f32.mrb[60].mxu0  ;;  %v2645_v52 = vadd.f32 %v2617_v27, %v2613_v13 }
 0x7f7   :  { %v2576_v2 = vadd.f32 %v2575_v61, %v6487_v63  ;;  %v2619_v54 = vmul.f32 %v6487_v63, %v6487_v63  ;;  %v6498_v5 = vpop.f32.mrb[61].mxu0  ;;  %v2654_v18 = vadd.f32 %v2618_v8, %v2614_v44  ;;  %v6503_v10 = vpop.f32.mrb[60].mxu1 }
 0x7f8   :  { %v2585_v12 = vadd.f32 %v2584_v40, %v6498_v5  ;;  %v2620_v15 = vmul.f32 %v6498_v5, %v6498_v5  ;;  %v2594_v46 = vadd.f32 %v2593_v60, %v6503_v10  ;;  %v2621_v61 = vmul.f32 %v6503_v10, %v6503_v10  ;;  %v6508_v37 = vpop.f32.mrb[61].mxu1 }
 0x7f9   :  { %v2628_v48 = vadd.f32 %v2627_v47, %v2619_v54  ;;  %v2603_v13 = vadd.f32 %v2602_v56, %v6508_v37  ;;  %v2622_v40 = vmul.f32 %v6508_v37, %v6508_v37 }
 0x7fa   :  { %v2637_v62 = vadd.f32 %v2636_v34, %v2620_v15  ;;  %v6510_v22 = vpop.f32.mrb[62].mxu0  ;;  %v2646_v60 = vadd.f32 %v2645_v52, %v2621_v61 }
 0x7fb   :  { %v2577_v27 = vadd.f32 %v2576_v2, %v6510_v22  ;;  %v2623_v47 = vmul.f32 %v6510_v22, %v6510_v22  ;;  %v6518_v44 = vpop.f32.mrb[63].mxu0  ;;  %v2655_v54 = vadd.f32 %v2654_v18, %v2622_v40  ;;  %v6523_v15 = vpop.f32.mrb[62].mxu1 }
 0x7fc   :  { %v2586_v8 = vadd.f32 %v2585_v12, %v6518_v44  ;;  %v2624_v34 = vmul.f32 %v6518_v44, %v6518_v44  ;;  %v2595_v3 = vadd.f32 %v2594_v46, %v6523_v15  ;;  %v2625_v2 = vmul.f32 %v6523_v15, %v6523_v15  ;;  %v6528_v42 = vpop.f32.mrb[63].mxu1 }
 0x7fd   :  { %v2578_v56 = vrot.slane %v2577_v27, 4  ;;  %v2629_v32 = vadd.f32 %v2628_v48, %v2623_v47  ;;  %v2604_v52 = vadd.f32 %v2603_v13, %v6528_v42  ;;  %v2626_v12 = vmul.f32 %v6528_v42, %v6528_v42 }
 0x7fe   :  { %v2587_v41 = vrot.slane %v2586_v8, 4  ;;  %v2638_v16 = vadd.f32 %v2637_v62, %v2624_v34  ;;  %v2596_v40 = vrot.slane %v2595_v3, 4  ;;  %v2647_v43 = vadd.f32 %v2646_v60, %v2625_v2 }
 0x7ff   :  { %v2579_v61 = vadd.f32 %v2578_v56, %v2577_v27  ;;  %v2630_v18 = vrot.slane %v2629_v32, 4  ;;  %v2605_v47 = vrot.slane %v2604_v52, 4  ;;  %v2656_v46 = vadd.f32 %v2655_v54, %v2626_v12 }
 0x800   :  { %v2588_v35 = vadd.f32 %v2587_v41, %v2586_v8  ;;  %v2639_v48 = vrot.slane %v2638_v16, 4  ;;  %v2597_v20 = vadd.f32 %v2596_v40, %v2595_v3  ;;  %v2648_v53 = vrot.slane %v2647_v43, 4 }
 0x801   :  { %v2580_v31 = vrot.slane %v2579_v61, 2  ;;  %v2631_v28 = vadd.f32 %v2630_v18, %v2629_v32  ;;  %v2606_v62 = vadd.f32 %v2605_v47, %v2604_v52  ;;  %v2657_v34 = vrot.slane %v2656_v46, 4 }
 0x802   :  { %v2589_v55 = vrot.slane %v2588_v35, 2  ;;  %v2640_v19 = vadd.f32 %v2639_v48, %v2638_v16  ;;  %v2598_v51 = vrot.slane %v2597_v20, 2  ;;  %v2649_v33 = vadd.f32 %v2648_v53, %v2647_v43 }
 0x803   :  { %v2581_v13 = vadd.f32 %v2580_v31, %v2579_v61  ;;  %v2632_v21 = vrot.slane %v2631_v28, 2  ;;  %v2607_v45 = vrot.slane %v2606_v62, 2  ;;  %v2658_v60 = vadd.f32 %v2657_v34, %v2656_v46 }
 0x804   :  { %v2590_v27 = vadd.f32 %v2589_v55, %v2588_v35  ;;  %v2641_v56 = vrot.slane %v2640_v19, 2  ;;  %v2599_v2 = vadd.f32 %v2598_v51, %v2597_v20  ;;  %v2650_v54 = vrot.slane %v2649_v33, 2 }
 0x805   :  { %v2582_v41 = vrot.slane %v2581_v13, 1  ;;  %v2633_v8 = vadd.f32 %v2632_v21, %v2631_v28  ;;  %v2608_v3 = vadd.f32 %v2607_v45, %v2606_v62  ;;  %v2659_v18 = vrot.slane %v2658_v60, 2 }
 0x806   :  { %v2591_v12 = vrot.slane %v2590_v27, 1  ;;  %v2642_v32 = vadd.f32 %v2641_v56, %v2640_v19  ;;  %v2600_v52 = vrot.slane %v2599_v2, 1  ;;  %v2651_v48 = vadd.f32 %v2650_v54, %v2649_v33 }
 0x807   :  { %v2583_v40 = vadd.f32 %v2582_v41, %v2581_v13  ;;  %v2634_v16 = vrot.slane %v2633_v8, 1  ;;  %v2609_v47 = vrot.slane %v2608_v3, 1  ;;  %v2660_v53 = vadd.f32 %v2659_v18, %v2658_v60  ;;  %v4939_v60 = vld [vmem:[%s7427_s3 + $0xc] sm:$0x3] }
 0x808   :  { %v2592_v31 = vadd.f32 %v2591_v12, %v2590_v27  ;;  %v2643_v61 = vrot.slane %v2642_v32, 1  ;;  %v2652_v35 = vrot.slane %v2651_v48, 1  ;;  %v2601_v34 = vadd.f32 %v2600_v52, %v2599_v2 }
 0x809   :  { %v2635_v55 = vadd.f32 %v2634_v16, %v2633_v8  ;;  %v2661_v28 = vrot.slane %v2660_v53, 1  ;;  %v2610_v19 = vadd.f32 %v2609_v47, %v2608_v3 }
 0x80a   :  { %v2644_v43 = vadd.f32 %v2643_v61, %v2642_v32  ;;  %v2663_v46 = vadd.f32 %v2592_v31, %v2583_v40  ;;  %v2653_v51 = vadd.f32 %v2652_v35, %v2651_v48 }
 0x80b   :  { %v2662_v62 = vadd.f32 %v2661_v28, %v2660_v53 }
 0x80c   :  { %v2667_v20 = vadd.f32 %v2644_v43, %v2635_v55  ;;  %v2664_v21 = vadd.f32 %v2663_v46, %v2601_v34 }
 0x80e   :  { %v2668_v45 = vadd.f32 %v2667_v20, %v2653_v51  ;;  %v2665_v13 = vadd.f32 %v2664_v21, %v2610_v19 }
 0x810   :  { %v2666_v56 = vmul.f32 0.0078125, %v2665_v13  ;;  %v2669_v41 = vadd.f32 %v2668_v45, %v2662_v62 }
 0x812   :  { %v2670_v33 = vmul.f32 0.0078125, %v2669_v41  ;;  %v2671_v27 = vmul.f32 %v2666_v56, %v2666_v56 }
 0x814   :  { %v2672_v54 = vsub.f32 %v2670_v33, %v2671_v27 }
 0x816   :  { %v2673_v12 = vadd.f32 1e-05, %v2672_v54 }
 0x818   :  { %5215 = vrsqrt.f32 %v2673_v12 }
 0x822   :  { %v5216_v8 = vpop.eup %5215 }
 0x823   :  { %v2675_v2 = vmul.f32 %v5216_v8, %v4939_v60 }
 0x825   :  { %v2676_v32 = vmul.f32 %v2675_v2, %v2666_v56  ;;  %v2684_v18 = vrot.slane %v2675_v2, %v5509_v49 }
 0x827   :  { %v2678_v3 = vrot.slane %v2676_v32, 7  ;;  %v2700_v40 = vmul.f32 %v2684_v18, %v6528_v42  ;;  %v2686_v16 = vmul.f32 %v2684_v18, %v6455_v24  ;;  %v2690_v52 = vmul.f32 %v2684_v18, %v6469_v11 }
 0x828   :  { %v2688_v48 = vmul.f32 %v2684_v18, %v6459_v58  ;;  %v2692_v31 = vmul.f32 %v2684_v18, %v6485_v29  ;;  %v2685_v61 = vmul.f32 %v2684_v18, %v6453_v57  ;;  %v2689_v47 = vmul.f32 %v2684_v18, %v6461_v9 }
 0x829   :  { %v2680_v53 = vsub.f32 %v4939_v60, %v2678_v3  ;;  %v2687_v55 = vmul.f32 %v2684_v18, %v6457_v4  ;;  %v2691_v35 = vmul.f32 %v2684_v18, %v6479_v38  ;;  %v2694_v43 = vmul.f32 %v2684_v18, %v6498_v5 }
 0x82a   :  { %v2698_v42 = vmul.f32 %v2684_v18, %v6518_v44  ;;  %v2696_v24 = vmul.f32 %v2684_v18, %v6508_v37  ;;  %v2693_v11 = vmul.f32 %v2684_v18, %v6487_v63  ;;  %v2697_v58 = vmul.f32 %v2684_v18, %v6510_v22 }
 0x82b   :  { %v2704_v29 = vrot.slane %v2680_v53, %v5513_v59  ;;  %v2695_v57 = vmul.f32 %v2684_v18, %v6503_v10  ;;  %v2699_v9 = vmul.f32 %v2684_v18, %v6523_v15 }
 0x82d   :  { %v2720_v46 = vadd.f32 %v2704_v29, %v2700_v40  ;;  %v2706_v4 = vadd.f32 %v2704_v29, %v2686_v16  ;;  %v2710_v34 = vadd.f32 %v2704_v29, %v2690_v52  ;;  %v2708_v38 = vadd.f32 %v2704_v29, %v2688_v48 }
 0x82e   :  { %v2712_v28 = vadd.f32 %v2704_v29, %v2692_v31  ;;  %v2705_v5 = vadd.f32 %v2704_v29, %v2685_v61  ;;  %v2709_v20 = vadd.f32 %v2704_v29, %v2689_v47  ;;  %v2707_v44 = vadd.f32 %v2704_v29, %v2687_v55 }
 0x82f   :  { %v2722_v51 = vmax.f32 %v2706_v4, 0.0  ;;  %v2726_v37 = vmax.f32 %v2710_v34, 0.0  ;;  %v2724_v21 = vmax.f32 %v2708_v38, 0.0  ;;  %v2711_v63 = vadd.f32 %v2704_v29, %v2691_v35  ;;  %v2740_v35 = vld [vmem:[#allocation3 + $0xc0] sm:$0xff] }
 0x830   :  { %v2728_v19 = vmax.f32 %v2712_v28, 0.0  ;;  %v2721_v22 = vmax.f32 %v2705_v5, 0.0  ;;  %v2725_v45 = vmax.f32 %v2709_v20, 0.0  ;;  %v2723_v62 = vmax.f32 %v2707_v44, 0.0 }
 0x831   :  { %v5097_v13 = vpack.c.bf16 %v2726_v37, %v2722_v51  ;;  %v2727_v10 = vmax.f32 %v2711_v63, 0.0  ;;  %v2714_v56 = vadd.f32 %v2704_v29, %v2694_v43  ;;  %v2718_v15 = vadd.f32 %v2704_v29, %v2698_v42  ;;  %v2741_v43 = vld [vmem:[#allocation3 + $0xc8] sm:$0xff]  ;;  %v2742_v42 = vld [vmem:[#allocation3 + $0xd0] sm:$0xff] }
 0x832   :  { %v5105_v41 = vpack.c.bf16 %v2728_v19, %v2724_v21  ;;  %v5099_v33 = vpack.c.bf16 %v2725_v45, %v2721_v22  ;;  %v2716_v27 = vadd.f32 %v2704_v29, %v2696_v24  ;;  %v2736_v54 = vmax.f32 %v2720_v46, 0.0  ;;  %v2743_v24 = vld [vmem:[#allocation3 + $0xd8] sm:$0xff] }
 0x833   :  { %5098 = vmatprep.subr.bf16.mxu0 %v5097_v13  ;;  %v5107_v12 = vpack.c.bf16 %v2727_v10, %v2723_v62  ;;  %v2730_v60 = vmax.f32 %v2714_v56, 0.0  ;;  %v2734_v8 = vmax.f32 %v2718_v15, 0.0  ;;  %v2713_v2 = vadd.f32 %v2704_v29, %v2693_v11 }
 0x834   :  { %5106 = vmatprep.subr.bf16.mxu1 %v5105_v41  ;;  %5100 = vmatpush1.bf16.msra.mxu0 %v5099_v33  ;;  %v2732_v32 = vmax.f32 %v2716_v27, 0.0  ;;  %v2717_v18 = vadd.f32 %v2704_v29, %v2697_v58  ;;  %v2715_v3 = vadd.f32 %v2704_v29, %v2695_v57  ;;  %v2719_v40 = vadd.f32 %v2704_v29, %v2699_v9 }
 0x835   :  { %5108 = vmatpush1.bf16.msra.mxu1 %v5107_v12  ;;  %v5101_v16 = vpack.c.bf16 %v2734_v8, %v2730_v60  ;;  %v2729_v52 = vmax.f32 %v2713_v2, 0.0 }
 0x836   :  { %v5109_v48 = vpack.c.bf16 %v2736_v54, %v2732_v32  ;;  %v2733_v31 = vmax.f32 %v2717_v18, 0.0  ;;  %v2731_v61 = vmax.f32 %v2715_v3, 0.0  ;;  %v2735_v47 = vmax.f32 %v2719_v40, 0.0 }
 0x837   :  { %5102 = vmatprep.subr.bf16.mxu0 %v5101_v16 }
 0x838   :  { %5110 = vmatprep.subr.bf16.mxu1 %v5109_v48  ;;  %v5103_v53 = vpack.c.bf16 %v2733_v31, %v2729_v52  ;;  %v5111_v55 = vpack.c.bf16 %v2735_v47, %v2731_v61 }
 0x83a   :  { %5104 = vmatpush1.bf16.msra.mxu0 %v5103_v53  ;;  %5112 = vmatpush1.bf16.msra.mxu1 %v5111_v55 }
 0x83d   :  { %4949 = vmatmul.mubr.msk.f32.vlgmr.msra.gmra.mrb[64].mxu0 %vm493_vm2, %v2740_v35  ;;  %4953 = vmatmul.mubr.msk.f32.vlgmr.msra.gmra.mrb[64].mxu1 %vm493_vm2, %v2740_v35 }
 0x83e   :  { %2826 = vmatprep.mubr.f32.mxu0 %v7547_v39  ;;  %2915 = vmatprep.mubr.f32.mxu1 %v7547_v39 }
 0x841   :  { %4950 = vmatmul.mubr.msk.f32.gmra.mrb[66].mxu0 %vm493_vm2, %v2741_v43  ;;  %4954 = vmatmul.mubr.msk.f32.gmra.mrb[66].mxu1 %vm493_vm2, %v2741_v43 }
 0x842   :  { %2832 = vmatprep.mubr.f32.mxu0 %v7547_v39  ;;  %2921 = vmatprep.mubr.f32.mxu1 %v7547_v39 }
 0x845   :  { %4951 = vmatmul.mubr.msk.f32.gmra.mrb[68].mxu0 %vm493_vm2, %v2742_v42  ;;  %4955 = vmatmul.mubr.msk.f32.gmra.mrb[68].mxu1 %vm493_vm2, %v2742_v42 }
 0x846   :  { %2838 = vmatprep.mubr.f32.mxu0 %v7547_v39  ;;  %2927 = vmatprep.mubr.f32.mxu1 %v7547_v39 }
 0x849   :  { %4952 = vmatmul.mubr.msk.f32.gmra.mrb[70].mxu0 %vm493_vm2, %v2743_v24  ;;  %4956 = vmatmul.mubr.msk.f32.gmra.mrb[70].mxu1 %vm493_vm2, %v2743_v24 }
 0x84a   :  { %3211 = vmatprep.mubr.f32.mxu0 %v7547_v39  ;;  %3300 = vmatprep.mubr.f32.mxu1 %v7547_v39 }
 0x910   :  { %v6570_v11 = vpop.f32.mrb[64].mxu0  ;;  %v6572_v58 = vpop.f32.mrb[64].mxu1 }
 0x911   :  { %v6574_v29 = vpop.f32.mrb[65].mxu0  ;;  %v6576_v57 = vpop.f32.mrb[65].mxu1  ;;  %v2972_v9 = vmul.f32 %v6572_v58, %v6572_v58  ;;  %v2970_v46 = vmul.f32 %v6570_v11, %v6570_v11 }
 0x912   :  { %v2971_v4 = vmul.f32 %v6574_v29, %v6574_v29  ;;  %v2973_v38 = vmul.f32 %v6576_v57, %v6576_v57 }
 0x914   :  { %v6584_v34 = vpop.f32.mrb[66].mxu0  ;;  %v6588_v28 = vpop.f32.mrb[66].mxu1 }
 0x915   :  { %v2934_v5 = vadd.f32 %v6584_v34, %v6570_v11  ;;  %v2974_v20 = vmul.f32 %v6584_v34, %v6584_v34  ;;  %v6594_v44 = vpop.f32.mrb[67].mxu0  ;;  %v2952_v51 = vadd.f32 %v6588_v28, %v6572_v58  ;;  %v2976_v37 = vmul.f32 %v6588_v28, %v6588_v28  ;;  %v6600_v21 = vpop.f32.mrb[67].mxu1 }
 0x916   :  { %v2943_v63 = vadd.f32 %v6594_v44, %v6574_v29  ;;  %v2975_v19 = vmul.f32 %v6594_v44, %v6594_v44  ;;  %v2961_v22 = vadd.f32 %v6600_v21, %v6576_v57  ;;  %v2977_v45 = vmul.f32 %v6600_v21, %v6600_v21 }
 0x917   :  { %v2986_v62 = vadd.f32 %v2974_v20, %v2970_v46  ;;  %v3004_v13 = vadd.f32 %v2976_v37, %v2972_v9 }
 0x918   :  { %v2995_v10 = vadd.f32 %v2975_v19, %v2971_v4  ;;  %v6610_v56 = vpop.f32.mrb[68].mxu0  ;;  %v3013_v15 = vadd.f32 %v2977_v45, %v2973_v38  ;;  %v6612_v41 = vpop.f32.mrb[68].mxu1 }
 0x919   :  { %v2935_v33 = vadd.f32 %v2934_v5, %v6610_v56  ;;  %v2978_v27 = vmul.f32 %v6610_v56, %v6610_v56  ;;  %v6617_v54 = vpop.f32.mrb[69].mxu0  ;;  %v2953_v12 = vadd.f32 %v2952_v51, %v6612_v41  ;;  %v2980_v60 = vmul.f32 %v6612_v41, %v6612_v41  ;;  %v6622_v8 = vpop.f32.mrb[69].mxu1 }
 0x91a   :  { %v2944_v2 = vadd.f32 %v2943_v63, %v6617_v54  ;;  %v2979_v32 = vmul.f32 %v6617_v54, %v6617_v54  ;;  %v2962_v18 = vadd.f32 %v2961_v22, %v6622_v8  ;;  %v2981_v3 = vmul.f32 %v6622_v8, %v6622_v8 }
 0x91b   :  { %v2987_v40 = vadd.f32 %v2986_v62, %v2978_v27  ;;  %v3005_v16 = vadd.f32 %v3004_v13, %v2980_v60 }
 0x91c   :  { %v2996_v52 = vadd.f32 %v2995_v10, %v2979_v32  ;;  %v6630_v48 = vpop.f32.mrb[70].mxu0  ;;  %v3014_v31 = vadd.f32 %v3013_v15, %v2981_v3  ;;  %v6632_v61 = vpop.f32.mrb[70].mxu1 }
 0x91d   :  { %v2936_v47 = vadd.f32 %v2935_v33, %v6630_v48  ;;  %v2982_v53 = vmul.f32 %v6630_v48, %v6630_v48  ;;  %v6637_v55 = vpop.f32.mrb[71].mxu0  ;;  %v2954_v35 = vadd.f32 %v2953_v12, %v6632_v61  ;;  %v2984_v43 = vmul.f32 %v6632_v61, %v6632_v61  ;;  %v6642_v42 = vpop.f32.mrb[71].mxu1 }
 0x91e   :  { %v2945_v24 = vadd.f32 %v2944_v2, %v6637_v55  ;;  %v2983_v9 = vmul.f32 %v6637_v55, %v6637_v55  ;;  %v2963_v46 = vadd.f32 %v2962_v18, %v6642_v42  ;;  %v2985_v4 = vmul.f32 %v6642_v42, %v6642_v42 }
 0x91f   :  { %v2937_v38 = vrot.slane %v2936_v47, 4  ;;  %v2988_v5 = vadd.f32 %v2987_v40, %v2982_v53  ;;  %v2955_v20 = vrot.slane %v2954_v35, 4  ;;  %v3006_v51 = vadd.f32 %v3005_v16, %v2984_v43 }
 0x920   :  { %v2946_v37 = vrot.slane %v2945_v24, 4  ;;  %v2997_v63 = vadd.f32 %v2996_v52, %v2983_v9  ;;  %v2964_v19 = vrot.slane %v2963_v46, 4  ;;  %v3015_v22 = vadd.f32 %v3014_v31, %v2985_v4 }
 0x921   :  { %v2938_v45 = vadd.f32 %v2937_v38, %v2936_v47  ;;  %v2989_v62 = vrot.slane %v2988_v5, 4  ;;  %v2956_v13 = vadd.f32 %v2955_v20, %v2954_v35  ;;  %v3007_v10 = vrot.slane %v3006_v51, 4 }
 0x922   :  { %v2947_v15 = vadd.f32 %v2946_v37, %v2945_v24  ;;  %v2998_v33 = vrot.slane %v2997_v63, 4  ;;  %v2965_v27 = vadd.f32 %v2964_v19, %v2963_v46  ;;  %v3016_v12 = vrot.slane %v3015_v22, 4 }
 0x923   :  { %v2939_v60 = vrot.slane %v2938_v45, 2  ;;  %v2990_v2 = vadd.f32 %v2989_v62, %v2988_v5  ;;  %v2957_v32 = vrot.slane %v2956_v13, 2  ;;  %v3008_v18 = vadd.f32 %v3007_v10, %v3006_v51 }
 0x924   :  { %v2948_v3 = vrot.slane %v2947_v15, 2  ;;  %v2999_v40 = vadd.f32 %v2998_v33, %v2997_v63  ;;  %v2966_v53 = vrot.slane %v2965_v27, 2  ;;  %v3017_v16 = vadd.f32 %v3016_v12, %v3015_v22 }
 0x925   :  { %v2940_v43 = vadd.f32 %v2939_v60, %v2938_v45  ;;  %v2991_v52 = vrot.slane %v2990_v2, 2  ;;  %v2958_v9 = vadd.f32 %v2957_v32, %v2956_v13  ;;  %v3009_v31 = vrot.slane %v3008_v18, 2 }
 0x926   :  { %v2949_v47 = vadd.f32 %v2948_v3, %v2947_v15  ;;  %v3000_v4 = vrot.slane %v2999_v40, 2  ;;  %v2967_v35 = vadd.f32 %v2966_v53, %v2965_v27  ;;  %v3018_v38 = vrot.slane %v3017_v16, 2 }
 0x927   :  { %v2941_v24 = vrot.slane %v2940_v43, 1  ;;  %v2992_v20 = vadd.f32 %v2991_v52, %v2990_v2  ;;  %v3010_v46 = vadd.f32 %v3009_v31, %v3008_v18  ;;  %v2959_v5 = vrot.slane %v2958_v9, 1 }
 0x928   :  { %v2950_v37 = vrot.slane %v2949_v47, 1  ;;  %v3001_v19 = vadd.f32 %v3000_v4, %v2999_v40  ;;  %v3019_v62 = vadd.f32 %v3018_v38, %v3017_v16  ;;  %v2968_v45 = vrot.slane %v2967_v35, 1 }
 0x929   :  { %v2942_v51 = vadd.f32 %v2941_v24, %v2940_v43  ;;  %v2993_v10 = vrot.slane %v2992_v20, 1  ;;  %v3011_v22 = vrot.slane %v3010_v46, 1  ;;  %v2960_v15 = vadd.f32 %v2959_v5, %v2958_v9  ;;  %v4948_v24 = vld [vmem:[%s7427_s3 + $0xe] sm:$0x3] }
 0x92a   :  { %v2951_v63 = vadd.f32 %v2950_v37, %v2949_v47  ;;  %v3002_v33 = vrot.slane %v3001_v19, 1  ;;  %v3020_v32 = vrot.slane %v3019_v62, 1  ;;  %v2969_v2 = vadd.f32 %v2968_v45, %v2967_v35 }
 0x92b   :  { %v2994_v12 = vadd.f32 %v2993_v10, %v2992_v20  ;;  %v3012_v3 = vadd.f32 %v3011_v22, %v3010_v46 }
 0x92c   :  { %v3003_v13 = vadd.f32 %v3002_v33, %v3001_v19  ;;  %v3022_v60 = vadd.f32 %v2951_v63, %v2942_v51  ;;  %v3021_v52 = vadd.f32 %v3020_v32, %v3019_v62 }
 0x92e   :  { %v3026_v27 = vadd.f32 %v3003_v13, %v2994_v12  ;;  %v3023_v53 = vadd.f32 %v3022_v60, %v2960_v15 }
 0x930   :  { %v3027_v18 = vadd.f32 %v3026_v27, %v3012_v3  ;;  %v3024_v40 = vadd.f32 %v3023_v53, %v2969_v2 }
 0x932   :  { %v3025_v31 = vmul.f32 0.0078125, %v3024_v40  ;;  %v3028_v16 = vadd.f32 %v3027_v18, %v3021_v52 }
 0x934   :  { %v3029_v43 = vmul.f32 0.0078125, %v3028_v16  ;;  %v3030_v4 = vmul.f32 %v3025_v31, %v3025_v31  ;;  %v7598_v16 = vmax.f32 %v6335_v0, 0.0 }
 0x936   :  { %v3031_v47 = vsub.f32 %v3029_v43, %v3030_v4 }
 0x938   :  { %v3032_v38 = vadd.f32 1e-05, %v3031_v47  ;;  %v7599_v47 = vmax.f32 %v6339_v36, 0.0 }
 0x93a   :  { %5217 = vrsqrt.f32 %v3032_v38 }
 0x944   :  { %v5218_v9 = vpop.eup %5217 }
 0x945   :  { %v3034_v20 = vmul.f32 %v5218_v9, %v4948_v24 }
 0x947   :  { %v3035_v37 = vmul.f32 %v3034_v20, %v3025_v31  ;;  %v3043_v46 = vrot.slane %v3034_v20, %v5509_v49 }
 0x949   :  { %v3037_v35 = vrot.slane %v3035_v37, 7  ;;  %v3059_v19 = vmul.f32 %v3043_v46, %v6642_v42  ;;  %v3045_v5 = vmul.f32 %v3043_v46, %v6574_v29  ;;  %v3049_v62 = vmul.f32 %v3043_v46, %v6594_v44 }
 0x94a   :  { %v3047_v51 = vmul.f32 %v3043_v46, %v6576_v57  ;;  %v3051_v10 = vmul.f32 %v3043_v46, %v6600_v21  ;;  %v3044_v63 = vmul.f32 %v3043_v46, %v6570_v11  ;;  %v3048_v33 = vmul.f32 %v3043_v46, %v6584_v34 }
 0x94b   :  { %v3039_v22 = vsub.f32 %v4948_v24, %v3037_v35  ;;  %v3046_v45 = vmul.f32 %v3043_v46, %v6572_v58  ;;  %v3050_v12 = vmul.f32 %v3043_v46, %v6588_v28  ;;  %v3053_v13 = vmul.f32 %v3043_v46, %v6617_v54 }
 0x94c   :  { %v3057_v42 = vmul.f32 %v3043_v46, %v6637_v55  ;;  %v3055_v29 = vmul.f32 %v3043_v46, %v6622_v8  ;;  %v3052_v44 = vmul.f32 %v3043_v46, %v6610_v56  ;;  %v3056_v57 = vmul.f32 %v3043_v46, %v6630_v48 }
 0x94d   :  { %v3063_v21 = vrot.slane %v3039_v22, %v5513_v59  ;;  %v3054_v11 = vmul.f32 %v3043_v46, %v6612_v41  ;;  %v3058_v34 = vmul.f32 %v3043_v46, %v6632_v61  ;;  %v7596_v41 = vmax.f32 %v6327_v26, 0.0 }
 0x94e   :  { %v7597_v61 = vmax.f32 %v6331_v14, 0.0  ;;  %v7600_v24 = vmax.f32 %v6343_v6, 0.0  ;;  %v7601_v26 = vmax.f32 %v6347_v23, 0.0  ;;  %v7602_v35 = vmax.f32 %v6354_v50, 0.0 }
 0x94f   :  { %v3079_v60 = vadd.f32 %v3063_v21, %v3059_v19  ;;  %v3065_v58 = vadd.f32 %v3063_v21, %v3045_v5  ;;  %v3069_v15 = vadd.f32 %v3063_v21, %v3049_v62  ;;  %v3067_v28 = vadd.f32 %v3063_v21, %v3047_v51 }
 0x950   :  { %v3071_v32 = vadd.f32 %v3063_v21, %v3051_v10  ;;  %v3064_v54 = vadd.f32 %v3063_v21, %v3044_v63  ;;  %v3068_v27 = vadd.f32 %v3063_v21, %v3048_v33  ;;  %v3066_v55 = vadd.f32 %v3063_v21, %v3046_v45 }
 0x951   :  { %v3095_v3 = vmax.f32 %v3079_v60, 0.0  ;;  %v3081_v8 = vmax.f32 %v3065_v58, 0.0  ;;  %v3085_v53 = vmax.f32 %v3069_v15, 0.0  ;;  %v3083_v56 = vmax.f32 %v3067_v28, 0.0 }
 0x952   :  { %v3087_v2 = vmax.f32 %v3071_v32, 0.0  ;;  %v3080_v48 = vmax.f32 %v3064_v54, 0.0  ;;  %v3084_v18 = vmax.f32 %v3068_v27, 0.0  ;;  %v3070_v52 = vadd.f32 %v3063_v21, %v3050_v12 }
 0x953   :  { %v6673_v40 = vadd.f32 %v3081_v8, %v7596_v41  ;;  %v6677_v31 = vadd.f32 %v3085_v53, %v7597_v61  ;;  %v6681_v43 = vadd.f32 %v3083_v56, %v7598_v16  ;;  %v3082_v4 = vmax.f32 %v3066_v55, 0.0  ;;  %v7611_v41 = vld [vmem:[#allocation11_spill] sm:$0xff] }
 0x954   :  { %v6685_v38 = vadd.f32 %v3087_v2, %v7599_v47  ;;  %v6689_v9 = vadd.f32 %v3080_v48, %v7600_v24  ;;  %v6693_v20 = vadd.f32 %v3084_v18, %v7601_v26  ;;  %v3086_v14 = vmax.f32 %v3070_v52, 0.0  ;;  %v7608_v48 = vld [vmem:[#allocation13_spill] sm:$0xff] }
 0x955   :  { %v7510_v37 = vmax.f32 %v6673_v40, 0.0  ;;  %v7509_v0 = vmax.f32 %v6677_v31, 0.0  ;;  %v7508_v46 = vmax.f32 %v6681_v43, 0.0  ;;  %v6700_v36 = vadd.f32 %v3082_v4, %v7602_v35  ;;  %v7614_v4 = vld [vmem:[#allocation10_spill] sm:$0xff]  ;;  %v7617_v35 = vld [vmem:[#allocation12_spill] sm:$0xff] }
 0x956   :  { %v7507_v19 = vmax.f32 %v6685_v38, 0.0  ;;  %v7506_v6 = vmax.f32 %v6689_v9, 0.0  ;;  %v7505_v5 = vmax.f32 %v6693_v20, 0.0  ;;  %v7603_v23 = vmax.f32 %v6361_v25, 0.0 }
 0x957   :  { %v5113_v51 = vpack.c.bf16 %v7509_v0, %v7510_v37  ;;  %v7504_v10 = vmax.f32 %v6700_v36, 0.0  ;;  %v3073_v50 = vadd.f32 %v3063_v21, %v3053_v13  ;;  %v3077_v63 = vadd.f32 %v3063_v21, %v3057_v42 }
 0x958   :  { %v6707_v62 = vadd.f32 %v3086_v14, %v7603_v23  ;;  %v5121_v33 = vpack.c.bf16 %v7507_v19, %v7508_v46  ;;  %v5115_v25 = vpack.c.bf16 %v7505_v5, %v7506_v6  ;;  %v3075_v45 = vadd.f32 %v3063_v21, %v3055_v29 }
 0x959   :  { %5114 = vmatprep.subr.bf16.mxu0 %v5113_v51  ;;  %v3089_v12 = vmax.f32 %v3073_v50, 0.0  ;;  %v3093_v60 = vmax.f32 %v3077_v63, 0.0  ;;  %v7604_v58 = vmax.f32 %v6379_v30, 0.0  ;;  %v3072_v42 = vadd.f32 %v3063_v21, %v3052_v44 }
 0x95a   :  { %v7503_v22 = vmax.f32 %v6707_v62, 0.0  ;;  %5122 = vmatprep.subr.bf16.mxu1 %v5121_v33  ;;  %5116 = vmatpush1.bf16.msra.mxu0 %v5115_v25  ;;  %v3091_v28 = vmax.f32 %v3075_v45, 0.0  ;;  %v3076_v32 = vadd.f32 %v3063_v21, %v3056_v57  ;;  %v3074_v54 = vadd.f32 %v3063_v21, %v3054_v11  ;;  %v3131_v45 = vld [vmem:[#allocation3 + $0xe0] sm:$0xff] }
 0x95b   :  { %v6725_v13 = vadd.f32 %v3095_v3, %v7604_v58  ;;  %v7605_v29 = vmax.f32 %v6387_v1, 0.0  ;;  %v7606_v55 = vmax.f32 %v6391_v7, 0.0  ;;  %v3088_v3 = vmax.f32 %v3072_v42, 0.0  ;;  %v3134_v58 = vld [vmem:[#allocation3 + $0xf8] sm:$0xff] }
 0x95c   :  { %v5123_v15 = vpack.c.bf16 %v7503_v22, %v7504_v10  ;;  %v7607_v8 = vmax.f32 %v6396_v17, 0.0  ;;  %v3092_v56 = vmax.f32 %v3076_v32, 0.0  ;;  %v3078_v2 = vadd.f32 %v3063_v21, %v3058_v34 }
 0x95d   :  { %v6733_v27 = vadd.f32 %v3089_v12, %v7605_v29  ;;  %v6737_v30 = vadd.f32 %v3093_v60, %v7606_v55  ;;  %v7502_v44 = vmax.f32 %v6725_v13, 0.0  ;;  %v3090_v57 = vmax.f32 %v3074_v54, 0.0  ;;  %v3132_v12 = vld [vmem:[#allocation3 + $0xe8] sm:$0xff]  ;;  %v3133_v60 = vld [vmem:[#allocation3 + $0xf0] sm:$0xff] }
 0x95e   :  { %5124 = vmatpush1.bf16.msra.mxu1 %v5123_v15  ;;  %v6742_v53 = vadd.f32 %v3091_v28, %v7607_v8  ;;  %v7609_v18 = vmax.f32 %v7608_v48, 0.0  ;;  %v7612_v61 = vmax.f32 %v7611_v41, 0.0  ;;  %v3094_v17 = vmax.f32 %v3078_v2, 0.0 }
 0x95f   :  { %v7501_v11 = vmax.f32 %v6733_v27, 0.0  ;;  %v7500_v1 = vmax.f32 %v6737_v30, 0.0  ;;  %v7615_v47 = vmax.f32 %v7614_v4, 0.0  ;;  %v7618_v23 = vmax.f32 %v7617_v35, 0.0 }
 0x960   :  { %v6748_v7 = vadd.f32 %v3088_v3, %v7609_v18  ;;  %v7499_v52 = vmax.f32 %v6742_v53, 0.0  ;;  %v6753_v16 = vadd.f32 %v3092_v56, %v7612_v61 }
 0x961   :  { %v6757_v24 = vadd.f32 %v3090_v57, %v7615_v47  ;;  %v5117_v21 = vpack.c.bf16 %v7500_v1, %v7501_v11  ;;  %v6771_v51 = vadd.f32 %v3094_v17, %v7618_v23 }
 0x962   :  { %7610 = vst [vmem:[#allocation13_spill] sm:$0xff] %v6748_v7  ;;  %7613 = vst [vmem:[#allocation11_spill] sm:$0xff] %v6753_v16  ;;  %v7498_v34 = vmax.f32 %v6748_v7, 0.0  ;;  %v5125_v26 = vpack.c.bf16 %v7502_v44, %v7499_v52  ;;  %v7497_v14 = vmax.f32 %v6753_v16, 0.0 }
 0x963   :  { %7616 = vst [vmem:[#allocation10_spill] sm:$0xff] %v6757_v24  ;;  %7619 = vst [vmem:[#allocation12_spill] sm:$0xff] %v6771_v51  ;;  %v7496_v50 = vmax.f32 %v6757_v24, 0.0  ;;  %5118 = vmatprep.subr.bf16.mxu0 %v5117_v21  ;;  %v7495_v33 = vmax.f32 %v6771_v51, 0.0 }
 0x964   :  { %5126 = vmatprep.subr.bf16.mxu1 %v5125_v26  ;;  %v5119_v63 = vpack.c.bf16 %v7497_v14, %v7498_v34 }
 0x965   :  { %v5127_v25 = vpack.c.bf16 %v7495_v33, %v7496_v50 }
 0x966   :  { %5120 = vmatpush1.bf16.msra.mxu0 %v5119_v63 }
 0x967   :  { %5128 = vmatpush1.bf16.msra.mxu1 %v5127_v25 }
 0x969   :  { %4958 = vmatmul.mubr.msk.f32.vlgmr.msra.gmra.mrb[72].mxu0 %vm493_vm2, %v3131_v45 }
 0x96a   :  { %3217 = vmatprep.mubr.f32.mxu0 %v7547_v39  ;;  %4962 = vmatmul.mubr.msk.f32.vlgmr.msra.gmra.mrb[72].mxu1 %vm493_vm2, %v3131_v45 }
 0x96b   :  { %3306 = vmatprep.mubr.f32.mxu1 %v7547_v39 }
 0x96d   :  { %4959 = vmatmul.mubr.msk.f32.gmra.mrb[74].mxu0 %vm493_vm2, %v3132_v12 }
 0x96e   :  { %3223 = vmatprep.mubr.f32.mxu0 %v7547_v39  ;;  %4963 = vmatmul.mubr.msk.f32.gmra.mrb[74].mxu1 %vm493_vm2, %v3132_v12 }
 0x96f   :  { %3312 = vmatprep.mubr.f32.mxu1 %v7547_v39 }
 0x971   :  { %4960 = vmatmul.mubr.msk.f32.gmra.mrb[76].mxu0 %vm493_vm2, %v3133_v60 }
 0x972   :  { %3229 = vmatprep.mubr.f32.mxu0 %v7547_v39  ;;  %4964 = vmatmul.mubr.msk.f32.gmra.mrb[76].mxu1 %vm493_vm2, %v3133_v60 }
 0x973   :  { %3318 = vmatprep.mubr.f32.mxu1 %v7547_v39 }
 0x975   :  { %4961 = vmatmul.mubr.msk.f32.gmra.mrb[78].mxu0 %vm493_vm2, %v3134_v58 }
 0x976   :  { %3570 = vmatprep.mubr.f32.mxu0 %v7547_v39  ;;  %4965 = vmatmul.mubr.msk.f32.gmra.mrb[78].mxu1 %vm493_vm2, %v3134_v58 }
 0x977   :  { %3659 = vmatprep.mubr.f32.mxu1 %v7547_v39 }
 0xa3c   :  { %v6799_v42 = vpop.f32.mrb[72].mxu0 }
 0xa3d   :  { %v6801_v15 = vpop.f32.mrb[73].mxu0  ;;  %v6803_v28 = vpop.f32.mrb[72].mxu1  ;;  %v3361_v29 = vmul.f32 %v6799_v42, %v6799_v42 }
 0xa3e   :  { %v6805_v32 = vpop.f32.mrb[73].mxu1  ;;  %v3363_v56 = vmul.f32 %v6803_v28, %v6803_v28  ;;  %v3362_v2 = vmul.f32 %v6801_v15, %v6801_v15 }
 0xa3f   :  { %v3364_v26 = vmul.f32 %v6805_v32, %v6805_v32 }
 0xa40   :  { %v6807_v54 = vpop.f32.mrb[74].mxu0 }
 0xa41   :  { %v3325_v55 = vadd.f32 %v6807_v54, %v6799_v42  ;;  %v3365_v3 = vmul.f32 %v6807_v54, %v6807_v54  ;;  %v6815_v8 = vpop.f32.mrb[75].mxu0  ;;  %v6825_v18 = vpop.f32.mrb[74].mxu1 }
 0xa42   :  { %v3334_v57 = vadd.f32 %v6815_v8, %v6801_v15  ;;  %v3366_v48 = vmul.f32 %v6815_v8, %v6815_v8  ;;  %v3343_v61 = vadd.f32 %v6825_v18, %v6803_v28  ;;  %v3367_v17 = vmul.f32 %v6825_v18, %v6825_v18  ;;  %v6831_v4 = vpop.f32.mrb[75].mxu1 }
 0xa43   :  { %v3377_v41 = vadd.f32 %v3365_v3, %v3361_v29  ;;  %v3352_v35 = vadd.f32 %v6831_v4, %v6805_v32  ;;  %v3368_v23 = vmul.f32 %v6831_v4, %v6831_v4 }
 0xa44   :  { %v3386_v47 = vadd.f32 %v3366_v48, %v3362_v2  ;;  %v6833_v21 = vpop.f32.mrb[76].mxu0  ;;  %v3395_v12 = vadd.f32 %v3367_v17, %v3363_v56 }
 0xa45   :  { %v3326_v63 = vadd.f32 %v3325_v55, %v6833_v21  ;;  %v3369_v25 = vmul.f32 %v6833_v21, %v6833_v21  ;;  %v6844_v45 = vpop.f32.mrb[77].mxu0  ;;  %v3404_v29 = vadd.f32 %v3368_v23, %v3364_v26  ;;  %v6849_v3 = vpop.f32.mrb[76].mxu1 }
 0xa46   :  { %v3335_v60 = vadd.f32 %v3334_v57, %v6844_v45  ;;  %v3370_v58 = vmul.f32 %v6844_v45, %v6844_v45  ;;  %v3344_v48 = vadd.f32 %v3343_v61, %v6849_v3  ;;  %v3371_v55 = vmul.f32 %v6849_v3, %v6849_v3  ;;  %v6854_v33 = vpop.f32.mrb[77].mxu1 }
 0xa47   :  { %v3378_v2 = vadd.f32 %v3377_v41, %v3369_v25  ;;  %v3353_v56 = vadd.f32 %v3352_v35, %v6854_v33  ;;  %v3372_v57 = vmul.f32 %v6854_v33, %v6854_v33 }
 0xa48   :  { %v3387_v50 = vadd.f32 %v3386_v47, %v3370_v58  ;;  %v6856_v14 = vpop.f32.mrb[78].mxu0  ;;  %v3396_v61 = vadd.f32 %v3395_v12, %v3371_v55 }
 0xa49   :  { %v3327_v17 = vadd.f32 %v3326_v63, %v6856_v14  ;;  %v3373_v41 = vmul.f32 %v6856_v14, %v6856_v14  ;;  %v6864_v26 = vpop.f32.mrb[79].mxu0  ;;  %v3405_v25 = vadd.f32 %v3404_v29, %v3372_v57  ;;  %v6869_v58 = vpop.f32.mrb[78].mxu1 }
 0xa4a   :  { %v3336_v23 = vadd.f32 %v3335_v60, %v6864_v26  ;;  %v3374_v47 = vmul.f32 %v6864_v26, %v6864_v26  ;;  %v3345_v52 = vadd.f32 %v3344_v48, %v6869_v58  ;;  %v3375_v63 = vmul.f32 %v6869_v58, %v6869_v58  ;;  %v6874_v1 = vpop.f32.mrb[79].mxu1 }
 0xa4b   :  { %v3328_v35 = vrot.slane %v3327_v17, 4  ;;  %v3379_v34 = vadd.f32 %v3378_v2, %v3373_v41  ;;  %v3354_v12 = vadd.f32 %v3353_v56, %v6874_v1  ;;  %v3376_v60 = vmul.f32 %v6874_v1, %v6874_v1 }
 0xa4c   :  { %v3337_v11 = vrot.slane %v3336_v23, 4  ;;  %v3388_v44 = vadd.f32 %v3387_v50, %v3374_v47  ;;  %v3346_v57 = vrot.slane %v3345_v52, 4  ;;  %v3397_v22 = vadd.f32 %v3396_v61, %v3375_v63 }
 0xa4d   :  { %v3329_v55 = vadd.f32 %v3328_v35, %v3327_v17  ;;  %v3380_v29 = vrot.slane %v3379_v34, 4  ;;  %v3355_v41 = vrot.slane %v3354_v12, 4  ;;  %v3406_v48 = vadd.f32 %v3405_v25, %v3376_v60 }
 0xa4e   :  { %v3338_v10 = vadd.f32 %v3337_v11, %v3336_v23  ;;  %v3389_v2 = vrot.slane %v3388_v44, 4  ;;  %v3347_v19 = vadd.f32 %v3346_v57, %v3345_v52  ;;  %v3398_v46 = vrot.slane %v3397_v22, 4 }
 0xa4f   :  { %v3330_v5 = vrot.slane %v3329_v55, 2  ;;  %v3381_v6 = vadd.f32 %v3380_v29, %v3379_v34  ;;  %v3356_v50 = vadd.f32 %v3355_v41, %v3354_v12  ;;  %v3407_v47 = vrot.slane %v3406_v48, 4 }
 0xa50   :  { %v3339_v0 = vrot.slane %v3338_v10, 2  ;;  %v3390_v37 = vadd.f32 %v3389_v2, %v3388_v44  ;;  %v3348_v24 = vrot.slane %v3347_v19, 2  ;;  %v3399_v16 = vadd.f32 %v3398_v46, %v3397_v22 }
 0xa51   :  { %v3331_v56 = vadd.f32 %v3330_v5, %v3329_v55  ;;  %v3382_v51 = vrot.slane %v3381_v6, 2  ;;  %v3357_v7 = vrot.slane %v3356_v50, 2  ;;  %v3408_v61 = vadd.f32 %v3407_v47, %v3406_v48 }
 0xa52   :  { %v3340_v17 = vadd.f32 %v3339_v0, %v3338_v10  ;;  %v3391_v35 = vrot.slane %v3390_v37, 2  ;;  %v3349_v63 = vadd.f32 %v3348_v24, %v3347_v19  ;;  %v3400_v25 = vrot.slane %v3399_v16, 2 }
 0xa53   :  { %v3332_v11 = vrot.slane %v3331_v56, 1  ;;  %v3383_v23 = vadd.f32 %v3382_v51, %v3381_v6  ;;  %v3358_v52 = vadd.f32 %v3357_v7, %v3356_v50  ;;  %v3409_v29 = vrot.slane %v3408_v61, 2 }
 0xa54   :  { %v3341_v60 = vrot.slane %v3340_v17, 1  ;;  %v3392_v34 = vadd.f32 %v3391_v35, %v3390_v37  ;;  %v3350_v12 = vrot.slane %v3349_v63, 1  ;;  %v3401_v2 = vadd.f32 %v3400_v25, %v3399_v16 }
 0xa55   :  { %v3333_v57 = vadd.f32 %v3332_v11, %v3331_v56  ;;  %v3384_v44 = vrot.slane %v3383_v23, 1  ;;  %v3359_v41 = vrot.slane %v3358_v52, 1  ;;  %v3410_v46 = vadd.f32 %v3409_v29, %v3408_v61  ;;  %v4957_v61 = vld [vmem:[%s7427_s3 + $0x10] sm:$0x3] }
 0xa56   :  { %v3342_v5 = vadd.f32 %v3341_v60, %v3340_v17  ;;  %v3393_v55 = vrot.slane %v3392_v34, 1  ;;  %v3402_v10 = vrot.slane %v3401_v2, 1  ;;  %v3351_v47 = vadd.f32 %v3350_v12, %v3349_v63 }
 0xa57   :  { %v3385_v0 = vadd.f32 %v3384_v44, %v3383_v23  ;;  %v3411_v6 = vrot.slane %v3410_v46, 1  ;;  %v3360_v37 = vadd.f32 %v3359_v41, %v3358_v52 }
 0xa58   :  { %v3394_v22 = vadd.f32 %v3393_v55, %v3392_v34  ;;  %v3413_v48 = vadd.f32 %v3342_v5, %v3333_v57  ;;  %v3403_v24 = vadd.f32 %v3402_v10, %v3401_v2 }
 0xa59   :  { %v3412_v50 = vadd.f32 %v3411_v6, %v3410_v46 }
 0xa5a   :  { %v3417_v19 = vadd.f32 %v3394_v22, %v3385_v0  ;;  %v3414_v51 = vadd.f32 %v3413_v48, %v3351_v47 }
 0xa5c   :  { %v3418_v7 = vadd.f32 %v3417_v19, %v3403_v24  ;;  %v3415_v56 = vadd.f32 %v3414_v51, %v3360_v37 }
 0xa5e   :  { %v3416_v35 = vmul.f32 0.0078125, %v3415_v56  ;;  %v3419_v11 = vadd.f32 %v3418_v7, %v3412_v50 }
 0xa60   :  { %v3420_v16 = vmul.f32 0.0078125, %v3419_v11  ;;  %v3421_v17 = vmul.f32 %v3416_v35, %v3416_v35 }
 0xa62   :  { %v3422_v25 = vsub.f32 %v3420_v16, %v3421_v17 }
 0xa64   :  { %v3423_v60 = vadd.f32 1e-05, %v3422_v25 }
 0xa66   :  { %5219 = vrsqrt.f32 %v3423_v60 }
 0xa70   :  { %v5220_v23 = vpop.eup %5219 }
 0xa71   :  { %v3425_v63 = vmul.f32 %v5220_v23, %v4957_v61 }
 0xa73   :  { %v3426_v34 = vmul.f32 %v3425_v63, %v3416_v35  ;;  %v3434_v29 = vrot.slane %v3425_v63, %v5509_v49 }
 0xa75   :  { %v3428_v52 = vrot.slane %v3426_v34, 7  ;;  %v3450_v57 = vmul.f32 %v3434_v29, %v6874_v1  ;;  %v3436_v44 = vmul.f32 %v3434_v29, %v6801_v15  ;;  %v3440_v12 = vmul.f32 %v3434_v29, %v6815_v8 }
 0xa76   :  { %v3438_v2 = vmul.f32 %v3434_v29, %v6805_v32  ;;  %v3442_v5 = vmul.f32 %v3434_v29, %v6831_v4  ;;  %v3435_v55 = vmul.f32 %v3434_v29, %v6799_v42  ;;  %v3439_v41 = vmul.f32 %v3434_v29, %v6807_v54 }
 0xa77   :  { %v3430_v46 = vsub.f32 %v4957_v61, %v3428_v52  ;;  %v3437_v0 = vmul.f32 %v3434_v29, %v6803_v28  ;;  %v3441_v10 = vmul.f32 %v3434_v29, %v6825_v18  ;;  %v3444_v22 = vmul.f32 %v3434_v29, %v6844_v45 }
 0xa78   :  { %v3448_v1 = vmul.f32 %v3434_v29, %v6864_v26  ;;  %v3446_v15 = vmul.f32 %v3434_v29, %v6854_v33  ;;  %v3443_v8 = vmul.f32 %v3434_v29, %v6833_v21  ;;  %v3447_v32 = vmul.f32 %v3434_v29, %v6856_v14 }
 0xa79   :  { %v3454_v4 = vrot.slane %v3430_v46, %v5513_v59  ;;  %v3445_v42 = vmul.f32 %v3434_v29, %v6849_v3  ;;  %v3449_v54 = vmul.f32 %v3434_v29, %v6869_v58 }
 0xa7b   :  { %v3470_v48 = vadd.f32 %v3454_v4, %v3450_v57  ;;  %v3456_v28 = vadd.f32 %v3454_v4, %v3436_v44  ;;  %v3460_v47 = vadd.f32 %v3454_v4, %v3440_v12  ;;  %v3458_v18 = vadd.f32 %v3454_v4, %v3438_v2 }
 0xa7c   :  { %v3462_v6 = vadd.f32 %v3454_v4, %v3442_v5  ;;  %v3455_v45 = vadd.f32 %v3454_v4, %v3435_v55  ;;  %v3459_v19 = vadd.f32 %v3454_v4, %v3439_v41  ;;  %v3457_v26 = vadd.f32 %v3454_v4, %v3437_v0 }
 0xa7d   :  { %v3472_v24 = vmax.f32 %v3456_v28, 0.0  ;;  %v3476_v33 = vmax.f32 %v3460_v47, 0.0  ;;  %v3474_v51 = vmax.f32 %v3458_v18, 0.0  ;;  %v3461_v21 = vadd.f32 %v3454_v4, %v3441_v10  ;;  %v3490_v10 = vld [vmem:[#allocation3 + $0x100] sm:$0xff] }
 0xa7e   :  { %v3478_v37 = vmax.f32 %v3462_v6, 0.0  ;;  %v3471_v14 = vmax.f32 %v3455_v45, 0.0  ;;  %v3475_v7 = vmax.f32 %v3459_v19, 0.0  ;;  %v3473_v50 = vmax.f32 %v3457_v26, 0.0 }
 0xa7f   :  { %v5129_v56 = vpack.c.bf16 %v3476_v33, %v3472_v24  ;;  %v3477_v3 = vmax.f32 %v3461_v21, 0.0  ;;  %v3464_v35 = vadd.f32 %v3454_v4, %v3444_v22  ;;  %v3468_v58 = vadd.f32 %v3454_v4, %v3448_v1  ;;  %v3491_v22 = vld [vmem:[#allocation3 + $0x108] sm:$0xff]  ;;  %v3492_v1 = vld [vmem:[#allocation3 + $0x110] sm:$0xff] }
 0xa80   :  { %v5137_v11 = vpack.c.bf16 %v3478_v37, %v3474_v51  ;;  %v5131_v16 = vpack.c.bf16 %v3475_v7, %v3471_v14  ;;  %v3466_v17 = vadd.f32 %v3454_v4, %v3446_v15  ;;  %v3486_v25 = vmax.f32 %v3470_v48, 0.0  ;;  %v3493_v15 = vld [vmem:[#allocation3 + $0x118] sm:$0xff] }
 0xa81   :  { %5130 = vmatprep.subr.bf16.mxu0 %v5129_v56  ;;  %v5139_v60 = vpack.c.bf16 %v3477_v3, %v3473_v50  ;;  %v3480_v61 = vmax.f32 %v3464_v35, 0.0  ;;  %v3484_v23 = vmax.f32 %v3468_v58, 0.0  ;;  %v3463_v63 = vadd.f32 %v3454_v4, %v3443_v8 }
 0xa82   :  { %5138 = vmatprep.subr.bf16.mxu1 %v5137_v11  ;;  %5132 = vmatpush1.bf16.msra.mxu0 %v5131_v16  ;;  %v3482_v34 = vmax.f32 %v3466_v17, 0.0  ;;  %v3467_v29 = vadd.f32 %v3454_v4, %v3447_v32  ;;  %v3465_v52 = vadd.f32 %v3454_v4, %v3445_v42  ;;  %v3469_v57 = vadd.f32 %v3454_v4, %v3449_v54 }
 0xa83   :  { %5140 = vmatpush1.bf16.msra.mxu1 %v5139_v60  ;;  %v5133_v44 = vpack.c.bf16 %v3484_v23, %v3480_v61  ;;  %v3479_v12 = vmax.f32 %v3463_v63, 0.0 }
 0xa84   :  { %v5141_v2 = vpack.c.bf16 %v3486_v25, %v3482_v34  ;;  %v3483_v5 = vmax.f32 %v3467_v29, 0.0  ;;  %v3481_v55 = vmax.f32 %v3465_v52, 0.0  ;;  %v3485_v41 = vmax.f32 %v3469_v57, 0.0 }
 0xa85   :  { %5134 = vmatprep.subr.bf16.mxu0 %v5133_v44 }
 0xa86   :  { %5142 = vmatprep.subr.bf16.mxu1 %v5141_v2  ;;  %v5135_v46 = vpack.c.bf16 %v3483_v5, %v3479_v12  ;;  %v5143_v0 = vpack.c.bf16 %v3485_v41, %v3481_v55 }
 0xa88   :  { %5136 = vmatpush1.bf16.msra.mxu0 %v5135_v46  ;;  %5144 = vmatpush1.bf16.msra.mxu1 %v5143_v0 }
 0xa8b   :  { %4967 = vmatmul.mubr.msk.f32.vlgmr.msra.gmra.mrb[80].mxu0 %vm493_vm2, %v3490_v10  ;;  %4971 = vmatmul.mubr.msk.f32.vlgmr.msra.gmra.mrb[80].mxu1 %vm493_vm2, %v3490_v10 }
 0xa8c   :  { %3576 = vmatprep.mubr.f32.mxu0 %v7547_v39  ;;  %3665 = vmatprep.mubr.f32.mxu1 %v7547_v39 }
 0xa8f   :  { %4968 = vmatmul.mubr.msk.f32.gmra.mrb[82].mxu0 %vm493_vm2, %v3491_v22  ;;  %4972 = vmatmul.mubr.msk.f32.gmra.mrb[82].mxu1 %vm493_vm2, %v3491_v22 }
 0xa90   :  { %3582 = vmatprep.mubr.f32.mxu0 %v7547_v39  ;;  %3671 = vmatprep.mubr.f32.mxu1 %v7547_v39 }
 0xa93   :  { %4969 = vmatmul.mubr.msk.f32.gmra.mrb[84].mxu0 %vm493_vm2, %v3492_v1  ;;  %4973 = vmatmul.mubr.msk.f32.gmra.mrb[84].mxu1 %vm493_vm2, %v3492_v1 }
 0xa94   :  { %3588 = vmatprep.mubr.f32.mxu0 %v7547_v39  ;;  %3677 = vmatprep.mubr.f32.mxu1 %v7547_v39 }
 0xa97   :  { %4970 = vmatmul.mubr.msk.f32.gmra.mrb[86].mxu0 %vm493_vm2, %v3493_v15  ;;  %4974 = vmatmul.mubr.msk.f32.gmra.mrb[86].mxu1 %vm493_vm2, %v3493_v15 }
 0xa98   :  { %3961 = vmatprep.mubr.f32.mxu0 %v7547_v39  ;;  %4050 = vmatprep.mubr.f32.mxu1 %v7547_v39 }
 0xb5e   :  { %v6916_v8 = vpop.f32.mrb[80].mxu0  ;;  %v6918_v32 = vpop.f32.mrb[80].mxu1 }
 0xb5f   :  { %v6920_v4 = vpop.f32.mrb[81].mxu0  ;;  %v6922_v42 = vpop.f32.mrb[81].mxu1  ;;  %v3722_v54 = vmul.f32 %v6918_v32, %v6918_v32  ;;  %v3720_v48 = vmul.f32 %v6916_v8, %v6916_v8 }
 0xb60   :  { %v3721_v28 = vmul.f32 %v6920_v4, %v6920_v4  ;;  %v3723_v18 = vmul.f32 %v6922_v42, %v6922_v42 }
 0xb62   :  { %v6930_v47 = vpop.f32.mrb[82].mxu0  ;;  %v6934_v6 = vpop.f32.mrb[82].mxu1 }
 0xb63   :  { %v3684_v45 = vadd.f32 %v6930_v47, %v6916_v8  ;;  %v3724_v19 = vmul.f32 %v6930_v47, %v6930_v47  ;;  %v6940_v26 = vpop.f32.mrb[83].mxu0  ;;  %v3702_v24 = vadd.f32 %v6934_v6, %v6918_v32  ;;  %v3726_v33 = vmul.f32 %v6934_v6, %v6934_v6  ;;  %v6946_v51 = vpop.f32.mrb[83].mxu1 }
 0xb64   :  { %v3693_v21 = vadd.f32 %v6940_v26, %v6920_v4  ;;  %v3725_v37 = vmul.f32 %v6940_v26, %v6940_v26  ;;  %v3711_v14 = vadd.f32 %v6946_v51, %v6922_v42  ;;  %v3727_v7 = vmul.f32 %v6946_v51, %v6946_v51 }
 0xb65   :  { %v3736_v50 = vadd.f32 %v3724_v19, %v3720_v48  ;;  %v3754_v56 = vadd.f32 %v3726_v33, %v3722_v54 }
 0xb66   :  { %v3745_v3 = vadd.f32 %v3725_v37, %v3721_v28  ;;  %v6956_v35 = vpop.f32.mrb[84].mxu0  ;;  %v3763_v58 = vadd.f32 %v3727_v7, %v3723_v18  ;;  %v6958_v11 = vpop.f32.mrb[84].mxu1 }
 0xb67   :  { %v3685_v16 = vadd.f32 %v3684_v45, %v6956_v35  ;;  %v3728_v17 = vmul.f32 %v6956_v35, %v6956_v35  ;;  %v6963_v25 = vpop.f32.mrb[85].mxu0  ;;  %v3703_v60 = vadd.f32 %v3702_v24, %v6958_v11  ;;  %v3730_v61 = vmul.f32 %v6958_v11, %v6958_v11  ;;  %v6968_v23 = vpop.f32.mrb[85].mxu1 }
 0xb68   :  { %v3694_v63 = vadd.f32 %v3693_v21, %v6963_v25  ;;  %v3729_v34 = vmul.f32 %v6963_v25, %v6963_v25  ;;  %v3712_v29 = vadd.f32 %v3711_v14, %v6968_v23  ;;  %v3731_v52 = vmul.f32 %v6968_v23, %v6968_v23 }
 0xb69   :  { %v3737_v57 = vadd.f32 %v3736_v50, %v3728_v17  ;;  %v3755_v44 = vadd.f32 %v3754_v56, %v3730_v61 }
 0xb6a   :  { %v3746_v12 = vadd.f32 %v3745_v3, %v3729_v34  ;;  %v6976_v2 = vpop.f32.mrb[86].mxu0  ;;  %v3764_v5 = vadd.f32 %v3763_v58, %v3731_v52  ;;  %v6978_v55 = vpop.f32.mrb[86].mxu1 }
 0xb6b   :  { %v3686_v41 = vadd.f32 %v3685_v16, %v6976_v2  ;;  %v3732_v46 = vmul.f32 %v6976_v2, %v6976_v2  ;;  %v6983_v0 = vpop.f32.mrb[87].mxu0  ;;  %v3704_v10 = vadd.f32 %v3703_v60, %v6978_v55  ;;  %v3734_v22 = vmul.f32 %v6978_v55, %v6978_v55  ;;  %v6988_v1 = vpop.f32.mrb[87].mxu1 }
 0xb6c   :  { %v3695_v15 = vadd.f32 %v3694_v63, %v6983_v0  ;;  %v3733_v54 = vmul.f32 %v6983_v0, %v6983_v0  ;;  %v3713_v48 = vadd.f32 %v3712_v29, %v6988_v1  ;;  %v3735_v28 = vmul.f32 %v6988_v1, %v6988_v1 }
 0xb6d   :  { %v3687_v18 = vrot.slane %v3686_v41, 4  ;;  %v3738_v45 = vadd.f32 %v3737_v57, %v3732_v46  ;;  %v3705_v19 = vrot.slane %v3704_v10, 4  ;;  %v3756_v24 = vadd.f32 %v3755_v44, %v3734_v22 }
 0xb6e   :  { %v3696_v33 = vrot.slane %v3695_v15, 4  ;;  %v3747_v21 = vadd.f32 %v3746_v12, %v3733_v54  ;;  %v3714_v37 = vrot.slane %v3713_v48, 4  ;;  %v3765_v14 = vadd.f32 %v3764_v5, %v3735_v28 }
 0xb6f   :  { %v3688_v7 = vadd.f32 %v3687_v18, %v3686_v41  ;;  %v3739_v50 = vrot.slane %v3738_v45, 4  ;;  %v3706_v56 = vadd.f32 %v3705_v19, %v3704_v10  ;;  %v3757_v3 = vrot.slane %v3756_v24, 4 }
 0xb70   :  { %v3697_v58 = vadd.f32 %v3696_v33, %v3695_v15  ;;  %v3748_v16 = vrot.slane %v3747_v21, 4  ;;  %v3715_v17 = vadd.f32 %v3714_v37, %v3713_v48  ;;  %v3766_v60 = vrot.slane %v3765_v14, 4 }
 0xb71   :  { %v3689_v61 = vrot.slane %v3688_v7, 2  ;;  %v3740_v63 = vadd.f32 %v3739_v50, %v3738_v45  ;;  %v3707_v34 = vrot.slane %v3706_v56, 2  ;;  %v3758_v29 = vadd.f32 %v3757_v3, %v3756_v24 }
 0xb72   :  { %v3698_v52 = vrot.slane %v3697_v58, 2  ;;  %v3749_v57 = vadd.f32 %v3748_v16, %v3747_v21  ;;  %v3716_v46 = vrot.slane %v3715_v17, 2  ;;  %v3767_v44 = vadd.f32 %v3766_v60, %v3765_v14 }
 0xb73   :  { %v3690_v22 = vadd.f32 %v3689_v61, %v3688_v7  ;;  %v3741_v12 = vrot.slane %v3740_v63, 2  ;;  %v3708_v54 = vadd.f32 %v3707_v34, %v3706_v56  ;;  %v3759_v5 = vrot.slane %v3758_v29, 2 }
 0xb74   :  { %v3699_v41 = vadd.f32 %v3698_v52, %v3697_v58  ;;  %v3750_v28 = vrot.slane %v3749_v57, 2  ;;  %v3717_v10 = vadd.f32 %v3716_v46, %v3715_v17  ;;  %v3768_v18 = vrot.slane %v3767_v44, 2 }
 0xb75   :  { %v3691_v15 = vrot.slane %v3690_v22, 1  ;;  %v3742_v19 = vadd.f32 %v3741_v12, %v3740_v63  ;;  %v3760_v48 = vadd.f32 %v3759_v5, %v3758_v29  ;;  %v3709_v45 = vrot.slane %v3708_v54, 1 }
 0xb76   :  { %v3700_v33 = vrot.slane %v3699_v41, 1  ;;  %v3751_v37 = vadd.f32 %v3750_v28, %v3749_v57  ;;  %v3769_v50 = vadd.f32 %v3768_v18, %v3767_v44  ;;  %v3718_v7 = vrot.slane %v3717_v10, 1 }
 0xb77   :  { %v3692_v24 = vadd.f32 %v3691_v15, %v3690_v22  ;;  %v3743_v3 = vrot.slane %v3742_v19, 1  ;;  %v3761_v14 = vrot.slane %v3760_v48, 1  ;;  %v3710_v58 = vadd.f32 %v3709_v45, %v3708_v54  ;;  %v4966_v15 = vld [vmem:[%s7427_s3 + $0x12] sm:$0x3] }
 0xb78   :  { %v3701_v21 = vadd.f32 %v3700_v33, %v3699_v41  ;;  %v3752_v16 = vrot.slane %v3751_v37, 1  ;;  %v3770_v34 = vrot.slane %v3769_v50, 1  ;;  %v3719_v63 = vadd.f32 %v3718_v7, %v3717_v10 }
 0xb79   :  { %v3744_v60 = vadd.f32 %v3743_v3, %v3742_v19  ;;  %v3762_v52 = vadd.f32 %v3761_v14, %v3760_v48 }
 0xb7a   :  { %v3753_v56 = vadd.f32 %v3752_v16, %v3751_v37  ;;  %v3772_v61 = vadd.f32 %v3701_v21, %v3692_v24  ;;  %v3771_v12 = vadd.f32 %v3770_v34, %v3769_v50 }
 0xb7c   :  { %v3776_v17 = vadd.f32 %v3753_v56, %v3744_v60  ;;  %v3773_v46 = vadd.f32 %v3772_v61, %v3710_v58 }
 0xb7e   :  { %v3777_v29 = vadd.f32 %v3776_v17, %v3762_v52  ;;  %v3774_v57 = vadd.f32 %v3773_v46, %v3719_v63 }
 0xb80   :  { %v3775_v5 = vmul.f32 0.0078125, %v3774_v57  ;;  %v3778_v44 = vadd.f32 %v3777_v29, %v3771_v12 }
 0xb82   :  { %v3779_v22 = vmul.f32 0.0078125, %v3778_v44  ;;  %v3780_v28 = vmul.f32 %v3775_v5, %v3775_v5  ;;  %v7622_v44 = vmax.f32 %v6681_v43, 0.0 }
 0xb84   :  { %v3781_v41 = vsub.f32 %v3779_v22, %v3780_v28 }
 0xb86   :  { %v3782_v18 = vadd.f32 1e-05, %v3781_v41  ;;  %v7623_v41 = vmax.f32 %v6685_v38, 0.0 }
 0xb88   :  { %5221 = vrsqrt.f32 %v3782_v18 }
 0xb92   :  { %v5222_v54 = vpop.eup %5221 }
 0xb93   :  { %v3784_v19 = vmul.f32 %v5222_v54, %v4966_v15 }
 0xb95   :  { %v3785_v33 = vmul.f32 %v3784_v19, %v3775_v5  ;;  %v3793_v48 = vrot.slane %v3784_v19, %v5509_v49 }
 0xb97   :  { %v3787_v10 = vrot.slane %v3785_v33, 7  ;;  %v3809_v37 = vmul.f32 %v3793_v48, %v6988_v1  ;;  %v3795_v45 = vmul.f32 %v3793_v48, %v6920_v4  ;;  %v3799_v50 = vmul.f32 %v3793_v48, %v6940_v26 }
 0xb98   :  { %v3797_v24 = vmul.f32 %v3793_v48, %v6922_v42  ;;  %v3801_v3 = vmul.f32 %v3793_v48, %v6946_v51  ;;  %v3794_v21 = vmul.f32 %v3793_v48, %v6916_v8  ;;  %v3798_v16 = vmul.f32 %v3793_v48, %v6930_v47 }
 0xb99   :  { %v3789_v14 = vsub.f32 %v4966_v15, %v3787_v10  ;;  %v3796_v7 = vmul.f32 %v3793_v48, %v6918_v32  ;;  %v3800_v60 = vmul.f32 %v3793_v48, %v6934_v6  ;;  %v3803_v56 = vmul.f32 %v3793_v48, %v6963_v25 }
 0xb9a   :  { %v3807_v1 = vmul.f32 %v3793_v48, %v6983_v0  ;;  %v3805_v4 = vmul.f32 %v3793_v48, %v6968_v23  ;;  %v3802_v26 = vmul.f32 %v3793_v48, %v6956_v35  ;;  %v3806_v42 = vmul.f32 %v3793_v48, %v6976_v2 }
 0xb9b   :  { %v3813_v51 = vrot.slane %v3789_v14, %v5513_v59  ;;  %v3804_v8 = vmul.f32 %v3793_v48, %v6958_v11  ;;  %v3808_v47 = vmul.f32 %v3793_v48, %v6978_v55  ;;  %v7620_v11 = vmax.f32 %v6673_v40, 0.0 }
 0xb9c   :  { %v7621_v55 = vmax.f32 %v6677_v31, 0.0  ;;  %v7624_v15 = vmax.f32 %v6689_v9, 0.0  ;;  %v7625_v40 = vmax.f32 %v6693_v20, 0.0  ;;  %v7626_v10 = vmax.f32 %v6700_v36, 0.0 }
 0xb9d   :  { %v3829_v61 = vadd.f32 %v3813_v51, %v3809_v37  ;;  %v3815_v32 = vadd.f32 %v3813_v51, %v3795_v45  ;;  %v3819_v58 = vadd.f32 %v3813_v51, %v3799_v50  ;;  %v3817_v6 = vadd.f32 %v3813_v51, %v3797_v24 }
 0xb9e   :  { %v3821_v34 = vadd.f32 %v3813_v51, %v3801_v3  ;;  %v3814_v25 = vadd.f32 %v3813_v51, %v3794_v21  ;;  %v3818_v17 = vadd.f32 %v3813_v51, %v3798_v16  ;;  %v3816_v0 = vadd.f32 %v3813_v51, %v3796_v7 }
 0xb9f   :  { %v3845_v52 = vmax.f32 %v3829_v61, 0.0  ;;  %v3831_v23 = vmax.f32 %v3815_v32, 0.0  ;;  %v3835_v46 = vmax.f32 %v3819_v58, 0.0  ;;  %v3833_v35 = vmax.f32 %v3817_v6, 0.0 }
 0xba0   :  { %v3837_v63 = vmax.f32 %v3821_v34, 0.0  ;;  %v3830_v2 = vmax.f32 %v3814_v25, 0.0  ;;  %v3834_v29 = vmax.f32 %v3818_v17, 0.0  ;;  %v3820_v12 = vadd.f32 %v3813_v51, %v3800_v60 }
 0xba1   :  { %v7019_v57 = vadd.f32 %v3831_v23, %v7620_v11  ;;  %v7023_v5 = vadd.f32 %v3835_v46, %v7621_v55  ;;  %v7027_v22 = vadd.f32 %v3833_v35, %v7622_v44  ;;  %v3832_v28 = vmax.f32 %v3816_v0, 0.0  ;;  %v7635_v11 = vld [vmem:[#allocation11_spill] sm:$0xff] }
 0xba2   :  { %v7031_v18 = vadd.f32 %v3837_v63, %v7623_v41  ;;  %v7035_v54 = vadd.f32 %v3830_v2, %v7624_v15  ;;  %v7039_v19 = vadd.f32 %v3834_v29, %v7625_v40  ;;  %v3836_v31 = vmax.f32 %v3820_v12, 0.0  ;;  %v7632_v2 = vld [vmem:[#allocation13_spill] sm:$0xff] }
 0xba3   :  { %v7530_v33 = vmax.f32 %v7019_v57, 0.0  ;;  %v7529_v43 = vmax.f32 %v7023_v5, 0.0  ;;  %v7528_v48 = vmax.f32 %v7027_v22, 0.0  ;;  %v7046_v38 = vadd.f32 %v3832_v28, %v7626_v10  ;;  %v7638_v28 = vld [vmem:[#allocation10_spill] sm:$0xff]  ;;  %v7641_v10 = vld [vmem:[#allocation12_spill] sm:$0xff] }
 0xba4   :  { %v7527_v37 = vmax.f32 %v7031_v18, 0.0  ;;  %v7526_v9 = vmax.f32 %v7035_v54, 0.0  ;;  %v7525_v45 = vmax.f32 %v7039_v19, 0.0  ;;  %v7627_v20 = vmax.f32 %v6707_v62, 0.0 }
 0xba5   :  { %v5145_v24 = vpack.c.bf16 %v7529_v43, %v7530_v33  ;;  %v7524_v3 = vmax.f32 %v7046_v38, 0.0  ;;  %v3823_v36 = vadd.f32 %v3813_v51, %v3803_v56  ;;  %v3827_v21 = vadd.f32 %v3813_v51, %v3807_v1 }
 0xba6   :  { %v7053_v50 = vadd.f32 %v3836_v31, %v7627_v20  ;;  %v5153_v16 = vpack.c.bf16 %v7527_v37, %v7528_v48  ;;  %v5147_v62 = vpack.c.bf16 %v7525_v45, %v7526_v9  ;;  %v3825_v7 = vadd.f32 %v3813_v51, %v3805_v4 }
 0xba7   :  { %5146 = vmatprep.subr.bf16.mxu0 %v5145_v24  ;;  %v3839_v60 = vmax.f32 %v3823_v36, 0.0  ;;  %v3843_v61 = vmax.f32 %v3827_v21, 0.0  ;;  %v7628_v32 = vmax.f32 %v6725_v13, 0.0  ;;  %v3822_v1 = vadd.f32 %v3813_v51, %v3802_v26 }
 0xba8   :  { %v7523_v14 = vmax.f32 %v7053_v50, 0.0  ;;  %5154 = vmatprep.subr.bf16.mxu1 %v5153_v16  ;;  %5148 = vmatpush1.bf16.msra.mxu0 %v5147_v62  ;;  %v3841_v6 = vmax.f32 %v3825_v7, 0.0  ;;  %v3826_v34 = vadd.f32 %v3813_v51, %v3806_v42  ;;  %v3824_v25 = vadd.f32 %v3813_v51, %v3804_v8  ;;  %v3881_v7 = vld [vmem:[#allocation3 + $0x120] sm:$0xff] }
 0xba9   :  { %v7071_v56 = vadd.f32 %v3845_v52, %v7628_v32  ;;  %v7629_v4 = vmax.f32 %v6733_v27, 0.0  ;;  %v7630_v0 = vmax.f32 %v6737_v30, 0.0  ;;  %v3838_v52 = vmax.f32 %v3822_v1, 0.0  ;;  %v3884_v32 = vld [vmem:[#allocation3 + $0x138] sm:$0xff] }
 0xbaa   :  { %v5155_v58 = vpack.c.bf16 %v7523_v14, %v7524_v3  ;;  %v7631_v23 = vmax.f32 %v6742_v53, 0.0  ;;  %v3842_v35 = vmax.f32 %v3826_v34, 0.0  ;;  %v3828_v63 = vadd.f32 %v3813_v51, %v3808_v47 }
 0xbab   :  { %v7079_v17 = vadd.f32 %v3839_v60, %v7629_v4  ;;  %v7083_v13 = vadd.f32 %v3843_v61, %v7630_v0  ;;  %v7522_v26 = vmax.f32 %v7071_v56, 0.0  ;;  %v3840_v42 = vmax.f32 %v3824_v25, 0.0  ;;  %v3882_v60 = vld [vmem:[#allocation3 + $0x128] sm:$0xff]  ;;  %v3883_v61 = vld [vmem:[#allocation3 + $0x130] sm:$0xff] }
 0xbac   :  { %5156 = vmatpush1.bf16.msra.mxu1 %v5155_v58  ;;  %v7088_v46 = vadd.f32 %v3841_v6, %v7631_v23  ;;  %v7633_v29 = vmax.f32 %v7632_v2, 0.0  ;;  %v7636_v55 = vmax.f32 %v7635_v11, 0.0  ;;  %v3844_v53 = vmax.f32 %v3828_v63, 0.0 }
 0xbad   :  { %v7521_v8 = vmax.f32 %v7079_v17, 0.0  ;;  %v7520_v27 = vmax.f32 %v7083_v13, 0.0  ;;  %v7639_v41 = vmax.f32 %v7638_v28, 0.0  ;;  %v7642_v20 = vmax.f32 %v7641_v10, 0.0 }
 0xbae   :  { %v7094_v30 = vadd.f32 %v3838_v52, %v7633_v29  ;;  %v7519_v12 = vmax.f32 %v7088_v46, 0.0  ;;  %v7099_v44 = vadd.f32 %v3842_v35, %v7636_v55 }
 0xbaf   :  { %v7103_v15 = vadd.f32 %v3840_v42, %v7639_v41  ;;  %v5149_v51 = vpack.c.bf16 %v7520_v27, %v7521_v8  ;;  %v7117_v24 = vadd.f32 %v3844_v53, %v7642_v20 }
 0xbb0   :  { %7634 = vst [vmem:[#allocation13_spill] sm:$0xff] %v7094_v30  ;;  %7637 = vst [vmem:[#allocation11_spill] sm:$0xff] %v7099_v44  ;;  %v7518_v47 = vmax.f32 %v7094_v30, 0.0  ;;  %v5157_v40 = vpack.c.bf16 %v7522_v26, %v7519_v12  ;;  %v7517_v31 = vmax.f32 %v7099_v44, 0.0 }
 0xbb1   :  { %7640 = vst [vmem:[#allocation10_spill] sm:$0xff] %v7103_v15  ;;  %7643 = vst [vmem:[#allocation12_spill] sm:$0xff] %v7117_v24  ;;  %v7516_v36 = vmax.f32 %v7103_v15, 0.0  ;;  %5150 = vmatprep.subr.bf16.mxu0 %v5149_v51  ;;  %v7515_v16 = vmax.f32 %v7117_v24, 0.0 }
 0xbb2   :  { %5158 = vmatprep.subr.bf16.mxu1 %v5157_v40  ;;  %v5151_v21 = vpack.c.bf16 %v7517_v31, %v7518_v47 }
 0xbb3   :  { %v5159_v62 = vpack.c.bf16 %v7515_v16, %v7516_v36 }
 0xbb4   :  { %5152 = vmatpush1.bf16.msra.mxu0 %v5151_v21 }
 0xbb5   :  { %5160 = vmatpush1.bf16.msra.mxu1 %v5159_v62 }
 0xbb7   :  { %4976 = vmatmul.mubr.msk.f32.vlgmr.msra.gmra.mrb[88].mxu0 %vm493_vm2, %v3881_v7 }
 0xbb8   :  { %3967 = vmatprep.mubr.f32.mxu0 %v7547_v39  ;;  %4980 = vmatmul.mubr.msk.f32.vlgmr.msra.gmra.mrb[88].mxu1 %vm493_vm2, %v3881_v7 }
 0xbb9   :  { %4056 = vmatprep.mubr.f32.mxu1 %v7547_v39 }
 0xbbb   :  { %4977 = vmatmul.mubr.msk.f32.gmra.mrb[90].mxu0 %vm493_vm2, %v3882_v60 }
 0xbbc   :  { %3973 = vmatprep.mubr.f32.mxu0 %v7547_v39  ;;  %4981 = vmatmul.mubr.msk.f32.gmra.mrb[90].mxu1 %vm493_vm2, %v3882_v60 }
 0xbbd   :  { %4062 = vmatprep.mubr.f32.mxu1 %v7547_v39 }
 0xbbf   :  { %4978 = vmatmul.mubr.msk.f32.gmra.mrb[92].mxu0 %vm493_vm2, %v3883_v61 }
 0xbc0   :  { %3979 = vmatprep.mubr.f32.mxu0 %v7547_v39  ;;  %4982 = vmatmul.mubr.msk.f32.gmra.mrb[92].mxu1 %vm493_vm2, %v3883_v61 }
 0xbc1   :  { %4068 = vmatprep.mubr.f32.mxu1 %v7547_v39 }
 0xbc3   :  { %4979 = vmatmul.mubr.msk.f32.gmra.mrb[94].mxu0 %vm493_vm2, %v3884_v32 }
 0xbc4   :  { %4320 = vmatprep.mubr.f32.mxu0 %v7547_v39  ;;  %4983 = vmatmul.mubr.msk.f32.gmra.mrb[94].mxu1 %vm493_vm2, %v3884_v32 }
 0xbc5   :  { %4409 = vmatprep.mubr.f32.mxu1 %v7547_v39 }
 0xc8a   :  { %v7145_v1 = vpop.f32.mrb[88].mxu0 }
 0xc8b   :  { %v7147_v58 = vpop.f32.mrb[89].mxu0  ;;  %v7149_v6 = vpop.f32.mrb[88].mxu1  ;;  %v4111_v4 = vmul.f32 %v7145_v1, %v7145_v1 }
 0xc8c   :  { %v7151_v34 = vpop.f32.mrb[89].mxu1  ;;  %v4113_v35 = vmul.f32 %v7149_v6, %v7149_v6  ;;  %v4112_v63 = vmul.f32 %v7147_v58, %v7147_v58 }
 0xc8d   :  { %v4114_v40 = vmul.f32 %v7151_v34, %v7151_v34 }
 0xc8e   :  { %v7153_v25 = vpop.f32.mrb[90].mxu0 }
 0xc8f   :  { %v4075_v0 = vadd.f32 %v7153_v25, %v7145_v1  ;;  %v4115_v52 = vmul.f32 %v7153_v25, %v7153_v25  ;;  %v7161_v23 = vpop.f32.mrb[91].mxu0  ;;  %v7171_v29 = vpop.f32.mrb[90].mxu1 }
 0xc90   :  { %v4084_v42 = vadd.f32 %v7161_v23, %v7147_v58  ;;  %v4116_v2 = vmul.f32 %v7161_v23, %v7161_v23  ;;  %v4093_v55 = vadd.f32 %v7171_v29, %v7149_v6  ;;  %v4117_v53 = vmul.f32 %v7171_v29, %v7171_v29  ;;  %v7177_v28 = vpop.f32.mrb[91].mxu1 }
 0xc91   :  { %v4127_v11 = vadd.f32 %v4115_v52, %v4111_v4  ;;  %v4102_v10 = vadd.f32 %v7177_v28, %v7151_v34  ;;  %v4118_v20 = vmul.f32 %v7177_v28, %v7177_v28 }
 0xc92   :  { %v4136_v41 = vadd.f32 %v4116_v2, %v4112_v63  ;;  %v7179_v51 = vpop.f32.mrb[92].mxu0  ;;  %v4145_v60 = vadd.f32 %v4117_v53, %v4113_v35 }
 0xc93   :  { %v4076_v21 = vadd.f32 %v4075_v0, %v7179_v51  ;;  %v4119_v62 = vmul.f32 %v7179_v51, %v7179_v51  ;;  %v7190_v7 = vpop.f32.mrb[93].mxu0  ;;  %v4154_v4 = vadd.f32 %v4118_v20, %v4114_v40  ;;  %v7195_v52 = vpop.f32.mrb[92].mxu1 }
 0xc94   :  { %v4085_v61 = vadd.f32 %v4084_v42, %v7190_v7  ;;  %v4120_v32 = vmul.f32 %v7190_v7, %v7190_v7  ;;  %v4094_v2 = vadd.f32 %v4093_v55, %v7195_v52  ;;  %v4121_v0 = vmul.f32 %v7195_v52, %v7195_v52  ;;  %v7200_v16 = vpop.f32.mrb[93].mxu1 }
 0xc95   :  { %v4128_v63 = vadd.f32 %v4127_v11, %v4119_v62  ;;  %v4103_v35 = vadd.f32 %v4102_v10, %v7200_v16  ;;  %v4122_v42 = vmul.f32 %v7200_v16, %v7200_v16 }
 0xc96   :  { %v4137_v36 = vadd.f32 %v4136_v41, %v4120_v32  ;;  %v7202_v31 = vpop.f32.mrb[94].mxu0  ;;  %v4146_v55 = vadd.f32 %v4145_v60, %v4121_v0 }
 0xc97   :  { %v4077_v53 = vadd.f32 %v4076_v21, %v7202_v31  ;;  %v4123_v11 = vmul.f32 %v7202_v31, %v7202_v31  ;;  %v7210_v40 = vpop.f32.mrb[95].mxu0  ;;  %v4155_v62 = vadd.f32 %v4154_v4, %v4122_v42  ;;  %v7215_v32 = vpop.f32.mrb[94].mxu1 }
 0xc98   :  { %v4086_v20 = vadd.f32 %v4085_v61, %v7210_v40  ;;  %v4124_v41 = vmul.f32 %v7210_v40, %v7210_v40  ;;  %v4095_v12 = vadd.f32 %v4094_v2, %v7215_v32  ;;  %v4125_v21 = vmul.f32 %v7215_v32, %v7215_v32  ;;  %v7220_v27 = vpop.f32.mrb[95].mxu1 }
 0xc99   :  { %v4078_v10 = vrot.slane %v4077_v53, 4  ;;  %v4129_v47 = vadd.f32 %v4128_v63, %v4123_v11  ;;  %v4104_v60 = vadd.f32 %v4103_v35, %v7220_v27  ;;  %v4126_v61 = vmul.f32 %v7220_v27, %v7220_v27 }
 0xc9a   :  { %v4087_v8 = vrot.slane %v4086_v20, 4  ;;  %v4138_v26 = vadd.f32 %v4137_v36, %v4124_v41  ;;  %v4096_v42 = vrot.slane %v4095_v12, 4  ;;  %v4147_v14 = vadd.f32 %v4146_v55, %v4125_v21 }
 0xc9b   :  { %v4079_v0 = vadd.f32 %v4078_v10, %v4077_v53  ;;  %v4130_v4 = vrot.slane %v4129_v47, 4  ;;  %v4105_v11 = vrot.slane %v4104_v60, 4  ;;  %v4156_v2 = vadd.f32 %v4155_v62, %v4126_v61 }
 0xc9c   :  { %v4088_v3 = vadd.f32 %v4087_v8, %v4086_v20  ;;  %v4139_v63 = vrot.slane %v4138_v26, 4  ;;  %v4097_v37 = vadd.f32 %v4096_v42, %v4095_v12  ;;  %v4148_v48 = vrot.slane %v4147_v14, 4 }
 0xc9d   :  { %v4080_v45 = vrot.slane %v4079_v0, 2  ;;  %v4131_v9 = vadd.f32 %v4130_v4, %v4129_v47  ;;  %v4106_v36 = vadd.f32 %v4105_v11, %v4104_v60  ;;  %v4157_v41 = vrot.slane %v4156_v2, 4 }
 0xc9e   :  { %v4089_v43 = vrot.slane %v4088_v3, 2  ;;  %v4140_v33 = vadd.f32 %v4139_v63, %v4138_v26  ;;  %v4098_v15 = vrot.slane %v4097_v37, 2  ;;  %v4149_v44 = vadd.f32 %v4148_v48, %v4147_v14 }
 0xc9f   :  { %v4081_v35 = vadd.f32 %v4080_v45, %v4079_v0  ;;  %v4132_v24 = vrot.slane %v4131_v9, 2  ;;  %v4107_v30 = vrot.slane %v4106_v36, 2  ;;  %v4158_v55 = vadd.f32 %v4157_v41, %v4156_v2 }
 0xca0   :  { %v4090_v53 = vadd.f32 %v4089_v43, %v4088_v3  ;;  %v4141_v10 = vrot.slane %v4140_v33, 2  ;;  %v4099_v21 = vadd.f32 %v4098_v15, %v4097_v37  ;;  %v4150_v62 = vrot.slane %v4149_v44, 2 }
 0xca1   :  { %v4082_v8 = vrot.slane %v4081_v35, 1  ;;  %v4133_v20 = vadd.f32 %v4132_v24, %v4131_v9  ;;  %v4108_v12 = vadd.f32 %v4107_v30, %v4106_v36  ;;  %v4159_v4 = vrot.slane %v4158_v55, 2 }
 0xca2   :  { %v4091_v61 = vrot.slane %v4090_v53, 1  ;;  %v4142_v47 = vadd.f32 %v4141_v10, %v4140_v33  ;;  %v4100_v60 = vrot.slane %v4099_v21, 1  ;;  %v4151_v63 = vadd.f32 %v4150_v62, %v4149_v44 }
 0xca3   :  { %v4083_v42 = vadd.f32 %v4082_v8, %v4081_v35  ;;  %v4134_v26 = vrot.slane %v4133_v20, 1  ;;  %v4109_v11 = vrot.slane %v4108_v12, 1  ;;  %v4160_v48 = vadd.f32 %v4159_v4, %v4158_v55  ;;  %v4975_v55 = vld [vmem:[%s7427_s3 + $0x14] sm:$0x3] }
 0xca4   :  { %v4092_v45 = vadd.f32 %v4091_v61, %v4090_v53  ;;  %v4143_v0 = vrot.slane %v4142_v47, 1  ;;  %v4152_v3 = vrot.slane %v4151_v63, 1  ;;  %v4101_v41 = vadd.f32 %v4100_v60, %v4099_v21 }
 0xca5   :  { %v4135_v43 = vadd.f32 %v4134_v26, %v4133_v20  ;;  %v4161_v9 = vrot.slane %v4160_v48, 1  ;;  %v4110_v33 = vadd.f32 %v4109_v11, %v4108_v12 }
 0xca6   :  { %v4144_v14 = vadd.f32 %v4143_v0, %v4142_v47  ;;  %v4163_v2 = vadd.f32 %v4092_v45, %v4083_v42  ;;  %v4153_v15 = vadd.f32 %v4152_v3, %v4151_v63 }
 0xca7   :  { %v4162_v36 = vadd.f32 %v4161_v9, %v4160_v48 }
 0xca8   :  { %v4167_v37 = vadd.f32 %v4144_v14, %v4135_v43  ;;  %v4164_v24 = vadd.f32 %v4163_v2, %v4101_v41 }
 0xcaa   :  { %v4168_v30 = vadd.f32 %v4167_v37, %v4153_v15  ;;  %v4165_v35 = vadd.f32 %v4164_v24, %v4110_v33 }
 0xcac   :  { %v4166_v10 = vmul.f32 0.0078125, %v4165_v35  ;;  %v4169_v8 = vadd.f32 %v4168_v30, %v4162_v36 }
 0xcae   :  { %v4170_v44 = vmul.f32 0.0078125, %v4169_v8  ;;  %v4171_v53 = vmul.f32 %v4166_v10, %v4166_v10 }
 0xcb0   :  { %v4172_v62 = vsub.f32 %v4170_v44, %v4171_v53 }
 0xcb2   :  { %v4173_v61 = vadd.f32 1e-05, %v4172_v62 }
 0xcb4   :  { %5223 = vrsqrt.f32 %v4173_v61 }
 0xcbe   :  { %v5224_v20 = vpop.eup %5223 }
 0xcbf   :  { %v4175_v21 = vmul.f32 %v5224_v20, %v4975_v55 }
 0xcc1   :  { %v4176_v47 = vmul.f32 %v4175_v21, %v4166_v10  ;;  %v4184_v4 = vrot.slane %v4175_v21, %v5509_v49 }
 0xcc3   :  { %v4178_v12 = vrot.slane %v4176_v47, 7  ;;  %v4200_v42 = vmul.f32 %v4184_v4, %v7220_v27  ;;  %v4186_v26 = vmul.f32 %v4184_v4, %v7147_v58  ;;  %v4190_v60 = vmul.f32 %v4184_v4, %v7161_v23 }
 0xcc4   :  { %v4188_v63 = vmul.f32 %v4184_v4, %v7151_v34  ;;  %v4192_v45 = vmul.f32 %v4184_v4, %v7177_v28  ;;  %v4185_v0 = vmul.f32 %v4184_v4, %v7145_v1  ;;  %v4189_v11 = vmul.f32 %v4184_v4, %v7153_v25 }
 0xcc5   :  { %v4180_v48 = vsub.f32 %v4975_v55, %v4178_v12  ;;  %v4187_v43 = vmul.f32 %v4184_v4, %v7149_v6  ;;  %v4191_v3 = vmul.f32 %v4184_v4, %v7171_v29  ;;  %v4194_v14 = vmul.f32 %v4184_v4, %v7190_v7 }
 0xcc6   :  { %v4198_v27 = vmul.f32 %v4184_v4, %v7210_v40  ;;  %v4196_v58 = vmul.f32 %v4184_v4, %v7200_v16  ;;  %v4193_v23 = vmul.f32 %v4184_v4, %v7179_v51  ;;  %v4197_v34 = vmul.f32 %v4184_v4, %v7202_v31 }
 0xcc7   :  { %v4204_v28 = vrot.slane %v4180_v48, %v5513_v59  ;;  %v4195_v1 = vmul.f32 %v4184_v4, %v7195_v52  ;;  %v4199_v25 = vmul.f32 %v4184_v4, %v7215_v32 }
 0xcc9   :  { %v4220_v2 = vadd.f32 %v4204_v28, %v4200_v42  ;;  %v4206_v6 = vadd.f32 %v4204_v28, %v4186_v26  ;;  %v4210_v41 = vadd.f32 %v4204_v28, %v4190_v60  ;;  %v4208_v29 = vadd.f32 %v4204_v28, %v4188_v63 }
 0xcca   :  { %v4212_v9 = vadd.f32 %v4204_v28, %v4192_v45  ;;  %v4205_v7 = vadd.f32 %v4204_v28, %v4185_v0  ;;  %v4209_v37 = vadd.f32 %v4204_v28, %v4189_v11  ;;  %v4207_v40 = vadd.f32 %v4204_v28, %v4187_v43 }
 0xccb   :  { %v4222_v15 = vmax.f32 %v4206_v6, 0.0  ;;  %v4226_v16 = vmax.f32 %v4210_v41, 0.0  ;;  %v4224_v24 = vmax.f32 %v4208_v29, 0.0  ;;  %v4211_v51 = vadd.f32 %v4204_v28, %v4191_v3  ;;  %v4240_v3 = vld [vmem:[#allocation3 + $0x140] sm:$0xff] }
 0xccc   :  { %v4228_v33 = vmax.f32 %v4212_v9, 0.0  ;;  %v4221_v31 = vmax.f32 %v4205_v7, 0.0  ;;  %v4225_v30 = vmax.f32 %v4209_v37, 0.0  ;;  %v4223_v36 = vmax.f32 %v4207_v40, 0.0 }
 0xccd   :  { %v5161_v35 = vpack.c.bf16 %v4226_v16, %v4222_v15  ;;  %v4227_v52 = vmax.f32 %v4211_v51, 0.0  ;;  %v4214_v10 = vadd.f32 %v4204_v28, %v4194_v14  ;;  %v4218_v32 = vadd.f32 %v4204_v28, %v4198_v27  ;;  %v4241_v14 = vld [vmem:[#allocation3 + $0x148] sm:$0xff]  ;;  %v4242_v27 = vld [vmem:[#allocation3 + $0x150] sm:$0xff] }
 0xcce   :  { %v5169_v8 = vpack.c.bf16 %v4228_v33, %v4224_v24  ;;  %v5163_v44 = vpack.c.bf16 %v4225_v30, %v4221_v31  ;;  %v4216_v53 = vadd.f32 %v4204_v28, %v4196_v58  ;;  %v4236_v62 = vmax.f32 %v4220_v2, 0.0  ;;  %v4243_v58 = vld [vmem:[#allocation3 + $0x158] sm:$0xff] }
 0xccf   :  { %5162 = vmatprep.subr.bf16.mxu0 %v5161_v35  ;;  %v5171_v61 = vpack.c.bf16 %v4227_v52, %v4223_v36  ;;  %v4230_v55 = vmax.f32 %v4214_v10, 0.0  ;;  %v4234_v20 = vmax.f32 %v4218_v32, 0.0  ;;  %v4213_v21 = vadd.f32 %v4204_v28, %v4193_v23  ;;  %v4811_v23 = vld [vmem:[#allocation2] sm:$0x1] }
 0xcd0   :  { %5170 = vmatprep.subr.bf16.mxu1 %v5169_v8  ;;  %5164 = vmatpush1.bf16.msra.mxu0 %v5163_v44  ;;  %v4232_v47 = vmax.f32 %v4216_v53, 0.0  ;;  %v4217_v4 = vadd.f32 %v4204_v28, %v4197_v34  ;;  %v4215_v12 = vadd.f32 %v4204_v28, %v4195_v1  ;;  %v4219_v42 = vadd.f32 %v4204_v28, %v4199_v25 }
 0xcd1   :  { %5172 = vmatpush1.bf16.msra.mxu1 %v5171_v61  ;;  %v5165_v26 = vpack.c.bf16 %v4234_v20, %v4230_v55  ;;  %v4229_v60 = vmax.f32 %v4213_v21, 0.0  ;;  %v5280_v34 = vmov 0  }
 0xcd2   :  { %v5173_v63 = vpack.c.bf16 %v4236_v62, %v4232_v47  ;;  %v4233_v45 = vmax.f32 %v4217_v4, 0.0  ;;  %v4231_v0 = vmax.f32 %v4215_v12, 0.0  ;;  %v4235_v11 = vmax.f32 %v4219_v42, 0.0  ;;  %5201 = vset.pattern.permute.xlu0 %v5280_v34 }
 0xcd3   :  { %5166 = vmatprep.subr.bf16.mxu0 %v5165_v26  ;;  %4814 = vperm.xlu0 %5201, %v4811_v23  }
 0xcd4   :  { %5174 = vmatprep.subr.bf16.mxu1 %v5173_v63  ;;  %v5167_v48 = vpack.c.bf16 %v4233_v45, %v4229_v60  ;;  %v5175_v43 = vpack.c.bf16 %v4235_v11, %v4231_v0 }
 0xcd6   :  { %5168 = vmatpush1.bf16.msra.mxu0 %v5167_v48  ;;  %5176 = vmatpush1.bf16.msra.mxu1 %v5175_v43 }
 0xcd9   :  { %4985 = vmatmul.mubr.msk.f32.vlgmr.msra.gmra.mrb[96].mxu0 %vm493_vm2, %v4240_v3  ;;  %4989 = vmatmul.mubr.msk.f32.vlgmr.msra.gmra.mrb[96].mxu1 %vm493_vm2, %v4240_v3 }
 0xcda   :  { %4326 = vmatprep.mubr.f32.mxu0 %v7547_v39  ;;  %4415 = vmatprep.mubr.f32.mxu1 %v7547_v39 }
 0xcdd   :  { %4986 = vmatmul.mubr.msk.f32.gmra.mrb[98].mxu0 %vm493_vm2, %v4241_v14  ;;  %4990 = vmatmul.mubr.msk.f32.gmra.mrb[98].mxu1 %vm493_vm2, %v4241_v14 }
 0xcde   :  { %4332 = vmatprep.mubr.f32.mxu0 %v7547_v39  ;;  %4421 = vmatprep.mubr.f32.mxu1 %v7547_v39 }
 0xce1   :  { %4987 = vmatmul.mubr.msk.f32.gmra.mrb[100].mxu0 %vm493_vm2, %v4242_v27  ;;  %4991 = vmatmul.mubr.msk.f32.gmra.mrb[100].mxu1 %vm493_vm2, %v4242_v27 }
 0xce2   :  { %4338 = vmatprep.mubr.f32.mxu0 %v7547_v39  ;;  %4427 = vmatprep.mubr.f32.mxu1 %v7547_v39 }
 0xce5   :  { %4988 = vmatmul.mubr.msk.f32.gmra.mrb[102].mxu0 %vm493_vm2, %v4243_v58  ;;  %4992 = vmatmul.mubr.msk.f32.gmra.mrb[102].mxu1 %vm493_vm2, %v4243_v58 }
 0xce6   :  { %4709 = vmatprep.mubr.f32.mxu0 %v7547_v39  ;;  %4792 = vmatprep.mubr.f32.mxu1 %v7547_v39 }
 0xdac   :  { %v7262_v28 = vpop.f32.mrb[96].mxu0  ;;  %v7264_v1 = vpop.f32.mrb[96].mxu1 }
 0xdad   :  { %v7266_v25 = vpop.f32.mrb[97].mxu0  ;;  %v7268_v2 = vpop.f32.mrb[97].mxu1  ;;  %v4472_v6 = vmul.f32 %v7264_v1, %v7264_v1  ;;  %v4470_v41 = vmul.f32 %v7262_v28, %v7262_v28 }
 0xdae   :  { %v4471_v29 = vmul.f32 %v7266_v25, %v7266_v25  ;;  %v4473_v7 = vmul.f32 %v7268_v2, %v7268_v2 }
 0xdb0   :  { %v7276_v9 = vpop.f32.mrb[98].mxu0  ;;  %v7280_v37 = vpop.f32.mrb[98].mxu1 }
 0xdb1   :  { %v4434_v40 = vadd.f32 %v7276_v9, %v7262_v28  ;;  %v4474_v15 = vmul.f32 %v7276_v9, %v7276_v9  ;;  %v7286_v16 = vpop.f32.mrb[99].mxu0  ;;  %v4452_v24 = vadd.f32 %v7280_v37, %v7264_v1  ;;  %v4476_v51 = vmul.f32 %v7280_v37, %v7280_v37  ;;  %v7292_v33 = vpop.f32.mrb[99].mxu1 }
 0xdb2   :  { %v4443_v31 = vadd.f32 %v7286_v16, %v7266_v25  ;;  %v4475_v30 = vmul.f32 %v7286_v16, %v7286_v16  ;;  %v4461_v36 = vadd.f32 %v7292_v33, %v7268_v2  ;;  %v4477_v35 = vmul.f32 %v7292_v33, %v7292_v33 }
 0xdb3   :  { %v4486_v52 = vadd.f32 %v4474_v15, %v4470_v41  ;;  %v4504_v10 = vadd.f32 %v4476_v51, %v4472_v6 }
 0xdb4   :  { %v4495_v32 = vadd.f32 %v4475_v30, %v4471_v29  ;;  %v7302_v8 = vpop.f32.mrb[100].mxu0  ;;  %v4513_v44 = vadd.f32 %v4477_v35, %v4473_v7  ;;  %v7304_v53 = vpop.f32.mrb[100].mxu1 }
 0xdb5   :  { %v4435_v62 = vadd.f32 %v4434_v40, %v7302_v8  ;;  %v4478_v61 = vmul.f32 %v7302_v8, %v7302_v8  ;;  %v7309_v55 = vpop.f32.mrb[101].mxu0  ;;  %v4453_v20 = vadd.f32 %v4452_v24, %v7304_v53  ;;  %v4480_v21 = vmul.f32 %v7304_v53, %v7304_v53  ;;  %v7314_v47 = vpop.f32.mrb[101].mxu1 }
 0xdb6   :  { %v4444_v4 = vadd.f32 %v4443_v31, %v7309_v55  ;;  %v4479_v12 = vmul.f32 %v7309_v55, %v7309_v55  ;;  %v4462_v42 = vadd.f32 %v4461_v36, %v7314_v47  ;;  %v4481_v26 = vmul.f32 %v7314_v47, %v7314_v47 }
 0xdb7   :  { %v4487_v60 = vadd.f32 %v4486_v52, %v4478_v61  ;;  %v4505_v63 = vadd.f32 %v4504_v10, %v4480_v21 }
 0xdb8   :  { %v4496_v45 = vadd.f32 %v4495_v32, %v4479_v12  ;;  %v7322_v0 = vpop.f32.mrb[102].mxu0  ;;  %v4514_v11 = vadd.f32 %v4513_v44, %v4481_v26  ;;  %v7324_v48 = vpop.f32.mrb[102].mxu1 }
 0xdb9   :  { %v4436_v43 = vadd.f32 %v4435_v62, %v7322_v0  ;;  %v4482_v3 = vmul.f32 %v7322_v0, %v7322_v0  ;;  %v7329_v14 = vpop.f32.mrb[103].mxu0  ;;  %v4454_v27 = vadd.f32 %v4453_v20, %v7324_v48  ;;  %v4484_v58 = vmul.f32 %v7324_v48, %v7324_v48  ;;  %v7334_v23 = vpop.f32.mrb[103].mxu1 }
 0xdba   :  { %v4445_v34 = vadd.f32 %v4444_v4, %v7329_v14  ;;  %v4483_v6 = vmul.f32 %v7329_v14, %v7329_v14  ;;  %v4463_v41 = vadd.f32 %v4462_v42, %v7334_v23  ;;  %v4485_v29 = vmul.f32 %v7334_v23, %v7334_v23 }
 0xdbb   :  { %v4437_v7 = vrot.slane %v4436_v43, 4  ;;  %v4488_v40 = vadd.f32 %v4487_v60, %v4482_v3  ;;  %v4455_v15 = vrot.slane %v4454_v27, 4  ;;  %v4506_v24 = vadd.f32 %v4505_v63, %v4484_v58 }
 0xdbc   :  { %v4446_v51 = vrot.slane %v4445_v34, 4  ;;  %v4497_v31 = vadd.f32 %v4496_v45, %v4483_v6  ;;  %v4464_v30 = vrot.slane %v4463_v41, 4  ;;  %v4515_v36 = vadd.f32 %v4514_v11, %v4485_v29 }
 0xdbd   :  { %v4438_v35 = vadd.f32 %v4437_v7, %v4436_v43  ;;  %v4489_v52 = vrot.slane %v4488_v40, 4  ;;  %v4456_v10 = vadd.f32 %v4455_v15, %v4454_v27  ;;  %v4507_v32 = vrot.slane %v4506_v24, 4 }
 0xdbe   :  { %v4447_v44 = vadd.f32 %v4446_v51, %v4445_v34  ;;  %v4498_v62 = vrot.slane %v4497_v31, 4  ;;  %v4465_v61 = vadd.f32 %v4464_v30, %v4463_v41  ;;  %v4516_v20 = vrot.slane %v4515_v36, 4 }
 0xdbf   :  { %v4439_v21 = vrot.slane %v4438_v35, 2  ;;  %v4490_v4 = vadd.f32 %v4489_v52, %v4488_v40  ;;  %v4457_v12 = vrot.slane %v4456_v10, 2  ;;  %v4508_v42 = vadd.f32 %v4507_v32, %v4506_v24 }
 0xdc0   :  { %v4448_v26 = vrot.slane %v4447_v44, 2  ;;  %v4499_v60 = vadd.f32 %v4498_v62, %v4497_v31  ;;  %v4466_v3 = vrot.slane %v4465_v61, 2  ;;  %v4517_v63 = vadd.f32 %v4516_v20, %v4515_v36 }
 0xdc1   :  { %v4440_v58 = vadd.f32 %v4439_v21, %v4438_v35  ;;  %v4491_v45 = vrot.slane %v4490_v4, 2  ;;  %v4458_v6 = vadd.f32 %v4457_v12, %v4456_v10  ;;  %v4509_v11 = vrot.slane %v4508_v42, 2 }
 0xdc2   :  { %v4449_v43 = vadd.f32 %v4448_v26, %v4447_v44  ;;  %v4500_v29 = vrot.slane %v4499_v60, 2  ;;  %v4467_v27 = vadd.f32 %v4466_v3, %v4465_v61  ;;  %v4518_v7 = vrot.slane %v4517_v63, 2 }
 0xdc3   :  { %v4441_v34 = vrot.slane %v4440_v58, 1  ;;  %v4492_v15 = vadd.f32 %v4491_v45, %v4490_v4  ;;  %v4510_v41 = vadd.f32 %v4509_v11, %v4508_v42  ;;  %v4459_v40 = vrot.slane %v4458_v6, 1 }
 0xdc4   :  { %v4450_v51 = vrot.slane %v4449_v43, 1  ;;  %v4501_v30 = vadd.f32 %v4500_v29, %v4499_v60  ;;  %v4519_v52 = vadd.f32 %v4518_v7, %v4517_v63  ;;  %v4468_v35 = vrot.slane %v4467_v27, 1 }
 0xdc5   :  { %v4442_v24 = vadd.f32 %v4441_v34, %v4440_v58  ;;  %v4493_v32 = vrot.slane %v4492_v15, 1  ;;  %v4511_v36 = vrot.slane %v4510_v41, 1  ;;  %v4460_v44 = vadd.f32 %v4459_v40, %v4458_v6  ;;  %v4984_v34 = vld [vmem:[%s7427_s3 + $0x16] sm:$0x3]  ;;  %s5282_s3 = smov [#allocation6]  }
 0xdc6   :  { %v4451_v31 = vadd.f32 %v4450_v51, %v4449_v43  ;;  %v4502_v62 = vrot.slane %v4501_v30, 1  ;;  %v4520_v12 = vrot.slane %v4519_v52, 1  ;;  %v4469_v4 = vadd.f32 %v4468_v35, %v4467_v27  ;;  %s4865_s19 = sshll.u32 %s5282_s3, 4  ;;  %s4866_s19 = int_to_ptr.vmem [resolvable:$true] %s4865_s19 }
 0xdc7   :  { %v4494_v20 = vadd.f32 %v4493_v32, %v4492_v15  ;;  %v4512_v26 = vadd.f32 %v4511_v36, %v4510_v41  ;;  %s5249_s20 = scalar_lea.vmem %s4866_s19, 64  ;;  %p5254_p9 = scmp.lt.s32.totalorder %s4866_s19, %s4866_s19 }
 0xdc8   :  { %v4503_v10 = vadd.f32 %v4502_v62, %v4501_v30  ;;  %v4522_v21 = vadd.f32 %v4451_v31, %v4442_v24  ;;  %v4521_v45 = vadd.f32 %v4520_v12, %v4519_v52  ;;  %p5250_p8 = scmp.ne.s32.totalorder %s4866_s19, %s5249_s20  ;;  %p5255_p10 = scmp.lt.s32.totalorder %s5249_s20, %s5249_s20 }
 0xdca   :  { %v4526_v61 = vadd.f32 %v4503_v10, %v4494_v20  ;;  %v4523_v3 = vadd.f32 %v4522_v21, %v4460_v44  ;;  %p5256_p11 = por %p5255_p10, %p5254_p9 }
 0xdcc   :  { %v4527_v42 = vadd.f32 %v4526_v61, %v4512_v26  ;;  %v4524_v60 = vadd.f32 %v4523_v3, %v4469_v4  ;;  %p5257_p12 = pnand %p5256_p11, %p5250_p8 }
 0xdce   :  { %v4525_v11 = vmul.f32 0.0078125, %v4524_v60  ;;  %v4528_v63 = vadd.f32 %v4527_v42, %v4521_v45 }
 0xdd0   :  { %v4529_v58 = vmul.f32 0.0078125, %v4528_v63  ;;  %v4530_v29 = vmul.f32 %v4525_v11, %v4525_v11 }
 0xdd2   :  { %v4531_v43 = vsub.f32 %v4529_v58, %v4530_v29  ;;  %v7647_v29 = vmax.f32 %v7031_v18, 0.0 }
 0xdd4   :  { %v4532_v7 = vadd.f32 1e-05, %v4531_v43 }
 0xdd6   :  { %5225 = vrsqrt.f32 %v4532_v7  ;;  %v7648_v7 = vmax.f32 %v7035_v54, 0.0 }
 0xde0   :  { %v5226_v6 = vpop.eup %5225 }
 0xde1   :  { %v4534_v15 = vmul.f32 %v5226_v6, %v4984_v34  ;;  %v7649_v6 = vmax.f32 %v7039_v19, 0.0 }
 0xde3   :  { %v4535_v51 = vmul.f32 %v4534_v15, %v4525_v11  ;;  %v4543_v41 = vrot.slane %v4534_v15, %v5509_v49  ;;  %v7646_v11 = vmax.f32 %v7027_v22, 0.0 }
 0xde5   :  { %v4537_v27 = vrot.slane %v4535_v51, 7  ;;  %v4559_v30 = vmul.f32 %v4543_v41, %v7334_v23  ;;  %v4545_v40 = vmul.f32 %v4543_v41, %v7266_v25  ;;  %v4549_v52 = vmul.f32 %v4543_v41, %v7286_v16 }
 0xde6   :  { %v4547_v24 = vmul.f32 %v4543_v41, %v7268_v2  ;;  %v4551_v32 = vmul.f32 %v4543_v41, %v7292_v33  ;;  %v4544_v31 = vmul.f32 %v4543_v41, %v7262_v28  ;;  %v4548_v62 = vmul.f32 %v4543_v41, %v7276_v9 }
 0xde7   :  { %v4539_v36 = vsub.f32 %v4984_v34, %v4537_v27  ;;  %v4546_v35 = vmul.f32 %v4543_v41, %v7264_v1  ;;  %v4550_v20 = vmul.f32 %v4543_v41, %v7280_v37  ;;  %v4553_v10 = vmul.f32 %v4543_v41, %v7309_v55 }
 0xde8   :  { %v4557_v23 = vmul.f32 %v4543_v41, %v7329_v14  ;;  %v4555_v25 = vmul.f32 %v4543_v41, %v7314_v47  ;;  %v4552_v16 = vmul.f32 %v4543_v41, %v7302_v8  ;;  %v4556_v2 = vmul.f32 %v4543_v41, %v7322_v0 }
 0xde9   :  { %v4563_v33 = vrot.slane %v4539_v36, %v5513_v59  ;;  %v4554_v28 = vmul.f32 %v4543_v41, %v7304_v53  ;;  %v4558_v9 = vmul.f32 %v4543_v41, %v7324_v48  ;;  %v7644_v53 = vmax.f32 %v7019_v57, 0.0 }
 0xdea   :  { %v7645_v48 = vmax.f32 %v7023_v5, 0.0  ;;  %v7650_v5 = vmax.f32 %v7046_v38, 0.0  ;;  %v7652_v38 = vmax.f32 %v7071_v56, 0.0 }
 0xdeb   :  { %v4579_v21 = vadd.f32 %v4563_v33, %v4559_v30  ;;  %v4565_v1 = vadd.f32 %v4563_v33, %v4545_v40  ;;  %v4569_v44 = vadd.f32 %v4563_v33, %v4549_v52  ;;  %v4567_v37 = vadd.f32 %v4563_v33, %v4547_v24 }
 0xdec   :  { %v4571_v12 = vadd.f32 %v4563_v33, %v4551_v32  ;;  %v4564_v55 = vadd.f32 %v4563_v33, %v4544_v31  ;;  %v4568_v61 = vadd.f32 %v4563_v33, %v4548_v62  ;;  %v4566_v14 = vadd.f32 %v4563_v33, %v4546_v35 }
 0xded   :  { %v4595_v26 = vmax.f32 %v4579_v21, 0.0  ;;  %v4581_v47 = vmax.f32 %v4565_v1, 0.0  ;;  %v4585_v3 = vmax.f32 %v4569_v44, 0.0  ;;  %v4583_v8 = vmax.f32 %v4567_v37, 0.0 }
 0xdee   :  { %v4587_v4 = vmax.f32 %v4571_v12, 0.0  ;;  %v4580_v0 = vmax.f32 %v4564_v55, 0.0  ;;  %v4584_v42 = vmax.f32 %v4568_v61, 0.0  ;;  %v4570_v59 = vadd.f32 %v4563_v33, %v4550_v20 }
 0xdef   :  { %v4597_v45 = vadd.f32 %v4581_v47, %v7644_v53  ;;  %v4601_v60 = vadd.f32 %v4585_v3, %v7645_v48  ;;  %v4599_v63 = vadd.f32 %v4583_v8, %v7646_v11  ;;  %v4582_v58 = vmax.f32 %v4566_v14, 0.0 }
 0xdf0   :  { %v4603_v43 = vadd.f32 %v4587_v4, %v7647_v29  ;;  %v4596_v34 = vadd.f32 %v4580_v0, %v7648_v7  ;;  %v4600_v15 = vadd.f32 %v4584_v42, %v7649_v6  ;;  %v4586_v51 = vmax.f32 %v4570_v59, 0.0  ;;  %v7656_v59 = vld [vmem:[#allocation13_spill] sm:$0xff]  ;;  %v7662_v7 = vld [vmem:[#allocation12_spill] sm:$0xff] }
 0xdf1   :  { %v4613_v41 = vmax.f32 %v4597_v45, 0.0  ;;  %v4617_v57 = vmax.f32 %v4601_v60, 0.0  ;;  %v4615_v27 = vmax.f32 %v4599_v63, 0.0  ;;  %v4598_v30 = vadd.f32 %v4582_v58, %v7650_v5  ;;  %v7660_v60 = vld [vmem:[#allocation10_spill] sm:$0xff]  ;;  %v4632_v5 = vld [vmem:[#allocation3 + $0x178] sm:$0xff] }
 0xdf2   :  { %v4619_v40 = vmax.f32 %v4603_v43, 0.0  ;;  %v4612_v22 = vmax.f32 %v4596_v34, 0.0  ;;  %v4616_v52 = vmax.f32 %v4600_v15, 0.0  ;;  %v7651_v24 = vmax.f32 %v7053_v50, 0.0 }
 0xdf3   :  { %v5177_v32 = vpack.c.bf16 %v4617_v57, %v4613_v41  ;;  %v4614_v31 = vmax.f32 %v4598_v30, 0.0  ;;  %v4573_v54 = vadd.f32 %v4563_v33, %v4553_v10  ;;  %v4577_v62 = vadd.f32 %v4563_v33, %v4557_v23  ;;  %v4629_v41 = vld [vmem:[#allocation3 + $0x160] sm:$0xff]  ;;  %v4630_v57 = vld [vmem:[#allocation3 + $0x168] sm:$0xff]  ;;  %v4815_v30 = vpop.permute.xlu0 %4814 }
 0xdf4   :  { %v4602_v18 = vadd.f32 %v4586_v51, %v7651_v24  ;;  %v5185_v36 = vpack.c.bf16 %v4619_v40, %v4615_v27  ;;  %v5179_v19 = vpack.c.bf16 %v4616_v52, %v4612_v22  ;;  %v4575_v20 = vadd.f32 %v4563_v33, %v4555_v25  ;;  %v4631_v27 = vld [vmem:[#allocation3 + $0x170] sm:$0xff] }
 0xdf5   :  { %5178 = vmatprep.subr.bf16.mxu0 %v5177_v32  ;;  %v4589_v21 = vmax.f32 %v4573_v54, 0.0  ;;  %v4593_v1 = vmax.f32 %v4577_v62, 0.0  ;;  %v4611_v44 = vadd.f32 %v4595_v26, %v7652_v38  ;;  %v4572_v37 = vadd.f32 %v4563_v33, %v4552_v16 }
 0xdf6   :  { %v4618_v35 = vmax.f32 %v4602_v18, 0.0  ;;  %5186 = vmatprep.subr.bf16.mxu1 %v5185_v36  ;;  %5180 = vmatpush1.bf16.msra.mxu0 %v5179_v19  ;;  %v4591_v50 = vmax.f32 %v4575_v20, 0.0  ;;  %v4576_v55 = vadd.f32 %v4563_v33, %v4556_v2  ;;  %v4574_v61 = vadd.f32 %v4563_v33, %v4554_v28  ;;  %v7664_v36 = vld [vmem:[#allocation9_spill] sm:$0xff] }
 0xdf7   :  { %v7653_v10 = vmax.f32 %v7079_v17, 0.0  ;;  %v7654_v14 = vmax.f32 %v7083_v13, 0.0  ;;  %v4627_v25 = vmax.f32 %v4611_v44, 0.0  ;;  %v4588_v3 = vmax.f32 %v4572_v37, 0.0  ;;  %v7658_v17 = vld [vmem:[#allocation11_spill] sm:$0xff] }
 0xdf8   :  { %v5187_v12 = vpack.c.bf16 %v4618_v35, %v4614_v31  ;;  %v7655_v8 = vmax.f32 %v7088_v46, 0.0  ;;  %v4592_v26 = vmax.f32 %v4576_v55, 0.0  ;;  %v4578_v16 = vadd.f32 %v4563_v33, %v4558_v9 }
 0xdf9   :  { %v4605_v23 = vadd.f32 %v4589_v21, %v7653_v10  ;;  %v4609_v47 = vadd.f32 %v4593_v1, %v7654_v14  ;;  %v4590_v4 = vmax.f32 %v4574_v61, 0.0  ;;  %v7657_v2 = vmax.f32 %v7656_v59, 0.0 }
 0xdfa   :  { %5188 = vmatpush1.bf16.msra.mxu1 %v5187_v12  ;;  %v4607_v56 = vadd.f32 %v4591_v50, %v7655_v8  ;;  %v7659_v45 = vmax.f32 %v7658_v17, 0.0  ;;  %v4594_v13 = vmax.f32 %v4578_v16, 0.0  ;;  %v7661_v11 = vmax.f32 %v7660_v60, 0.0 }
 0xdfb   :  { %v4621_v0 = vmax.f32 %v4605_v23, 0.0  ;;  %v4625_v42 = vmax.f32 %v4609_v47, 0.0  ;;  %v4604_v28 = vadd.f32 %v4588_v3, %v7657_v2  ;;  %v7663_v33 = vmax.f32 %v7662_v7, 0.0 }
 0xdfc   :  { %v4623_v53 = vmax.f32 %v4607_v56, 0.0  ;;  %v4608_v48 = vadd.f32 %v4592_v26, %v7659_v45  ;;  %v4606_v63 = vadd.f32 %v4590_v4, %v7661_v11  ;;  %v5281_v40 = vmov 1966171168  }
 0xdfd   :  { %v5181_v58 = vpack.c.bf16 %v4625_v42, %v4621_v0  ;;  %v4620_v29 = vmax.f32 %v4604_v28, 0.0  ;;  %v4610_v9 = vadd.f32 %v4594_v13, %v7663_v33  ;;  %v4832_v22 = vunpack.c.l.s4 %v5281_v40 }
 0xdfe   :  { %v5189_v46 = vpack.c.bf16 %v4627_v25, %v4623_v53  ;;  %v4624_v43 = vmax.f32 %v4608_v48, 0.0  ;;  %v4622_v34 = vmax.f32 %v4606_v63, 0.0  ;;  %v4820_v52 = vrot.slane %v4815_v30, %v5509_v49 }
 0xdff   :  { %5182 = vmatprep.subr.bf16.mxu0 %v5181_v58  ;;  %v4626_v15 = vmax.f32 %v4610_v9, 0.0  ;;  %v4833_v24 = vunpack.c.0.s8 %v4832_v22  ;;  %v7665_v47 = vlaneseq }
 0xe00   :  { %5190 = vmatprep.subr.bf16.mxu1 %v5189_v46  ;;  %v5183_v6 = vpack.c.bf16 %v4624_v43, %v4620_v29 }
 0xe01   :  { %v5191_v51 = vpack.c.bf16 %v4626_v15, %v4622_v34  ;;  %v4836_v19 = vsub.s32 %v4833_v24, %v7664_v36  ;;  %vm4856_vm3 = vcmp.lt.s32.totalorder %v7665_v47, 512 }
 0xe02   :  { %5184 = vmatpush1.bf16.msra.mxu0 %v5183_v6 }
 0xe03   :  { %5192 = vmatpush1.bf16.msra.mxu1 %v5191_v51 }
 0xe05   :  { %4993 = vmatmul.mubr.msk.f32.vlgmr.msra.gmra.mrb[104].mxu0 %vm493_vm2, %v4629_v41 }
 0xe06   :  { %4715 = vmatprep.mubr.f32.mxu0 %v7547_v39  ;;  %4997 = vmatmul.mubr.msk.f32.vlgmr.msra.gmra.mrb[104].mxu1 %vm493_vm2, %v4629_v41 }
 0xe07   :  { %4798 = vmatprep.mubr.f32.mxu1 %v7547_v39 }
 0xe09   :  { %4994 = vmatmul.mubr.msk.f32.gmra.mrb[106].mxu0 %vm493_vm2, %v4630_v57 }
 0xe0a   :  { %4719 = vmatprep.mubr.f32.mxu0 %v7547_v39  ;;  %4998 = vmatmul.mubr.msk.f32.gmra.mrb[106].mxu1 %vm493_vm2, %v4630_v57 }
 0xe0b   :  { %4802 = vmatprep.mubr.f32.mxu1 %v7547_v39 }
 0xe0d   :  { %4995 = vmatmul.mubr.msk.f32.gmra.mrb[108].mxu0 %vm493_vm2, %v4631_v27 }
 0xe0e   :  { %4723 = vmatprep.mubr.f32.mxu0 %v7547_v39  ;;  %4999 = vmatmul.mubr.msk.f32.gmra.mrb[108].mxu1 %vm493_vm2, %v4631_v27 }
 0xe0f   :  { %4806 = vmatprep.mubr.f32.mxu1 %v7547_v39 }
 0xe11   :  { %4996 = vmatmul.mubr.msk.f32.gmra.mrb[110].mxu0 %vm493_vm2, %v4632_v5 }
 0xe12   :  { %5000 = vmatmul.mubr.msk.f32.gmra.mrb[110].mxu1 %vm493_vm2, %v4632_v5 }
 0xed8   :  { %v4711_v18 = vpop.f32.mrb[104].mxu0 }
 0xed9   :  { %v4821_v32 = vadd.f32 %v4820_v52, %v4711_v18  ;;  %v4713_v31 = vpop.f32.mrb[105].mxu0  ;;  %v4794_v54 = vpop.f32.mrb[104].mxu1 }
 0xeda   :  { %v4822_v62 = vadd.f32 %v4820_v52, %v4713_v31  ;;  %v4823_v35 = vadd.f32 %v4820_v52, %v4794_v54  ;;  %v4796_v20 = vpop.f32.mrb[105].mxu1 }
 0xedb   :  { %v4824_v21 = vadd.f32 %v4820_v52, %v4796_v20 }
 0xedc   :  { %v4829_v39 = vcombine.low %v4821_v32, %v4822_v62  ;;  %v4717_v1 = vpop.f32.mrb[106].mxu0 }
 0xedd   :  { %v4718_v38 = vpop.f32.mrb[107].mxu0  ;;  %v4830_v37 = vcombine.low %v4823_v35, %v4824_v21  ;;  %v4800_v12 = vpop.f32.mrb[106].mxu1 }
 0xede   :  { %v4837_v44 = vrot.slane %v4829_v39, %v4836_v19  ;;  %v4801_v50 = vpop.f32.mrb[107].mxu1 }
 0xedf   :  { %v4844_v55 = vrot.slane %v4830_v37, %v4836_v19 }
 0xee0   :  { %v4721_v49 = vpop.f32.mrb[108].mxu0 }
 0xee1   :  { %v4722_v61 = vpop.f32.mrb[109].mxu0  ;;  %v4845_v10 = vcombine.low %v4837_v44, %v4844_v55  ;;  %v4804_v23 = vpop.f32.mrb[108].mxu1 }
 0xee2   :  { %v4805_v14 = vpop.f32.mrb[109].mxu1 }
 0xee3   :  { %v4852_v3 = vrot.slane %v4845_v10, %v4836_v19 }
 0xee4   :  { %v4725_v25 = vpop.f32.mrb[110].mxu0 }
 0xee5   :  { %v4726_v8 = vpop.f32.mrb[111].mxu0  ;;  %v4808_v56 = vpop.f32.mrb[110].mxu1  ;;  %4858 = vst.msk [vmem:[#allocation6] sm:$0xf] %vm4856_vm3, %v4852_v3 }
 0xee6   :  { %v4809_v26 = vpop.f32.mrb[111].mxu1 }
 0xee7   :  { %5260 = shalt.err (!%p5257_p12)
}
 0xee8   :  { %s5261_s23 = scalar_lea.hbm %s7429_s5, 64 }
 0xee9   :  { %p5262_p13 = scmp.ne.s32.totalorder %s7429_s5, %s5261_s23  ;;  %p5265_p0 = scmp.lt.u32.totalorder %s5261_s23, %s7429_s5 }
 0xeeb   :  { %p5267_p1 = pnand %p5265_p0, %p5262_p13 }
 0xeed   :  { %5270 = shalt.err (!%p5267_p1)
}
 0xeee   :  { %4868 = dma.vmem_to_hbm [thread:$0]  %s4866_s19, 64, %s7429_s5, [#allocation5]  }
 0xeef   :  { %5273 = dma.done.wait [#allocation5], 64  }
 0xef0   :  { %5274 = vsyncadd [#allocation5], 4294967232 }
 0xef1   :  { %4872 = vsyncpa [#allocation4], 1 }
 0xef2   :  { %4873 = vsyncpa [#allocation5], 1 }

</bundles_post_ra>
